<compile_context>
chip_gen: v7x
topology: tpu7x:2x2x1
jax: 0.10.0
libtpu: 0.0.40
codegen_flags: <defaults>
</compile_context>

<pallas_src>
import functools
import math

import jax
import jax.numpy as jnp
from jax.experimental import pallas as pl
from jax.experimental.pallas import tpu as pltpu

LANE = 128  # TPU lane width: padded per-gate block width == padded hidden width.


def _make_lstm_kernel(num_layers, hidden, seq_len, batch, output_size):
    """Builds the kernel closed over static sizes.

    Ref order:
      x (B, T, I) f32,
      layer 0: w_in0 (I, 4*LANE) bf16, w_hh0 (LANE, 4*LANE) bf16, b0 (1, 4*LANE) f32,
      layer l>=1: w_cat_l (2*LANE, 4*LANE) bf16, b_l (1, 4*LANE) f32,
      w_lin (O, LANE) f32, b_lin (1, O) f32,
      out (B, O) f32.
    """
    H, T, B, O = hidden, seq_len, batch, output_size
    GP = LANE  # padded gate block width

    def kernel(*refs):
        # --- unpack refs ----------------------------------------------------
        x_ref = refs[0]
        pos = 1
        layer_refs = []
        for l in range(num_layers):
            n = 3 if l == 0 else 2
            layer_refs.append(refs[pos:pos + n])
            pos += n
        w_lin_ref = refs[pos]
        b_lin_ref = refs[pos + 1]
        out_ref = refs[pos + 2]

        # --- hoisted, loop-invariant values ----------------------------------
        xv = x_ref[...]                                   # (B, T, I) f32
        w_in0 = layer_refs[0][0][...]                     # (I, 4*GP) bf16 (small)
        # Per-layer fused bias, broadcast once (not per step).
        bias = [jnp.broadcast_to(layer_refs[l][-1][...], (B, 4 * GP))
                for l in range(num_layers)]

        # --- per-layer recurrent state, kept entirely in vregs ---------------
        h_f32 = [jnp.zeros((B, GP), jnp.float32) for _ in range(num_layers)]
        h_bf = [jnp.zeros((B, GP), jnp.bfloat16) for _ in range(num_layers)]
        c = [jnp.zeros((B, GP), jnp.float32) for _ in range(num_layers)]

        def cell(l, t):
            """One LSTM cell update for (layer l, timestep t)."""
            if l == 0:
                # Input projection depends only on x -> off the serial chain.
                x_t = xv[:, t, :].astype(jnp.bfloat16)            # (B, I)
                z = (jnp.dot(x_t, w_in0, preferred_element_type=jnp.float32)
                     + jnp.dot(h_bf[0], layer_refs[0][1][...],
                               preferred_element_type=jnp.float32)
                     + bias[0])
            else:
                # Fused input-side + recurrent projection: one MXU op per step.
                hin = jnp.concatenate([h_bf[l - 1], h_bf[l]], axis=-1)  # (B, 2*GP)
                z = (jnp.dot(hin, layer_refs[l][0][...],
                             preferred_element_type=jnp.float32)
                     + bias[l])
            # Gate blocks are whole 128-lane slices (PyTorch gate order i,f,g,o).
            i_g = jax.nn.sigmoid(z[:, 0 * GP:1 * GP])
            f_g = jax.nn.sigmoid(z[:, 1 * GP:2 * GP])
            g_g = jnp.tanh(z[:, 2 * GP:3 * GP])
            o_g = jax.nn.sigmoid(z[:, 3 * GP:4 * GP])
            c_new = f_g * c[l] + i_g * g_g
            h_new = o_g * jnp.tanh(c_new)
            c[l] = c_new
            h_f32[l] = h_new
            h_bf[l] = h_new.astype(jnp.bfloat16)

        # --- wavefront over (layer, time) -------------------------------------
        # Wave s computes cell(l, s - l).  Layers are visited top-down within a
        # wave so each cell reads the previous wave's states before they are
        # overwritten.  Fully unrolled (T and num_layers are small and static).
        for s in range(T + num_layers - 1):
            for l in range(num_layers - 1, -1, -1):
                t = s - l
                if 0 <= t < T:
                    cell(l, t)

        # --- Linear head on the last layer's final hidden state ---------------
        h_last = h_f32[num_layers - 1]                    # (B, GP) f32, pad lanes 0
        if O == 1:
            # VPU broadcast-multiply + lane reduce; avoids a 1-column MXU result.
            pred = (jnp.sum(h_last * w_lin_ref[...], axis=-1, keepdims=True)
                    + b_lin_ref[...])
        else:
            pred = (jax.lax.dot_general(
                        h_last.astype(jnp.bfloat16),
                        w_lin_ref[...].astype(jnp.bfloat16),
                        (((1,), (1,)), ((), ())),
                        preferred_element_type=jnp.float32)
                    + b_lin_ref[...])
        out_ref[...] = pred.astype(out_ref.dtype)

    return kernel


def init_lstm_params(key, input_size, hidden_layers, output_size=1):
    """Canonical (PyTorch-convention) f32 parameters for nn.LSTM + nn.Linear."""
    assert all(h == hidden_layers[0] for h in hidden_layers), (
        "nn.LSTM uses one hidden size; all hidden_layers entries must match")
    num_layers = len(hidden_layers)
    H = hidden_layers[0]
    scale = 1.0 / math.sqrt(H)
    layers = []
    for l in range(num_layers):
        in_l = input_size if l == 0 else H
        key, k1, k2, k3, k4 = jax.random.split(key, 5)
        layers.append((
            jax.random.uniform(k1, (4 * H, in_l), jnp.float32, -scale, scale),  # w_ih
            jax.random.uniform(k2, (4 * H, H), jnp.float32, -scale, scale),     # w_hh
            jax.random.uniform(k3, (4 * H,), jnp.float32, -scale, scale),       # b_ih
            jax.random.uniform(k4, (4 * H,), jnp.float32, -scale, scale),       # b_hh
        ))
    key, k5, k6 = jax.random.split(key, 3)
    head = (jax.random.uniform(k5, (output_size, H), jnp.float32, -scale, scale),  # w_lin
            jax.random.uniform(k6, (output_size,), jnp.float32, -scale, scale))    # b_lin
    return layers, head


def _scatter_gate_cols(w_t, H):
    """(in, 4H) -> (in, 4*LANE): each gate in its own zero-padded 128-lane block."""
    in_dim = w_t.shape[0]
    out = jnp.zeros((in_dim, 4 * LANE), w_t.dtype)
    for g in range(4):
        out = out.at[:, g * LANE:g * LANE + H].set(w_t[:, g * H:(g + 1) * H])
    return out


def pack_params(layers, head, hidden, output_size):
    """One-time packing into the kernel layout (transposed, gate-padded, bf16
    matmul weights; fused f32 biases).  The forward wrapper does no per-call
    parameter work at all."""
    H = hidden
    packed = []
    for l, (w_ih, w_hh, b_ih, b_hh) in enumerate(layers):
        w_ih_g = _scatter_gate_cols(w_ih.T, H)            # (in_l, 4*LANE)
        w_hh_g = _scatter_gate_cols(w_hh.T, H)            # (H, 4*LANE)
        if l == 0:
            packed.append(w_ih_g.astype(jnp.bfloat16))                         # (I, 4*LANE)
            w_hh_p = jnp.zeros((LANE, 4 * LANE), jnp.float32).at[:H].set(w_hh_g)
            packed.append(w_hh_p.astype(jnp.bfloat16))                         # (LANE, 4*LANE)
        else:
            # Stacked weight for the fused [h^{l-1}_t, h^l_{t-1}] projection.
            w_cat = jnp.zeros((2 * LANE, 4 * LANE), jnp.float32)
            w_cat = w_cat.at[:H].set(w_ih_g)              # rows 0..H-1: input-side
            w_cat = w_cat.at[LANE:LANE + H].set(w_hh_g)   # rows LANE..LANE+H-1: recurrent
            packed.append(w_cat.astype(jnp.bfloat16))                          # (2*LANE, 4*LANE)
        b = b_ih + b_hh                                   # fused bias (4H,)
        b_p = jnp.zeros((1, 4 * LANE), jnp.float32)
        for g in range(4):
            b_p = b_p.at[0, g * LANE:g * LANE + H].set(b[g * H:(g + 1) * H])
        packed.append(b_p)                                                     # (1, 4*LANE) f32
    w_lin, b_lin = head
    w_lin_p = jnp.zeros((output_size, LANE), jnp.float32).at[:, :H].set(w_lin)
    packed.append(w_lin_p)                                                     # (O, LANE) f32
    packed.append(b_lin.reshape(1, output_size))                               # (1, O) f32
    return packed


@functools.partial(jax.jit, static_argnames=("num_layers", "hidden", "output_size"))
def lstm_forward(x_btI, packed_params, *, num_layers, hidden, output_size):
    """x_btI: (B, T, I) batch_first, as the PyTorch forward. Returns (B, output_size)."""
    B, T, _ = x_btI.shape
    kernel = _make_lstm_kernel(num_layers, hidden, T, B, output_size)
    n_in = 1 + len(packed_params)
    return pl.pallas_call(
        kernel,
        out_shape=jax.ShapeDtypeStruct((B, output_size), jnp.float32),
        in_specs=[pl.BlockSpec(memory_space=pltpu.MemorySpace.VMEM)] * n_in,
        out_specs=pl.BlockSpec(memory_space=pltpu.MemorySpace.VMEM),
    )(x_btI, *packed_params)


def lstm_forward_ref(x_btI, layers, head):
    """Pure-JAX f32 reference on the canonical (PyTorch-convention) parameters."""
    B, T, _ = x_btI.shape
    H = layers[0][1].shape[1]
    hs = [jnp.zeros((B, H), jnp.float32) for _ in layers]
    cs = [jnp.zeros((B, H), jnp.float32) for _ in layers]
    for t in range(T):
        inp = x_btI[:, t, :]
        for l, (w_ih, w_hh, b_ih, b_hh) in enumerate(layers):
            z = inp @ w_ih.T + hs[l] @ w_hh.T + b_ih + b_hh
            i_g = jax.nn.sigmoid(z[:, 0:H])
            f_g = jax.nn.sigmoid(z[:, H:2 * H])
            g_g = jnp.tanh(z[:, 2 * H:3 * H])
            o_g = jax.nn.sigmoid(z[:, 3 * H:4 * H])
            cs[l] = f_g * cs[l] + i_g * g_g
            hs[l] = o_g * jnp.tanh(cs[l])
            inp = hs[l]
    w_lin, b_lin = head
    return hs[-1] @ w_lin.T + b_lin


if __name__ == "__main__":
    # Shapes implied by the module: lstm(input_size=4, hidden_layers=[32, 32]),
    # batch_first input (B, T, input_size).
    input_size = 4
    hidden_layers = [32, 32]   # hidden size 32, 2 stacked layers
    output_size = 1
    B, T = 2, 8

    key = jax.random.PRNGKey(0)
    key, xk = jax.random.split(key)
    x = jax.random.normal(xk, (B, T, input_size), jnp.float32)

    layers, head = init_lstm_params(key, input_size, hidden_layers, output_size)
    packed = pack_params(layers, head, hidden_layers[0], output_size)

    out = lstm_forward(x, packed, num_layers=len(hidden_layers),
                       hidden=hidden_layers[0], output_size=output_size)
    out = jax.block_until_ready(out)

    ref = lstm_forward_ref(x, layers, head)
    assert out.shape == (B, output_size)
    # bf16 matmul operands (f32 accumulation) and the per-step bf16 cast of h
    # accumulate rounding over T recurrent steps -> loosened tolerance.
    assert jnp.allclose(out, ref, atol=3e-2, rtol=3e-2), (out, ref)

    print("KERNEL_OK")
</pallas_src>

<mosaic_0001>
module attributes {stable_mosaic.version = 11 : i64} {
  func.func @kernel(%arg0: memref<2x8x4xf32, #tpu.memory_space<vmem>>, %arg1: memref<4x512xbf16, #tpu.memory_space<vmem>>, %arg2: memref<128x512xbf16, #tpu.memory_space<vmem>>, %arg3: memref<1x512xf32, #tpu.memory_space<vmem>>, %arg4: memref<256x512xbf16, #tpu.memory_space<vmem>>, %arg5: memref<1x512xf32, #tpu.memory_space<vmem>>, %arg6: memref<1x128xf32, #tpu.memory_space<vmem>>, %arg7: memref<1x1xf32, #tpu.memory_space<vmem>>, %arg8: memref<2x1xf32, #tpu.memory_space<vmem>>) attributes {dimension_semantics = [], scalar_prefetch = 0 : i64, scratch_operands = 0 : i64, tpu.core_type = #tpu.core_type<tc>} {
    %c0 = arith.constant 0 : index
    %c0_0 = arith.constant 0 : index
    %c0_1 = arith.constant 0 : index
    %0 = vector.load %arg0[%c0, %c0_0, %c0_1] : memref<2x8x4xf32, #tpu.memory_space<vmem>>, vector<2x8x4xf32>
    %c0_2 = arith.constant 0 : index
    %c0_3 = arith.constant 0 : index
    %1 = vector.load %arg1[%c0_2, %c0_3] : memref<4x512xbf16, #tpu.memory_space<vmem>>, vector<4x512xbf16>
    %c0_4 = arith.constant 0 : index
    %c0_5 = arith.constant 0 : index
    %2 = vector.load %arg3[%c0_4, %c0_5] : memref<1x512xf32, #tpu.memory_space<vmem>>, vector<1x512xf32>
    %3 = vector.shape_cast %2 : vector<1x512xf32> to vector<1x512xf32>
    %4 = vector.broadcast %3 : vector<1x512xf32> to vector<2x512xf32>
    %c0_6 = arith.constant 0 : index
    %c0_7 = arith.constant 0 : index
    %5 = vector.load %arg5[%c0_6, %c0_7] : memref<1x512xf32, #tpu.memory_space<vmem>>, vector<1x512xf32>
    %6 = vector.shape_cast %5 : vector<1x512xf32> to vector<1x512xf32>
    %7 = vector.broadcast %6 : vector<1x512xf32> to vector<2x512xf32>
    %cst = arith.constant 0.000000e+00 : bf16
    %8 = vector.broadcast %cst : bf16 to vector<2x128xbf16>
    %cst_8 = arith.constant 0.000000e+00 : bf16
    %9 = vector.broadcast %cst_8 : bf16 to vector<2x128xbf16>
    %cst_9 = arith.constant 0.000000e+00 : f32
    %10 = vector.broadcast %cst_9 : f32 to vector<2x128xf32>
    %cst_10 = arith.constant 0.000000e+00 : f32
    %11 = vector.broadcast %cst_10 : f32 to vector<2x128xf32>
    %12 = vector.extract_strided_slice %0 {offsets = [0, 0, 0], sizes = [2, 1, 4], strides = [1, 1, 1]} : vector<2x8x4xf32> to vector<2x1x4xf32>
    %13 = vector.shape_cast %12 : vector<2x1x4xf32> to vector<2x4xf32>
    %14 = arith.truncf %13 : vector<2x4xf32> to vector<2x4xbf16>
    %cst_11 = arith.constant dense<0.000000e+00> : vector<2x512xf32>
    %15 = tpu.matmul %14, %1, %cst_11 {dimension_numbers = #tpu.dot_dimension_numbers<[1], [0], [0], [1], [0, 0, 1, 1], [], []>} : vector<2x4xbf16>, vector<4x512xbf16>, vector<2x512xf32> -> vector<2x512xf32>
    %c0_12 = arith.constant 0 : index
    %c0_13 = arith.constant 0 : index
    %16 = vector.load %arg2[%c0_12, %c0_13] : memref<128x512xbf16, #tpu.memory_space<vmem>>, vector<128x512xbf16>
    %cst_14 = arith.constant dense<0.000000e+00> : vector<2x512xf32>
    %17 = tpu.matmul %8, %16, %cst_14 {dimension_numbers = #tpu.dot_dimension_numbers<[1], [0], [0], [1], [0, 0, 1, 1], [], []>} : vector<2x128xbf16>, vector<128x512xbf16>, vector<2x512xf32> -> vector<2x512xf32>
    %18 = arith.addf %15, %17 : vector<2x512xf32>
    %19 = arith.addf %18, %4 : vector<2x512xf32>
    %20 = vector.extract_strided_slice %19 {offsets = [0, 0], sizes = [2, 128], strides = [1, 1]} : vector<2x512xf32> to vector<2x128xf32>
    %21 = arith.negf %20 : vector<2x128xf32>
    %22 = math.exp %21 : vector<2x128xf32>
    %cst_15 = arith.constant 1.000000e+00 : f32
    %23 = vector.broadcast %cst_15 : f32 to vector<2x128xf32>
    %24 = arith.addf %23, %22 : vector<2x128xf32>
    %25 = arith.divf %23, %24 : vector<2x128xf32>
    %26 = vector.extract_strided_slice %19 {offsets = [0, 128], sizes = [2, 128], strides = [1, 1]} : vector<2x512xf32> to vector<2x128xf32>
    %27 = arith.negf %26 : vector<2x128xf32>
    %28 = math.exp %27 : vector<2x128xf32>
    %cst_16 = arith.constant 1.000000e+00 : f32
    %29 = vector.broadcast %cst_16 : f32 to vector<2x128xf32>
    %30 = arith.addf %29, %28 : vector<2x128xf32>
    %31 = arith.divf %29, %30 : vector<2x128xf32>
    %32 = vector.extract_strided_slice %19 {offsets = [0, 256], sizes = [2, 128], strides = [1, 1]} : vector<2x512xf32> to vector<2x128xf32>
    %33 = math.tanh %32 : vector<2x128xf32>
    %34 = vector.extract_strided_slice %19 {offsets = [0, 384], sizes = [2, 128], strides = [1, 1]} : vector<2x512xf32> to vector<2x128xf32>
    %35 = arith.negf %34 : vector<2x128xf32>
    %36 = math.exp %35 : vector<2x128xf32>
    %cst_17 = arith.constant 1.000000e+00 : f32
    %37 = vector.broadcast %cst_17 : f32 to vector<2x128xf32>
    %38 = arith.addf %37, %36 : vector<2x128xf32>
    %39 = arith.divf %37, %38 : vector<2x128xf32>
    %40 = arith.mulf %31, %10 : vector<2x128xf32>
    %41 = arith.mulf %25, %33 : vector<2x128xf32>
    %42 = arith.addf %40, %41 : vector<2x128xf32>
    %43 = math.tanh %42 : vector<2x128xf32>
    %44 = arith.mulf %39, %43 : vector<2x128xf32>
    %45 = arith.truncf %44 : vector<2x128xf32> to vector<2x128xbf16>
    %46 = tpu.concatenate %45, %9 in 1 : vector<2x128xbf16>, vector<2x128xbf16> -> vector<2x256xbf16>
    %c0_18 = arith.constant 0 : index
    %c0_19 = arith.constant 0 : index
    %47 = vector.load %arg4[%c0_18, %c0_19] : memref<256x512xbf16, #tpu.memory_space<vmem>>, vector<256x512xbf16>
    %cst_20 = arith.constant dense<0.000000e+00> : vector<2x512xf32>
    %48 = tpu.matmul %46, %47, %cst_20 {dimension_numbers = #tpu.dot_dimension_numbers<[1], [0], [0], [1], [0, 0, 1, 1], [], []>} : vector<2x256xbf16>, vector<256x512xbf16>, vector<2x512xf32> -> vector<2x512xf32>
    %49 = arith.addf %48, %7 : vector<2x512xf32>
    %50 = vector.extract_strided_slice %49 {offsets = [0, 0], sizes = [2, 128], strides = [1, 1]} : vector<2x512xf32> to vector<2x128xf32>
    %51 = arith.negf %50 : vector<2x128xf32>
    %52 = math.exp %51 : vector<2x128xf32>
    %cst_21 = arith.constant 1.000000e+00 : f32
    %53 = vector.broadcast %cst_21 : f32 to vector<2x128xf32>
    %54 = arith.addf %53, %52 : vector<2x128xf32>
    %55 = arith.divf %53, %54 : vector<2x128xf32>
    %56 = vector.extract_strided_slice %49 {offsets = [0, 128], sizes = [2, 128], strides = [1, 1]} : vector<2x512xf32> to vector<2x128xf32>
    %57 = arith.negf %56 : vector<2x128xf32>
    %58 = math.exp %57 : vector<2x128xf32>
    %cst_22 = arith.constant 1.000000e+00 : f32
    %59 = vector.broadcast %cst_22 : f32 to vector<2x128xf32>
    %60 = arith.addf %59, %58 : vector<2x128xf32>
    %61 = arith.divf %59, %60 : vector<2x128xf32>
    %62 = vector.extract_strided_slice %49 {offsets = [0, 256], sizes = [2, 128], strides = [1, 1]} : vector<2x512xf32> to vector<2x128xf32>
    %63 = math.tanh %62 : vector<2x128xf32>
    %64 = vector.extract_strided_slice %49 {offsets = [0, 384], sizes = [2, 128], strides = [1, 1]} : vector<2x512xf32> to vector<2x128xf32>
    %65 = arith.negf %64 : vector<2x128xf32>
    %66 = math.exp %65 : vector<2x128xf32>
    %cst_23 = arith.constant 1.000000e+00 : f32
    %67 = vector.broadcast %cst_23 : f32 to vector<2x128xf32>
    %68 = arith.addf %67, %66 : vector<2x128xf32>
    %69 = arith.divf %67, %68 : vector<2x128xf32>
    %70 = arith.mulf %61, %11 : vector<2x128xf32>
    %71 = arith.mulf %55, %63 : vector<2x128xf32>
    %72 = arith.addf %70, %71 : vector<2x128xf32>
    %73 = math.tanh %72 : vector<2x128xf32>
    %74 = arith.mulf %69, %73 : vector<2x128xf32>
    %75 = arith.truncf %74 : vector<2x128xf32> to vector<2x128xbf16>
    %76 = vector.extract_strided_slice %0 {offsets = [0, 1, 0], sizes = [2, 1, 4], strides = [1, 1, 1]} : vector<2x8x4xf32> to vector<2x1x4xf32>
    %77 = vector.shape_cast %76 : vector<2x1x4xf32> to vector<2x4xf32>
    %78 = arith.truncf %77 : vector<2x4xf32> to vector<2x4xbf16>
    %cst_24 = arith.constant dense<0.000000e+00> : vector<2x512xf32>
    %79 = tpu.matmul %78, %1, %cst_24 {dimension_numbers = #tpu.dot_dimension_numbers<[1], [0], [0], [1], [0, 0, 1, 1], [], []>} : vector<2x4xbf16>, vector<4x512xbf16>, vector<2x512xf32> -> vector<2x512xf32>
    %c0_25 = arith.constant 0 : index
    %c0_26 = arith.constant 0 : index
    %80 = vector.load %arg2[%c0_25, %c0_26] : memref<128x512xbf16, #tpu.memory_space<vmem>>, vector<128x512xbf16>
    %cst_27 = arith.constant dense<0.000000e+00> : vector<2x512xf32>
    %81 = tpu.matmul %45, %80, %cst_27 {dimension_numbers = #tpu.dot_dimension_numbers<[1], [0], [0], [1], [0, 0, 1, 1], [], []>} : vector<2x128xbf16>, vector<128x512xbf16>, vector<2x512xf32> -> vector<2x512xf32>
    %82 = arith.addf %79, %81 : vector<2x512xf32>
    %83 = arith.addf %82, %4 : vector<2x512xf32>
    %84 = vector.extract_strided_slice %83 {offsets = [0, 0], sizes = [2, 128], strides = [1, 1]} : vector<2x512xf32> to vector<2x128xf32>
    %85 = arith.negf %84 : vector<2x128xf32>
    %86 = math.exp %85 : vector<2x128xf32>
    %cst_28 = arith.constant 1.000000e+00 : f32
    %87 = vector.broadcast %cst_28 : f32 to vector<2x128xf32>
    %88 = arith.addf %87, %86 : vector<2x128xf32>
    %89 = arith.divf %87, %88 : vector<2x128xf32>
    %90 = vector.extract_strided_slice %83 {offsets = [0, 128], sizes = [2, 128], strides = [1, 1]} : vector<2x512xf32> to vector<2x128xf32>
    %91 = arith.negf %90 : vector<2x128xf32>
    %92 = math.exp %91 : vector<2x128xf32>
    %cst_29 = arith.constant 1.000000e+00 : f32
    %93 = vector.broadcast %cst_29 : f32 to vector<2x128xf32>
    %94 = arith.addf %93, %92 : vector<2x128xf32>
    %95 = arith.divf %93, %94 : vector<2x128xf32>
    %96 = vector.extract_strided_slice %83 {offsets = [0, 256], sizes = [2, 128], strides = [1, 1]} : vector<2x512xf32> to vector<2x128xf32>
    %97 = math.tanh %96 : vector<2x128xf32>
    %98 = vector.extract_strided_slice %83 {offsets = [0, 384], sizes = [2, 128], strides = [1, 1]} : vector<2x512xf32> to vector<2x128xf32>
    %99 = arith.negf %98 : vector<2x128xf32>
    %100 = math.exp %99 : vector<2x128xf32>
    %cst_30 = arith.constant 1.000000e+00 : f32
    %101 = vector.broadcast %cst_30 : f32 to vector<2x128xf32>
    %102 = arith.addf %101, %100 : vector<2x128xf32>
    %103 = arith.divf %101, %102 : vector<2x128xf32>
    %104 = arith.mulf %95, %42 : vector<2x128xf32>
    %105 = arith.mulf %89, %97 : vector<2x128xf32>
    %106 = arith.addf %104, %105 : vector<2x128xf32>
    %107 = math.tanh %106 : vector<2x128xf32>
    %108 = arith.mulf %103, %107 : vector<2x128xf32>
    %109 = arith.truncf %108 : vector<2x128xf32> to vector<2x128xbf16>
    %110 = tpu.concatenate %109, %75 in 1 : vector<2x128xbf16>, vector<2x128xbf16> -> vector<2x256xbf16>
    %c0_31 = arith.constant 0 : index
    %c0_32 = arith.constant 0 : index
    %111 = vector.load %arg4[%c0_31, %c0_32] : memref<256x512xbf16, #tpu.memory_space<vmem>>, vector<256x512xbf16>
    %cst_33 = arith.constant dense<0.000000e+00> : vector<2x512xf32>
    %112 = tpu.matmul %110, %111, %cst_33 {dimension_numbers = #tpu.dot_dimension_numbers<[1], [0], [0], [1], [0, 0, 1, 1], [], []>} : vector<2x256xbf16>, vector<256x512xbf16>, vector<2x512xf32> -> vector<2x512xf32>
    %113 = arith.addf %112, %7 : vector<2x512xf32>
    %114 = vector.extract_strided_slice %113 {offsets = [0, 0], sizes = [2, 128], strides = [1, 1]} : vector<2x512xf32> to vector<2x128xf32>
    %115 = arith.negf %114 : vector<2x128xf32>
    %116 = math.exp %115 : vector<2x128xf32>
    %cst_34 = arith.constant 1.000000e+00 : f32
    %117 = vector.broadcast %cst_34 : f32 to vector<2x128xf32>
    %118 = arith.addf %117, %116 : vector<2x128xf32>
    %119 = arith.divf %117, %118 : vector<2x128xf32>
    %120 = vector.extract_strided_slice %113 {offsets = [0, 128], sizes = [2, 128], strides = [1, 1]} : vector<2x512xf32> to vector<2x128xf32>
    %121 = arith.negf %120 : vector<2x128xf32>
    %122 = math.exp %121 : vector<2x128xf32>
    %cst_35 = arith.constant 1.000000e+00 : f32
    %123 = vector.broadcast %cst_35 : f32 to vector<2x128xf32>
    %124 = arith.addf %123, %122 : vector<2x128xf32>
    %125 = arith.divf %123, %124 : vector<2x128xf32>
    %126 = vector.extract_strided_slice %113 {offsets = [0, 256], sizes = [2, 128], strides = [1, 1]} : vector<2x512xf32> to vector<2x128xf32>
    %127 = math.tanh %126 : vector<2x128xf32>
    %128 = vector.extract_strided_slice %113 {offsets = [0, 384], sizes = [2, 128], strides = [1, 1]} : vector<2x512xf32> to vector<2x128xf32>
    %129 = arith.negf %128 : vector<2x128xf32>
    %130 = math.exp %129 : vector<2x128xf32>
    %cst_36 = arith.constant 1.000000e+00 : f32
    %131 = vector.broadcast %cst_36 : f32 to vector<2x128xf32>
    %132 = arith.addf %131, %130 : vector<2x128xf32>
    %133 = arith.divf %131, %132 : vector<2x128xf32>
    %134 = arith.mulf %125, %72 : vector<2x128xf32>
    %135 = arith.mulf %119, %127 : vector<2x128xf32>
    %136 = arith.addf %134, %135 : vector<2x128xf32>
    %137 = math.tanh %136 : vector<2x128xf32>
    %138 = arith.mulf %133, %137 : vector<2x128xf32>
    %139 = arith.truncf %138 : vector<2x128xf32> to vector<2x128xbf16>
    %140 = vector.extract_strided_slice %0 {offsets = [0, 2, 0], sizes = [2, 1, 4], strides = [1, 1, 1]} : vector<2x8x4xf32> to vector<2x1x4xf32>
    %141 = vector.shape_cast %140 : vector<2x1x4xf32> to vector<2x4xf32>
    %142 = arith.truncf %141 : vector<2x4xf32> to vector<2x4xbf16>
    %cst_37 = arith.constant dense<0.000000e+00> : vector<2x512xf32>
    %143 = tpu.matmul %142, %1, %cst_37 {dimension_numbers = #tpu.dot_dimension_numbers<[1], [0], [0], [1], [0, 0, 1, 1], [], []>} : vector<2x4xbf16>, vector<4x512xbf16>, vector<2x512xf32> -> vector<2x512xf32>
    %c0_38 = arith.constant 0 : index
    %c0_39 = arith.constant 0 : index
    %144 = vector.load %arg2[%c0_38, %c0_39] : memref<128x512xbf16, #tpu.memory_space<vmem>>, vector<128x512xbf16>
    %cst_40 = arith.constant dense<0.000000e+00> : vector<2x512xf32>
    %145 = tpu.matmul %109, %144, %cst_40 {dimension_numbers = #tpu.dot_dimension_numbers<[1], [0], [0], [1], [0, 0, 1, 1], [], []>} : vector<2x128xbf16>, vector<128x512xbf16>, vector<2x512xf32> -> vector<2x512xf32>
    %146 = arith.addf %143, %145 : vector<2x512xf32>
    %147 = arith.addf %146, %4 : vector<2x512xf32>
    %148 = vector.extract_strided_slice %147 {offsets = [0, 0], sizes = [2, 128], strides = [1, 1]} : vector<2x512xf32> to vector<2x128xf32>
    %149 = arith.negf %148 : vector<2x128xf32>
    %150 = math.exp %149 : vector<2x128xf32>
    %cst_41 = arith.constant 1.000000e+00 : f32
    %151 = vector.broadcast %cst_41 : f32 to vector<2x128xf32>
    %152 = arith.addf %151, %150 : vector<2x128xf32>
    %153 = arith.divf %151, %152 : vector<2x128xf32>
    %154 = vector.extract_strided_slice %147 {offsets = [0, 128], sizes = [2, 128], strides = [1, 1]} : vector<2x512xf32> to vector<2x128xf32>
    %155 = arith.negf %154 : vector<2x128xf32>
    %156 = math.exp %155 : vector<2x128xf32>
    %cst_42 = arith.constant 1.000000e+00 : f32
    %157 = vector.broadcast %cst_42 : f32 to vector<2x128xf32>
    %158 = arith.addf %157, %156 : vector<2x128xf32>
    %159 = arith.divf %157, %158 : vector<2x128xf32>
    %160 = vector.extract_strided_slice %147 {offsets = [0, 256], sizes = [2, 128], strides = [1, 1]} : vector<2x512xf32> to vector<2x128xf32>
    %161 = math.tanh %160 : vector<2x128xf32>
    %162 = vector.extract_strided_slice %147 {offsets = [0, 384], sizes = [2, 128], strides = [1, 1]} : vector<2x512xf32> to vector<2x128xf32>
    %163 = arith.negf %162 : vector<2x128xf32>
    %164 = math.exp %163 : vector<2x128xf32>
    %cst_43 = arith.constant 1.000000e+00 : f32
    %165 = vector.broadcast %cst_43 : f32 to vector<2x128xf32>
    %166 = arith.addf %165, %164 : vector<2x128xf32>
    %167 = arith.divf %165, %166 : vector<2x128xf32>
    %168 = arith.mulf %159, %106 : vector<2x128xf32>
    %169 = arith.mulf %153, %161 : vector<2x128xf32>
    %170 = arith.addf %168, %169 : vector<2x128xf32>
    %171 = math.tanh %170 : vector<2x128xf32>
    %172 = arith.mulf %167, %171 : vector<2x128xf32>
    %173 = arith.truncf %172 : vector<2x128xf32> to vector<2x128xbf16>
    %174 = tpu.concatenate %173, %139 in 1 : vector<2x128xbf16>, vector<2x128xbf16> -> vector<2x256xbf16>
    %c0_44 = arith.constant 0 : index
    %c0_45 = arith.constant 0 : index
    %175 = vector.load %arg4[%c0_44, %c0_45] : memref<256x512xbf16, #tpu.memory_space<vmem>>, vector<256x512xbf16>
    %cst_46 = arith.constant dense<0.000000e+00> : vector<2x512xf32>
    %176 = tpu.matmul %174, %175, %cst_46 {dimension_numbers = #tpu.dot_dimension_numbers<[1], [0], [0], [1], [0, 0, 1, 1], [], []>} : vector<2x256xbf16>, vector<256x512xbf16>, vector<2x512xf32> -> vector<2x512xf32>
    %177 = arith.addf %176, %7 : vector<2x512xf32>
    %178 = vector.extract_strided_slice %177 {offsets = [0, 0], sizes = [2, 128], strides = [1, 1]} : vector<2x512xf32> to vector<2x128xf32>
    %179 = arith.negf %178 : vector<2x128xf32>
    %180 = math.exp %179 : vector<2x128xf32>
    %cst_47 = arith.constant 1.000000e+00 : f32
    %181 = vector.broadcast %cst_47 : f32 to vector<2x128xf32>
    %182 = arith.addf %181, %180 : vector<2x128xf32>
    %183 = arith.divf %181, %182 : vector<2x128xf32>
    %184 = vector.extract_strided_slice %177 {offsets = [0, 128], sizes = [2, 128], strides = [1, 1]} : vector<2x512xf32> to vector<2x128xf32>
    %185 = arith.negf %184 : vector<2x128xf32>
    %186 = math.exp %185 : vector<2x128xf32>
    %cst_48 = arith.constant 1.000000e+00 : f32
    %187 = vector.broadcast %cst_48 : f32 to vector<2x128xf32>
    %188 = arith.addf %187, %186 : vector<2x128xf32>
    %189 = arith.divf %187, %188 : vector<2x128xf32>
    %190 = vector.extract_strided_slice %177 {offsets = [0, 256], sizes = [2, 128], strides = [1, 1]} : vector<2x512xf32> to vector<2x128xf32>
    %191 = math.tanh %190 : vector<2x128xf32>
    %192 = vector.extract_strided_slice %177 {offsets = [0, 384], sizes = [2, 128], strides = [1, 1]} : vector<2x512xf32> to vector<2x128xf32>
    %193 = arith.negf %192 : vector<2x128xf32>
    %194 = math.exp %193 : vector<2x128xf32>
    %cst_49 = arith.constant 1.000000e+00 : f32
    %195 = vector.broadcast %cst_49 : f32 to vector<2x128xf32>
    %196 = arith.addf %195, %194 : vector<2x128xf32>
    %197 = arith.divf %195, %196 : vector<2x128xf32>
    %198 = arith.mulf %189, %136 : vector<2x128xf32>
    %199 = arith.mulf %183, %191 : vector<2x128xf32>
    %200 = arith.addf %198, %199 : vector<2x128xf32>
    %201 = math.tanh %200 : vector<2x128xf32>
    %202 = arith.mulf %197, %201 : vector<2x128xf32>
    %203 = arith.truncf %202 : vector<2x128xf32> to vector<2x128xbf16>
    %204 = vector.extract_strided_slice %0 {offsets = [0, 3, 0], sizes = [2, 1, 4], strides = [1, 1, 1]} : vector<2x8x4xf32> to vector<2x1x4xf32>
    %205 = vector.shape_cast %204 : vector<2x1x4xf32> to vector<2x4xf32>
    %206 = arith.truncf %205 : vector<2x4xf32> to vector<2x4xbf16>
    %cst_50 = arith.constant dense<0.000000e+00> : vector<2x512xf32>
    %207 = tpu.matmul %206, %1, %cst_50 {dimension_numbers = #tpu.dot_dimension_numbers<[1], [0], [0], [1], [0, 0, 1, 1], [], []>} : vector<2x4xbf16>, vector<4x512xbf16>, vector<2x512xf32> -> vector<2x512xf32>
    %c0_51 = arith.constant 0 : index
    %c0_52 = arith.constant 0 : index
    %208 = vector.load %arg2[%c0_51, %c0_52] : memref<128x512xbf16, #tpu.memory_space<vmem>>, vector<128x512xbf16>
    %cst_53 = arith.constant dense<0.000000e+00> : vector<2x512xf32>
    %209 = tpu.matmul %173, %208, %cst_53 {dimension_numbers = #tpu.dot_dimension_numbers<[1], [0], [0], [1], [0, 0, 1, 1], [], []>} : vector<2x128xbf16>, vector<128x512xbf16>, vector<2x512xf32> -> vector<2x512xf32>
    %210 = arith.addf %207, %209 : vector<2x512xf32>
    %211 = arith.addf %210, %4 : vector<2x512xf32>
    %212 = vector.extract_strided_slice %211 {offsets = [0, 0], sizes = [2, 128], strides = [1, 1]} : vector<2x512xf32> to vector<2x128xf32>
    %213 = arith.negf %212 : vector<2x128xf32>
    %214 = math.exp %213 : vector<2x128xf32>
    %cst_54 = arith.constant 1.000000e+00 : f32
    %215 = vector.broadcast %cst_54 : f32 to vector<2x128xf32>
    %216 = arith.addf %215, %214 : vector<2x128xf32>
    %217 = arith.divf %215, %216 : vector<2x128xf32>
    %218 = vector.extract_strided_slice %211 {offsets = [0, 128], sizes = [2, 128], strides = [1, 1]} : vector<2x512xf32> to vector<2x128xf32>
    %219 = arith.negf %218 : vector<2x128xf32>
    %220 = math.exp %219 : vector<2x128xf32>
    %cst_55 = arith.constant 1.000000e+00 : f32
    %221 = vector.broadcast %cst_55 : f32 to vector<2x128xf32>
    %222 = arith.addf %221, %220 : vector<2x128xf32>
    %223 = arith.divf %221, %222 : vector<2x128xf32>
    %224 = vector.extract_strided_slice %211 {offsets = [0, 256], sizes = [2, 128], strides = [1, 1]} : vector<2x512xf32> to vector<2x128xf32>
    %225 = math.tanh %224 : vector<2x128xf32>
    %226 = vector.extract_strided_slice %211 {offsets = [0, 384], sizes = [2, 128], strides = [1, 1]} : vector<2x512xf32> to vector<2x128xf32>
    %227 = arith.negf %226 : vector<2x128xf32>
    %228 = math.exp %227 : vector<2x128xf32>
    %cst_56 = arith.constant 1.000000e+00 : f32
    %229 = vector.broadcast %cst_56 : f32 to vector<2x128xf32>
    %230 = arith.addf %229, %228 : vector<2x128xf32>
    %231 = arith.divf %229, %230 : vector<2x128xf32>
    %232 = arith.mulf %223, %170 : vector<2x128xf32>
    %233 = arith.mulf %217, %225 : vector<2x128xf32>
    %234 = arith.addf %232, %233 : vector<2x128xf32>
    %235 = math.tanh %234 : vector<2x128xf32>
    %236 = arith.mulf %231, %235 : vector<2x128xf32>
    %237 = arith.truncf %236 : vector<2x128xf32> to vector<2x128xbf16>
    %238 = tpu.concatenate %237, %203 in 1 : vector<2x128xbf16>, vector<2x128xbf16> -> vector<2x256xbf16>
    %c0_57 = arith.constant 0 : index
    %c0_58 = arith.constant 0 : index
    %239 = vector.load %arg4[%c0_57, %c0_58] : memref<256x512xbf16, #tpu.memory_space<vmem>>, vector<256x512xbf16>
    %cst_59 = arith.constant dense<0.000000e+00> : vector<2x512xf32>
    %240 = tpu.matmul %238, %239, %cst_59 {dimension_numbers = #tpu.dot_dimension_numbers<[1], [0], [0], [1], [0, 0, 1, 1], [], []>} : vector<2x256xbf16>, vector<256x512xbf16>, vector<2x512xf32> -> vector<2x512xf32>
    %241 = arith.addf %240, %7 : vector<2x512xf32>
    %242 = vector.extract_strided_slice %241 {offsets = [0, 0], sizes = [2, 128], strides = [1, 1]} : vector<2x512xf32> to vector<2x128xf32>
    %243 = arith.negf %242 : vector<2x128xf32>
    %244 = math.exp %243 : vector<2x128xf32>
    %cst_60 = arith.constant 1.000000e+00 : f32
    %245 = vector.broadcast %cst_60 : f32 to vector<2x128xf32>
    %246 = arith.addf %245, %244 : vector<2x128xf32>
    %247 = arith.divf %245, %246 : vector<2x128xf32>
    %248 = vector.extract_strided_slice %241 {offsets = [0, 128], sizes = [2, 128], strides = [1, 1]} : vector<2x512xf32> to vector<2x128xf32>
    %249 = arith.negf %248 : vector<2x128xf32>
    %250 = math.exp %249 : vector<2x128xf32>
    %cst_61 = arith.constant 1.000000e+00 : f32
    %251 = vector.broadcast %cst_61 : f32 to vector<2x128xf32>
    %252 = arith.addf %251, %250 : vector<2x128xf32>
    %253 = arith.divf %251, %252 : vector<2x128xf32>
    %254 = vector.extract_strided_slice %241 {offsets = [0, 256], sizes = [2, 128], strides = [1, 1]} : vector<2x512xf32> to vector<2x128xf32>
    %255 = math.tanh %254 : vector<2x128xf32>
    %256 = vector.extract_strided_slice %241 {offsets = [0, 384], sizes = [2, 128], strides = [1, 1]} : vector<2x512xf32> to vector<2x128xf32>
    %257 = arith.negf %256 : vector<2x128xf32>
    %258 = math.exp %257 : vector<2x128xf32>
    %cst_62 = arith.constant 1.000000e+00 : f32
    %259 = vector.broadcast %cst_62 : f32 to vector<2x128xf32>
    %260 = arith.addf %259, %258 : vector<2x128xf32>
    %261 = arith.divf %259, %260 : vector<2x128xf32>
    %262 = arith.mulf %253, %200 : vector<2x128xf32>
    %263 = arith.mulf %247, %255 : vector<2x128xf32>
    %264 = arith.addf %262, %263 : vector<2x128xf32>
    %265 = math.tanh %264 : vector<2x128xf32>
    %266 = arith.mulf %261, %265 : vector<2x128xf32>
    %267 = arith.truncf %266 : vector<2x128xf32> to vector<2x128xbf16>
    %268 = vector.extract_strided_slice %0 {offsets = [0, 4, 0], sizes = [2, 1, 4], strides = [1, 1, 1]} : vector<2x8x4xf32> to vector<2x1x4xf32>
    %269 = vector.shape_cast %268 : vector<2x1x4xf32> to vector<2x4xf32>
    %270 = arith.truncf %269 : vector<2x4xf32> to vector<2x4xbf16>
    %cst_63 = arith.constant dense<0.000000e+00> : vector<2x512xf32>
    %271 = tpu.matmul %270, %1, %cst_63 {dimension_numbers = #tpu.dot_dimension_numbers<[1], [0], [0], [1], [0, 0, 1, 1], [], []>} : vector<2x4xbf16>, vector<4x512xbf16>, vector<2x512xf32> -> vector<2x512xf32>
    %c0_64 = arith.constant 0 : index
    %c0_65 = arith.constant 0 : index
    %272 = vector.load %arg2[%c0_64, %c0_65] : memref<128x512xbf16, #tpu.memory_space<vmem>>, vector<128x512xbf16>
    %cst_66 = arith.constant dense<0.000000e+00> : vector<2x512xf32>
    %273 = tpu.matmul %237, %272, %cst_66 {dimension_numbers = #tpu.dot_dimension_numbers<[1], [0], [0], [1], [0, 0, 1, 1], [], []>} : vector<2x128xbf16>, vector<128x512xbf16>, vector<2x512xf32> -> vector<2x512xf32>
    %274 = arith.addf %271, %273 : vector<2x512xf32>
    %275 = arith.addf %274, %4 : vector<2x512xf32>
    %276 = vector.extract_strided_slice %275 {offsets = [0, 0], sizes = [2, 128], strides = [1, 1]} : vector<2x512xf32> to vector<2x128xf32>
    %277 = arith.negf %276 : vector<2x128xf32>
    %278 = math.exp %277 : vector<2x128xf32>
    %cst_67 = arith.constant 1.000000e+00 : f32
    %279 = vector.broadcast %cst_67 : f32 to vector<2x128xf32>
    %280 = arith.addf %279, %278 : vector<2x128xf32>
    %281 = arith.divf %279, %280 : vector<2x128xf32>
    %282 = vector.extract_strided_slice %275 {offsets = [0, 128], sizes = [2, 128], strides = [1, 1]} : vector<2x512xf32> to vector<2x128xf32>
    %283 = arith.negf %282 : vector<2x128xf32>
    %284 = math.exp %283 : vector<2x128xf32>
    %cst_68 = arith.constant 1.000000e+00 : f32
    %285 = vector.broadcast %cst_68 : f32 to vector<2x128xf32>
    %286 = arith.addf %285, %284 : vector<2x128xf32>
    %287 = arith.divf %285, %286 : vector<2x128xf32>
    %288 = vector.extract_strided_slice %275 {offsets = [0, 256], sizes = [2, 128], strides = [1, 1]} : vector<2x512xf32> to vector<2x128xf32>
    %289 = math.tanh %288 : vector<2x128xf32>
    %290 = vector.extract_strided_slice %275 {offsets = [0, 384], sizes = [2, 128], strides = [1, 1]} : vector<2x512xf32> to vector<2x128xf32>
    %291 = arith.negf %290 : vector<2x128xf32>
    %292 = math.exp %291 : vector<2x128xf32>
    %cst_69 = arith.constant 1.000000e+00 : f32
    %293 = vector.broadcast %cst_69 : f32 to vector<2x128xf32>
    %294 = arith.addf %293, %292 : vector<2x128xf32>
    %295 = arith.divf %293, %294 : vector<2x128xf32>
    %296 = arith.mulf %287, %234 : vector<2x128xf32>
    %297 = arith.mulf %281, %289 : vector<2x128xf32>
    %298 = arith.addf %296, %297 : vector<2x128xf32>
    %299 = math.tanh %298 : vector<2x128xf32>
    %300 = arith.mulf %295, %299 : vector<2x128xf32>
    %301 = arith.truncf %300 : vector<2x128xf32> to vector<2x128xbf16>
    %302 = tpu.concatenate %301, %267 in 1 : vector<2x128xbf16>, vector<2x128xbf16> -> vector<2x256xbf16>
    %c0_70 = arith.constant 0 : index
    %c0_71 = arith.constant 0 : index
    %303 = vector.load %arg4[%c0_70, %c0_71] : memref<256x512xbf16, #tpu.memory_space<vmem>>, vector<256x512xbf16>
    %cst_72 = arith.constant dense<0.000000e+00> : vector<2x512xf32>
    %304 = tpu.matmul %302, %303, %cst_72 {dimension_numbers = #tpu.dot_dimension_numbers<[1], [0], [0], [1], [0, 0, 1, 1], [], []>} : vector<2x256xbf16>, vector<256x512xbf16>, vector<2x512xf32> -> vector<2x512xf32>
    %305 = arith.addf %304, %7 : vector<2x512xf32>
    %306 = vector.extract_strided_slice %305 {offsets = [0, 0], sizes = [2, 128], strides = [1, 1]} : vector<2x512xf32> to vector<2x128xf32>
    %307 = arith.negf %306 : vector<2x128xf32>
    %308 = math.exp %307 : vector<2x128xf32>
    %cst_73 = arith.constant 1.000000e+00 : f32
    %309 = vector.broadcast %cst_73 : f32 to vector<2x128xf32>
    %310 = arith.addf %309, %308 : vector<2x128xf32>
    %311 = arith.divf %309, %310 : vector<2x128xf32>
    %312 = vector.extract_strided_slice %305 {offsets = [0, 128], sizes = [2, 128], strides = [1, 1]} : vector<2x512xf32> to vector<2x128xf32>
    %313 = arith.negf %312 : vector<2x128xf32>
    %314 = math.exp %313 : vector<2x128xf32>
    %cst_74 = arith.constant 1.000000e+00 : f32
    %315 = vector.broadcast %cst_74 : f32 to vector<2x128xf32>
    %316 = arith.addf %315, %314 : vector<2x128xf32>
    %317 = arith.divf %315, %316 : vector<2x128xf32>
    %318 = vector.extract_strided_slice %305 {offsets = [0, 256], sizes = [2, 128], strides = [1, 1]} : vector<2x512xf32> to vector<2x128xf32>
    %319 = math.tanh %318 : vector<2x128xf32>
    %320 = vector.extract_strided_slice %305 {offsets = [0, 384], sizes = [2, 128], strides = [1, 1]} : vector<2x512xf32> to vector<2x128xf32>
    %321 = arith.negf %320 : vector<2x128xf32>
    %322 = math.exp %321 : vector<2x128xf32>
    %cst_75 = arith.constant 1.000000e+00 : f32
    %323 = vector.broadcast %cst_75 : f32 to vector<2x128xf32>
    %324 = arith.addf %323, %322 : vector<2x128xf32>
    %325 = arith.divf %323, %324 : vector<2x128xf32>
    %326 = arith.mulf %317, %264 : vector<2x128xf32>
    %327 = arith.mulf %311, %319 : vector<2x128xf32>
    %328 = arith.addf %326, %327 : vector<2x128xf32>
    %329 = math.tanh %328 : vector<2x128xf32>
    %330 = arith.mulf %325, %329 : vector<2x128xf32>
    %331 = arith.truncf %330 : vector<2x128xf32> to vector<2x128xbf16>
    %332 = vector.extract_strided_slice %0 {offsets = [0, 5, 0], sizes = [2, 1, 4], strides = [1, 1, 1]} : vector<2x8x4xf32> to vector<2x1x4xf32>
    %333 = vector.shape_cast %332 : vector<2x1x4xf32> to vector<2x4xf32>
    %334 = arith.truncf %333 : vector<2x4xf32> to vector<2x4xbf16>
    %cst_76 = arith.constant dense<0.000000e+00> : vector<2x512xf32>
    %335 = tpu.matmul %334, %1, %cst_76 {dimension_numbers = #tpu.dot_dimension_numbers<[1], [0], [0], [1], [0, 0, 1, 1], [], []>} : vector<2x4xbf16>, vector<4x512xbf16>, vector<2x512xf32> -> vector<2x512xf32>
    %c0_77 = arith.constant 0 : index
    %c0_78 = arith.constant 0 : index
    %336 = vector.load %arg2[%c0_77, %c0_78] : memref<128x512xbf16, #tpu.memory_space<vmem>>, vector<128x512xbf16>
    %cst_79 = arith.constant dense<0.000000e+00> : vector<2x512xf32>
    %337 = tpu.matmul %301, %336, %cst_79 {dimension_numbers = #tpu.dot_dimension_numbers<[1], [0], [0], [1], [0, 0, 1, 1], [], []>} : vector<2x128xbf16>, vector<128x512xbf16>, vector<2x512xf32> -> vector<2x512xf32>
    %338 = arith.addf %335, %337 : vector<2x512xf32>
    %339 = arith.addf %338, %4 : vector<2x512xf32>
    %340 = vector.extract_strided_slice %339 {offsets = [0, 0], sizes = [2, 128], strides = [1, 1]} : vector<2x512xf32> to vector<2x128xf32>
    %341 = arith.negf %340 : vector<2x128xf32>
    %342 = math.exp %341 : vector<2x128xf32>
    %cst_80 = arith.constant 1.000000e+00 : f32
    %343 = vector.broadcast %cst_80 : f32 to vector<2x128xf32>
    %344 = arith.addf %343, %342 : vector<2x128xf32>
    %345 = arith.divf %343, %344 : vector<2x128xf32>
    %346 = vector.extract_strided_slice %339 {offsets = [0, 128], sizes = [2, 128], strides = [1, 1]} : vector<2x512xf32> to vector<2x128xf32>
    %347 = arith.negf %346 : vector<2x128xf32>
    %348 = math.exp %347 : vector<2x128xf32>
    %cst_81 = arith.constant 1.000000e+00 : f32
    %349 = vector.broadcast %cst_81 : f32 to vector<2x128xf32>
    %350 = arith.addf %349, %348 : vector<2x128xf32>
    %351 = arith.divf %349, %350 : vector<2x128xf32>
    %352 = vector.extract_strided_slice %339 {offsets = [0, 256], sizes = [2, 128], strides = [1, 1]} : vector<2x512xf32> to vector<2x128xf32>
    %353 = math.tanh %352 : vector<2x128xf32>
    %354 = vector.extract_strided_slice %339 {offsets = [0, 384], sizes = [2, 128], strides = [1, 1]} : vector<2x512xf32> to vector<2x128xf32>
    %355 = arith.negf %354 : vector<2x128xf32>
    %356 = math.exp %355 : vector<2x128xf32>
    %cst_82 = arith.constant 1.000000e+00 : f32
    %357 = vector.broadcast %cst_82 : f32 to vector<2x128xf32>
    %358 = arith.addf %357, %356 : vector<2x128xf32>
    %359 = arith.divf %357, %358 : vector<2x128xf32>
    %360 = arith.mulf %351, %298 : vector<2x128xf32>
    %361 = arith.mulf %345, %353 : vector<2x128xf32>
    %362 = arith.addf %360, %361 : vector<2x128xf32>
    %363 = math.tanh %362 : vector<2x128xf32>
    %364 = arith.mulf %359, %363 : vector<2x128xf32>
    %365 = arith.truncf %364 : vector<2x128xf32> to vector<2x128xbf16>
    %366 = tpu.concatenate %365, %331 in 1 : vector<2x128xbf16>, vector<2x128xbf16> -> vector<2x256xbf16>
    %c0_83 = arith.constant 0 : index
    %c0_84 = arith.constant 0 : index
    %367 = vector.load %arg4[%c0_83, %c0_84] : memref<256x512xbf16, #tpu.memory_space<vmem>>, vector<256x512xbf16>
    %cst_85 = arith.constant dense<0.000000e+00> : vector<2x512xf32>
    %368 = tpu.matmul %366, %367, %cst_85 {dimension_numbers = #tpu.dot_dimension_numbers<[1], [0], [0], [1], [0, 0, 1, 1], [], []>} : vector<2x256xbf16>, vector<256x512xbf16>, vector<2x512xf32> -> vector<2x512xf32>
    %369 = arith.addf %368, %7 : vector<2x512xf32>
    %370 = vector.extract_strided_slice %369 {offsets = [0, 0], sizes = [2, 128], strides = [1, 1]} : vector<2x512xf32> to vector<2x128xf32>
    %371 = arith.negf %370 : vector<2x128xf32>
    %372 = math.exp %371 : vector<2x128xf32>
    %cst_86 = arith.constant 1.000000e+00 : f32
    %373 = vector.broadcast %cst_86 : f32 to vector<2x128xf32>
    %374 = arith.addf %373, %372 : vector<2x128xf32>
    %375 = arith.divf %373, %374 : vector<2x128xf32>
    %376 = vector.extract_strided_slice %369 {offsets = [0, 128], sizes = [2, 128], strides = [1, 1]} : vector<2x512xf32> to vector<2x128xf32>
    %377 = arith.negf %376 : vector<2x128xf32>
    %378 = math.exp %377 : vector<2x128xf32>
    %cst_87 = arith.constant 1.000000e+00 : f32
    %379 = vector.broadcast %cst_87 : f32 to vector<2x128xf32>
    %380 = arith.addf %379, %378 : vector<2x128xf32>
    %381 = arith.divf %379, %380 : vector<2x128xf32>
    %382 = vector.extract_strided_slice %369 {offsets = [0, 256], sizes = [2, 128], strides = [1, 1]} : vector<2x512xf32> to vector<2x128xf32>
    %383 = math.tanh %382 : vector<2x128xf32>
    %384 = vector.extract_strided_slice %369 {offsets = [0, 384], sizes = [2, 128], strides = [1, 1]} : vector<2x512xf32> to vector<2x128xf32>
    %385 = arith.negf %384 : vector<2x128xf32>
    %386 = math.exp %385 : vector<2x128xf32>
    %cst_88 = arith.constant 1.000000e+00 : f32
    %387 = vector.broadcast %cst_88 : f32 to vector<2x128xf32>
    %388 = arith.addf %387, %386 : vector<2x128xf32>
    %389 = arith.divf %387, %388 : vector<2x128xf32>
    %390 = arith.mulf %381, %328 : vector<2x128xf32>
    %391 = arith.mulf %375, %383 : vector<2x128xf32>
    %392 = arith.addf %390, %391 : vector<2x128xf32>
    %393 = math.tanh %392 : vector<2x128xf32>
    %394 = arith.mulf %389, %393 : vector<2x128xf32>
    %395 = arith.truncf %394 : vector<2x128xf32> to vector<2x128xbf16>
    %396 = vector.extract_strided_slice %0 {offsets = [0, 6, 0], sizes = [2, 1, 4], strides = [1, 1, 1]} : vector<2x8x4xf32> to vector<2x1x4xf32>
    %397 = vector.shape_cast %396 : vector<2x1x4xf32> to vector<2x4xf32>
    %398 = arith.truncf %397 : vector<2x4xf32> to vector<2x4xbf16>
    %cst_89 = arith.constant dense<0.000000e+00> : vector<2x512xf32>
    %399 = tpu.matmul %398, %1, %cst_89 {dimension_numbers = #tpu.dot_dimension_numbers<[1], [0], [0], [1], [0, 0, 1, 1], [], []>} : vector<2x4xbf16>, vector<4x512xbf16>, vector<2x512xf32> -> vector<2x512xf32>
    %c0_90 = arith.constant 0 : index
    %c0_91 = arith.constant 0 : index
    %400 = vector.load %arg2[%c0_90, %c0_91] : memref<128x512xbf16, #tpu.memory_space<vmem>>, vector<128x512xbf16>
    %cst_92 = arith.constant dense<0.000000e+00> : vector<2x512xf32>
    %401 = tpu.matmul %365, %400, %cst_92 {dimension_numbers = #tpu.dot_dimension_numbers<[1], [0], [0], [1], [0, 0, 1, 1], [], []>} : vector<2x128xbf16>, vector<128x512xbf16>, vector<2x512xf32> -> vector<2x512xf32>
    %402 = arith.addf %399, %401 : vector<2x512xf32>
    %403 = arith.addf %402, %4 : vector<2x512xf32>
    %404 = vector.extract_strided_slice %403 {offsets = [0, 0], sizes = [2, 128], strides = [1, 1]} : vector<2x512xf32> to vector<2x128xf32>
    %405 = arith.negf %404 : vector<2x128xf32>
    %406 = math.exp %405 : vector<2x128xf32>
    %cst_93 = arith.constant 1.000000e+00 : f32
    %407 = vector.broadcast %cst_93 : f32 to vector<2x128xf32>
    %408 = arith.addf %407, %406 : vector<2x128xf32>
    %409 = arith.divf %407, %408 : vector<2x128xf32>
    %410 = vector.extract_strided_slice %403 {offsets = [0, 128], sizes = [2, 128], strides = [1, 1]} : vector<2x512xf32> to vector<2x128xf32>
    %411 = arith.negf %410 : vector<2x128xf32>
    %412 = math.exp %411 : vector<2x128xf32>
    %cst_94 = arith.constant 1.000000e+00 : f32
    %413 = vector.broadcast %cst_94 : f32 to vector<2x128xf32>
    %414 = arith.addf %413, %412 : vector<2x128xf32>
    %415 = arith.divf %413, %414 : vector<2x128xf32>
    %416 = vector.extract_strided_slice %403 {offsets = [0, 256], sizes = [2, 128], strides = [1, 1]} : vector<2x512xf32> to vector<2x128xf32>
    %417 = math.tanh %416 : vector<2x128xf32>
    %418 = vector.extract_strided_slice %403 {offsets = [0, 384], sizes = [2, 128], strides = [1, 1]} : vector<2x512xf32> to vector<2x128xf32>
    %419 = arith.negf %418 : vector<2x128xf32>
    %420 = math.exp %419 : vector<2x128xf32>
    %cst_95 = arith.constant 1.000000e+00 : f32
    %421 = vector.broadcast %cst_95 : f32 to vector<2x128xf32>
    %422 = arith.addf %421, %420 : vector<2x128xf32>
    %423 = arith.divf %421, %422 : vector<2x128xf32>
    %424 = arith.mulf %415, %362 : vector<2x128xf32>
    %425 = arith.mulf %409, %417 : vector<2x128xf32>
    %426 = arith.addf %424, %425 : vector<2x128xf32>
    %427 = math.tanh %426 : vector<2x128xf32>
    %428 = arith.mulf %423, %427 : vector<2x128xf32>
    %429 = arith.truncf %428 : vector<2x128xf32> to vector<2x128xbf16>
    %430 = tpu.concatenate %429, %395 in 1 : vector<2x128xbf16>, vector<2x128xbf16> -> vector<2x256xbf16>
    %c0_96 = arith.constant 0 : index
    %c0_97 = arith.constant 0 : index
    %431 = vector.load %arg4[%c0_96, %c0_97] : memref<256x512xbf16, #tpu.memory_space<vmem>>, vector<256x512xbf16>
    %cst_98 = arith.constant dense<0.000000e+00> : vector<2x512xf32>
    %432 = tpu.matmul %430, %431, %cst_98 {dimension_numbers = #tpu.dot_dimension_numbers<[1], [0], [0], [1], [0, 0, 1, 1], [], []>} : vector<2x256xbf16>, vector<256x512xbf16>, vector<2x512xf32> -> vector<2x512xf32>
    %433 = arith.addf %432, %7 : vector<2x512xf32>
    %434 = vector.extract_strided_slice %433 {offsets = [0, 0], sizes = [2, 128], strides = [1, 1]} : vector<2x512xf32> to vector<2x128xf32>
    %435 = arith.negf %434 : vector<2x128xf32>
    %436 = math.exp %435 : vector<2x128xf32>
    %cst_99 = arith.constant 1.000000e+00 : f32
    %437 = vector.broadcast %cst_99 : f32 to vector<2x128xf32>
    %438 = arith.addf %437, %436 : vector<2x128xf32>
    %439 = arith.divf %437, %438 : vector<2x128xf32>
    %440 = vector.extract_strided_slice %433 {offsets = [0, 128], sizes = [2, 128], strides = [1, 1]} : vector<2x512xf32> to vector<2x128xf32>
    %441 = arith.negf %440 : vector<2x128xf32>
    %442 = math.exp %441 : vector<2x128xf32>
    %cst_100 = arith.constant 1.000000e+00 : f32
    %443 = vector.broadcast %cst_100 : f32 to vector<2x128xf32>
    %444 = arith.addf %443, %442 : vector<2x128xf32>
    %445 = arith.divf %443, %444 : vector<2x128xf32>
    %446 = vector.extract_strided_slice %433 {offsets = [0, 256], sizes = [2, 128], strides = [1, 1]} : vector<2x512xf32> to vector<2x128xf32>
    %447 = math.tanh %446 : vector<2x128xf32>
    %448 = vector.extract_strided_slice %433 {offsets = [0, 384], sizes = [2, 128], strides = [1, 1]} : vector<2x512xf32> to vector<2x128xf32>
    %449 = arith.negf %448 : vector<2x128xf32>
    %450 = math.exp %449 : vector<2x128xf32>
    %cst_101 = arith.constant 1.000000e+00 : f32
    %451 = vector.broadcast %cst_101 : f32 to vector<2x128xf32>
    %452 = arith.addf %451, %450 : vector<2x128xf32>
    %453 = arith.divf %451, %452 : vector<2x128xf32>
    %454 = arith.mulf %445, %392 : vector<2x128xf32>
    %455 = arith.mulf %439, %447 : vector<2x128xf32>
    %456 = arith.addf %454, %455 : vector<2x128xf32>
    %457 = math.tanh %456 : vector<2x128xf32>
    %458 = arith.mulf %453, %457 : vector<2x128xf32>
    %459 = arith.truncf %458 : vector<2x128xf32> to vector<2x128xbf16>
    %460 = vector.extract_strided_slice %0 {offsets = [0, 7, 0], sizes = [2, 1, 4], strides = [1, 1, 1]} : vector<2x8x4xf32> to vector<2x1x4xf32>
    %461 = vector.shape_cast %460 : vector<2x1x4xf32> to vector<2x4xf32>
    %462 = arith.truncf %461 : vector<2x4xf32> to vector<2x4xbf16>
    %cst_102 = arith.constant dense<0.000000e+00> : vector<2x512xf32>
    %463 = tpu.matmul %462, %1, %cst_102 {dimension_numbers = #tpu.dot_dimension_numbers<[1], [0], [0], [1], [0, 0, 1, 1], [], []>} : vector<2x4xbf16>, vector<4x512xbf16>, vector<2x512xf32> -> vector<2x512xf32>
    %c0_103 = arith.constant 0 : index
    %c0_104 = arith.constant 0 : index
    %464 = vector.load %arg2[%c0_103, %c0_104] : memref<128x512xbf16, #tpu.memory_space<vmem>>, vector<128x512xbf16>
    %cst_105 = arith.constant dense<0.000000e+00> : vector<2x512xf32>
    %465 = tpu.matmul %429, %464, %cst_105 {dimension_numbers = #tpu.dot_dimension_numbers<[1], [0], [0], [1], [0, 0, 1, 1], [], []>} : vector<2x128xbf16>, vector<128x512xbf16>, vector<2x512xf32> -> vector<2x512xf32>
    %466 = arith.addf %463, %465 : vector<2x512xf32>
    %467 = arith.addf %466, %4 : vector<2x512xf32>
    %468 = vector.extract_strided_slice %467 {offsets = [0, 0], sizes = [2, 128], strides = [1, 1]} : vector<2x512xf32> to vector<2x128xf32>
    %469 = arith.negf %468 : vector<2x128xf32>
    %470 = math.exp %469 : vector<2x128xf32>
    %cst_106 = arith.constant 1.000000e+00 : f32
    %471 = vector.broadcast %cst_106 : f32 to vector<2x128xf32>
    %472 = arith.addf %471, %470 : vector<2x128xf32>
    %473 = arith.divf %471, %472 : vector<2x128xf32>
    %474 = vector.extract_strided_slice %467 {offsets = [0, 128], sizes = [2, 128], strides = [1, 1]} : vector<2x512xf32> to vector<2x128xf32>
    %475 = arith.negf %474 : vector<2x128xf32>
    %476 = math.exp %475 : vector<2x128xf32>
    %cst_107 = arith.constant 1.000000e+00 : f32
    %477 = vector.broadcast %cst_107 : f32 to vector<2x128xf32>
    %478 = arith.addf %477, %476 : vector<2x128xf32>
    %479 = arith.divf %477, %478 : vector<2x128xf32>
    %480 = vector.extract_strided_slice %467 {offsets = [0, 256], sizes = [2, 128], strides = [1, 1]} : vector<2x512xf32> to vector<2x128xf32>
    %481 = math.tanh %480 : vector<2x128xf32>
    %482 = vector.extract_strided_slice %467 {offsets = [0, 384], sizes = [2, 128], strides = [1, 1]} : vector<2x512xf32> to vector<2x128xf32>
    %483 = arith.negf %482 : vector<2x128xf32>
    %484 = math.exp %483 : vector<2x128xf32>
    %cst_108 = arith.constant 1.000000e+00 : f32
    %485 = vector.broadcast %cst_108 : f32 to vector<2x128xf32>
    %486 = arith.addf %485, %484 : vector<2x128xf32>
    %487 = arith.divf %485, %486 : vector<2x128xf32>
    %488 = arith.mulf %479, %426 : vector<2x128xf32>
    %489 = arith.mulf %473, %481 : vector<2x128xf32>
    %490 = arith.addf %488, %489 : vector<2x128xf32>
    %491 = math.tanh %490 : vector<2x128xf32>
    %492 = arith.mulf %487, %491 : vector<2x128xf32>
    %493 = arith.truncf %492 : vector<2x128xf32> to vector<2x128xbf16>
    %494 = tpu.concatenate %493, %459 in 1 : vector<2x128xbf16>, vector<2x128xbf16> -> vector<2x256xbf16>
    %c0_109 = arith.constant 0 : index
    %c0_110 = arith.constant 0 : index
    %495 = vector.load %arg4[%c0_109, %c0_110] : memref<256x512xbf16, #tpu.memory_space<vmem>>, vector<256x512xbf16>
    %cst_111 = arith.constant dense<0.000000e+00> : vector<2x512xf32>
    %496 = tpu.matmul %494, %495, %cst_111 {dimension_numbers = #tpu.dot_dimension_numbers<[1], [0], [0], [1], [0, 0, 1, 1], [], []>} : vector<2x256xbf16>, vector<256x512xbf16>, vector<2x512xf32> -> vector<2x512xf32>
    %497 = arith.addf %496, %7 : vector<2x512xf32>
    %498 = vector.extract_strided_slice %497 {offsets = [0, 0], sizes = [2, 128], strides = [1, 1]} : vector<2x512xf32> to vector<2x128xf32>
    %499 = arith.negf %498 : vector<2x128xf32>
    %500 = math.exp %499 : vector<2x128xf32>
    %cst_112 = arith.constant 1.000000e+00 : f32
    %501 = vector.broadcast %cst_112 : f32 to vector<2x128xf32>
    %502 = arith.addf %501, %500 : vector<2x128xf32>
    %503 = arith.divf %501, %502 : vector<2x128xf32>
    %504 = vector.extract_strided_slice %497 {offsets = [0, 128], sizes = [2, 128], strides = [1, 1]} : vector<2x512xf32> to vector<2x128xf32>
    %505 = arith.negf %504 : vector<2x128xf32>
    %506 = math.exp %505 : vector<2x128xf32>
    %cst_113 = arith.constant 1.000000e+00 : f32
    %507 = vector.broadcast %cst_113 : f32 to vector<2x128xf32>
    %508 = arith.addf %507, %506 : vector<2x128xf32>
    %509 = arith.divf %507, %508 : vector<2x128xf32>
    %510 = vector.extract_strided_slice %497 {offsets = [0, 256], sizes = [2, 128], strides = [1, 1]} : vector<2x512xf32> to vector<2x128xf32>
    %511 = math.tanh %510 : vector<2x128xf32>
    %512 = vector.extract_strided_slice %497 {offsets = [0, 384], sizes = [2, 128], strides = [1, 1]} : vector<2x512xf32> to vector<2x128xf32>
    %513 = arith.negf %512 : vector<2x128xf32>
    %514 = math.exp %513 : vector<2x128xf32>
    %cst_114 = arith.constant 1.000000e+00 : f32
    %515 = vector.broadcast %cst_114 : f32 to vector<2x128xf32>
    %516 = arith.addf %515, %514 : vector<2x128xf32>
    %517 = arith.divf %515, %516 : vector<2x128xf32>
    %518 = arith.mulf %509, %456 : vector<2x128xf32>
    %519 = arith.mulf %503, %511 : vector<2x128xf32>
    %520 = arith.addf %518, %519 : vector<2x128xf32>
    %521 = math.tanh %520 : vector<2x128xf32>
    %522 = arith.mulf %517, %521 : vector<2x128xf32>
    %c0_115 = arith.constant 0 : index
    %c0_116 = arith.constant 0 : index
    %523 = vector.load %arg6[%c0_115, %c0_116] : memref<1x128xf32, #tpu.memory_space<vmem>>, vector<1x128xf32>
    %524 = vector.broadcast %523 : vector<1x128xf32> to vector<2x128xf32>
    %525 = arith.mulf %522, %524 : vector<2x128xf32>
    %cst_117 = arith.constant dense<0.000000e+00> : vector<2xf32>
    %526 = vector.multi_reduction <add>, %525, %cst_117 [1] : vector<2x128xf32> to vector<2xf32>
    %527 = vector.shape_cast %526 : vector<2xf32> to vector<2x1xf32>
    %c0_118 = arith.constant 0 : index
    %c0_119 = arith.constant 0 : index
    %528 = vector.load %arg7[%c0_118, %c0_119] : memref<1x1xf32, #tpu.memory_space<vmem>>, vector<1x1xf32>
    %529 = vector.broadcast %528 : vector<1x1xf32> to vector<2x1xf32>
    %530 = arith.addf %527, %529 : vector<2x1xf32>
    %c0_120 = arith.constant 0 : index
    %c0_121 = arith.constant 0 : index
    %531 = vector.load %arg8[%c0_120, %c0_121] : memref<2x1xf32, #tpu.memory_space<vmem>>, vector<2x1xf32>
    tpu.vector_store %arg8[%c0_120, %c0_121], %530 {strides = array<i32>} : memref<2x1xf32, #tpu.memory_space<vmem>>, vector<2x1xf32>,
    return
  }
}

</mosaic_0001>

<bundles_post_ra>
// kernel: lstm_forward.1
= control target key start
LH: loop header
LB: loop body
LE: loop exit
PB: predicated region body
PF: predicated region fallthrough
CT: control target
= control target key end

     0   :  { %s5780_s0 = inlined_call_operand.vmem [shape: f32[2,8,4], index: 0, kind: input, shape index: {}]   ;;  %s5781_s1 = inlined_call_operand.vmem [shape: bf16[4,512], index: 1, kind: input, shape index: {}]   ;;  %s5782_s2 = inlined_call_operand.hbm [shape: bf16[128,512], index: 2, kind: input, shape index: {}]   ;;  %s5783_s3 = inlined_call_operand.vmem [shape: f32[1,512], index: 3, kind: input, shape index: {}]   ;;  %s5784_s4 = inlined_call_operand.hbm [shape: bf16[256,512], index: 4, kind: input, shape index: {}]   ;;  %s5785_s5 = inlined_call_operand.vmem [shape: f32[1,512], index: 5, kind: input, shape index: {}]   ;;  %s5786_s6 = inlined_call_operand.vmem [shape: f32[1,128], index: 6, kind: input, shape index: {}]   ;;  %s5787_s7 = inlined_call_operand.<no memory space> [shape: f32[1,1], index: 7, kind: input, shape index: {}]   ;;  %s5788_s8 = inlined_call_operand.vmem [shape: f32[2,1], index: 8, kind: output, shape index: {}]  }
   0x1   :  { %v13_v0 = vstv %s5787_s7 }
   0x2   :  { %14 = vst [vmem:[#allocation2] sm:$0x1] %v13_v0 }
   0x3   :  { %15 = vsyncpa [#allocation4], 0 }
   0x4   :  { %16 = vsyncpa [#allocation6], 0  ;;  %s4027_s29 = smov [#allocation3]   ;;  %s3979_s11 = scalar_lea.hbm %s5782_s2, 4096 }
   0x5   :  { %s26_s30 = sshll.u32 %s4027_s29, 4  ;;  %p3980_p0 = scmp.ne.s32.totalorder %s5782_s2, %s3979_s11  ;;  %s27_s30 = int_to_ptr.vmem [resolvable:$true] %s26_s30 }
   0x6   :  { %p3983_p1 = scmp.lt.u32.totalorder %s3979_s11, %s5782_s2 }
   0x8   :  { %p3985_p2 = pnand %p3983_p1, %p3980_p0 }
   0xa   :  { %3988 = shalt.err (!%p3985_p2)
}
   0xb   :  { %s3989_s7 = scalar_lea.vmem %s27_s30, 4096  ;;  %p3994_p4 = scmp.lt.s32.totalorder %s27_s30, %s27_s30 }
   0xc   :  { %p3990_p3 = scmp.ne.s32.totalorder %s27_s30, %s3989_s7  ;;  %p3995_p5 = scmp.lt.s32.totalorder %s3989_s7, %s3989_s7 }
   0xe   :  { %p3996_p6 = por %p3995_p5, %p3994_p4 }
  0x10   :  { %p3997_p7 = pnand %p3996_p6, %p3990_p3 }
  0x12   :  { %4000 = shalt.err (!%p3997_p7)
}
  0x13   :  { %s4028_s16 = smov 256   ;;  %s4029_s17 = smov 16  }
  0x14   :  { %32 = dma.hbm_to_vmem [thread:$0]  %s5782_s2, 4096, %s27_s30, [#allocation4], %s4028_s16, %s4028_s16, %s4029_s17  }
  0x15   :  { %s4030_s20 = smov [#allocation5]   ;;  %s4001_s24 = scalar_lea.hbm %s5784_s4, 8192 }
  0x16   :  { %s40_s21 = sshll.u32 %s4030_s20, 4  ;;  %p4002_p8 = scmp.ne.s32.totalorder %s5784_s4, %s4001_s24  ;;  %s41_s21 = int_to_ptr.vmem [resolvable:$true] %s40_s21 }
  0x17   :  { %p4005_p9 = scmp.lt.u32.totalorder %s4001_s24, %s5784_s4 }
  0x19   :  { %p4007_p10 = pnand %p4005_p9, %p4002_p8 }
  0x1b   :  { %4010 = shalt.err (!%p4007_p10)
}
  0x1c   :  { %s4011_s29 = scalar_lea.vmem %s41_s21, 8192  ;;  %p4016_p12 = scmp.lt.s32.totalorder %s41_s21, %s41_s21 }
  0x1d   :  { %p4012_p11 = scmp.ne.s32.totalorder %s41_s21, %s4011_s29  ;;  %p4017_p13 = scmp.lt.s32.totalorder %s4011_s29, %s4011_s29 }
  0x1f   :  { %p4018_p0 = por %p4017_p13, %p4016_p12 }
  0x21   :  { %p4019_p1 = pnand %p4018_p0, %p4012_p11 }
  0x23   :  { %4022 = shalt.err (!%p4019_p1)
}
  0x24   :  { %46 = dma.hbm_to_vmem [thread:$0]  %s5784_s4, 8192, %s41_s21, [#allocation6], %s4028_s16, %s4028_s16, %s4029_s17  }
  0x25   :  { %4023 = dma.done.wait [#allocation4], 4096  }
  0x26   :  { %4024 = vsyncadd [#allocation4], 4294963200 }
  0x27   :  { %4025 = dma.done.wait [#allocation6], 8192  }
  0x28   :  { %4026 = vsyncadd [#allocation6], 4294959104  ;;  %v5789_v1 = vmov 0   ;;  %v4107_v2 = vld [vmem:[#allocation3 + $0x4] ss:$16 sps:$4 sm:$0xff]   ;;  %v65_v18 = vlaneseq  ;;  %vm413_vm0 = vcmask 1041408  }
  0x29   :  { %333 = vmatprep.mubr.bf16.mxu0 %v5789_v1  ;;  %374 = vmatprep.mubr.bf16.mxu1 %v5789_v1  ;;  %6185 = vst [vmem:[#allocation9_spill] sm:$0xff] %v4107_v2  ;;  %v4109_v3 = vld [vmem:[#allocation3] ss:$16 sps:$4 sm:$0xff]   ;;  %v4112_v4 = vld [vmem:[#allocation3 + $0x24] ss:$16 sps:$4 sm:$0xff]   ;;  %vm388_vm1 = vcmask 1041409  }
  0x2a   :  { %301 = vmatprep.subr.bf16.mxu0 %v4107_v2  ;;  %v4114_v5 = vld [vmem:[#allocation3 + $0x20] ss:$16 sps:$4 sm:$0xff]   ;;  %v4117_v6 = vld [vmem:[#allocation3 + $0xc] ss:$16 sps:$4 sm:$0xff]   ;;  %v4119_v7 = vld [vmem:[#allocation3 + $0x8] ss:$16 sps:$4 sm:$0xff]  }
  0x2b   :  { %302 = vmatpush1.bf16.msra.mxu0 %v4109_v3  ;;  %6186 = vst [vmem:[#allocation10_spill] sm:$0xff] %v4117_v6  ;;  %v4122_v8 = vld [vmem:[#allocation3 + $0x44] ss:$16 sps:$4 sm:$0xff]   ;;  %342 = vmatprep.subr.bf16.mxu1 %v4117_v6  ;;  %v4126_v9 = vld [vmem:[#allocation3 + $0x2c] ss:$16 sps:$4 sm:$0xff]   ;;  %v4163_v25 = vshrl.u32 %v65_v18, 7 }
  0x2c   :  { %303 = vmatprep.subr.bf16.mxu0 %v4112_v4  ;;  %343 = vmatpush1.bf16.msra.mxu1 %v4119_v7  ;;  %v4128_v10 = vld [vmem:[#allocation3 + $0x28] ss:$16 sps:$4 sm:$0xff]   ;;  %v4131_v11 = vld [vmem:[#allocation3 + $0x40] ss:$16 sps:$4 sm:$0xff]   ;;  %v4133_v12 = vld [vmem:[#allocation3 + $0x64] ss:$16 sps:$4 sm:$0xff]  }
  0x2d   :  { %344 = vmatprep.subr.bf16.mxu1 %v4126_v9  ;;  %v4137_v13 = vld [vmem:[#allocation3 + $0x4c] ss:$16 sps:$4 sm:$0xff]   ;;  %v4140_v14 = vld [vmem:[#allocation3 + $0x48] ss:$16 sps:$4 sm:$0xff]   ;;  %v4143_v15 = vld [vmem:[#allocation3 + $0x60] ss:$16 sps:$4 sm:$0xff]  }
  0x2e   :  { %v4146_v16 = vld [vmem:[#allocation3 + $0x6c] ss:$16 sps:$4 sm:$0xff]   ;;  %v4149_v17 = vld [vmem:[#allocation3 + $0x84] ss:$16 sps:$4 sm:$0xff]   ;;  %v4032_v19 = vmov 1983009808  }
  0x2f   :  { %304 = vmatpush1.bf16.msra.mxu0 %v4114_v5  ;;  %v394_v20 = vunpack.c.l.s4 %v4032_v19  ;;  %v4152_v21 = vld [vmem:[#allocation3 + $0x68] ss:$16 sps:$4 sm:$0xff]   ;;  %v4155_v22 = vld [vmem:[#allocation3 + $0x80] ss:$16 sps:$4 sm:$0xff]   ;;  %v4158_v23 = vld [vmem:[#allocation3 + $0x8c] ss:$16 sps:$4 sm:$0xff]  }
  0x30   :  { %305 = vmatprep.subr.bf16.mxu0 %v4122_v8  ;;  %345 = vmatpush1.bf16.msra.mxu1 %v4128_v10  ;;  %v4161_v24 = vld [vmem:[#allocation3 + $0xa4] ss:$16 sps:$4 sm:$0xff]   ;;  %v4166_v27 = vld [vmem:[#allocation3 + $0x88] ss:$16 sps:$4 sm:$0xff]   ;;  %v4169_v28 = vld [vmem:[#allocation3 + $0xa0] ss:$16 sps:$4 sm:$0xff]  }
  0x31   :  { %346 = vmatprep.subr.bf16.mxu1 %v4137_v13  ;;  %v395_v26 = vunpack.c.0.s8 %v394_v20  ;;  %v4172_v29 = vld [vmem:[#allocation3 + $0xac] ss:$16 sps:$4 sm:$0xff]   ;;  %v4175_v30 = vld [vmem:[#allocation3 + $0xc4] ss:$16 sps:$4 sm:$0xff]   ;;  %v4178_v32 = vld [vmem:[#allocation3 + $0xc0] ss:$16 sps:$4 sm:$0xff]  }
  0x32   :  { %v4180_v33 = vld [vmem:[#allocation3 + $0xa8] ss:$16 sps:$4 sm:$0xff]   ;;  %v62_v34 = vld [vmem:[%s5781_s1] sm:$0xff]  ;;  %vm409_vm2 = vcmask 31744   ;;  %vm3194_vm3 = vcmask 1024  }
  0x33   :  { %306 = vmatpush1.bf16.msra.mxu0 %v4131_v11  ;;  %v398_v31 = vsub.s32 %v395_v26, %v4163_v25  ;;  %v61_v35 = vld [vmem:[%s5780_s0 + $0x8] sm:$0xff]  ;;  %v60_v40 = vld [vmem:[%s5780_s0] sm:$0xff]  ;;  %v392_v41 = vcombine.high %v62_v34, %v62_v34 }
  0x34   :  { %307 = vmatprep.subr.bf16.mxu0 %v4133_v12  ;;  %347 = vmatpush1.bf16.msra.mxu1 %v4140_v14  ;;  %v4191_v36 = vld [vmem:[#allocation3 + $0xcc] ss:$16 sps:$4 sm:$0xff]   ;;  %v108_v37 = vpack.c.bf16 %v61_v35, %v61_v35  ;;  %v4194_v38 = vld [vmem:[#allocation3 + $0xe4] ss:$16 sps:$4 sm:$0xff]   ;;  %v4200_v42 = vld [vmem:[#allocation3 + $0xc8] ss:$16 sps:$4 sm:$0xff]   ;;  %v107_v45 = vpack.c.bf16 %v60_v40, %v60_v40 }
  0x35   :  { %348 = vmatprep.subr.bf16.mxu1 %v4146_v16  ;;  %v399_v39 = vrot.slane %v62_v34, %v398_v31  ;;  %v4203_v43 = vld [vmem:[#allocation3 + $0xe0] ss:$16 sps:$4 sm:$0xff]   ;;  %v4206_v44 = vld [vmem:[#allocation3 + $0xec] ss:$16 sps:$4 sm:$0xff]   ;;  %v4213_v48 = vld [vmem:[#allocation3 + $0xe8] ss:$16 sps:$4 sm:$0xff]   ;;  %v406_v49 = vrot.slane %v392_v41, %v398_v31 }
  0x36   :  { %v4208_v46 = vunpack.c.l.b16 %v108_v37  ;;  %v4216_v50 = vld [vmem:[#allocation5 + $0x4] ss:$16 sps:$4 sm:$0xff]   ;;  %v4220_v51 = vunpack.c.l.b16 %v107_v45  ;;  %v4230_v55 = vld [vmem:[#allocation5 + $0xc] ss:$16 sps:$4 sm:$0xff]   ;;  %v4245_v58 = vld [vmem:[#allocation5] ss:$16 sps:$4 sm:$0xff]  }
  0x37   :  { %308 = vmatpush1.bf16.msra.mxu0 %v4143_v15  ;;  %v4211_v47 = vcombine.high %v399_v39, %v399_v39  ;;  %v4226_v53 = vsel %vm413_vm0, %v399_v39, 0  ;;  %v4228_v54 = vcombine.high %v406_v49, %v406_v49  ;;  %v4239_v57 = vsel %vm413_vm0, %v406_v49, 0  ;;  %v4249_v60 = vld [vmem:[#allocation5 + $0x24] ss:$16 sps:$4 sm:$0xff]   ;;  %v4252_v61 = vld [vmem:[#allocation5 + $0x8] ss:$16 sps:$4 sm:$0xff]  }
  0x38   :  { %309 = vmatprep.subr.bf16.mxu0 %v4149_v17  ;;  %349 = vmatpush1.bf16.msra.mxu1 %v4152_v21  ;;  %6187 = vst [vmem:[#allocation11_spill] sm:$0xff] %v4208_v46  ;;  %v387_v52 = vrot.slane %v4208_v46, 7  ;;  %6189 = vst [vmem:[#allocation13_spill] sm:$0xff] %v4239_v57  ;;  %v4254_v62 = vld [vmem:[#allocation5 + $0x2c] ss:$16 sps:$4 sm:$0xff]  }
  0x39   :  { %350 = vmatprep.subr.bf16.mxu1 %v4158_v23  ;;  %6188 = vst [vmem:[#allocation12_spill] sm:$0xff] %v4228_v54  ;;  %6190 = vst [vmem:[#allocation14_spill] sm:$0xff] %v4249_v60  ;;  %v4256_v63 = vld [vmem:[#allocation5 + $0x20] ss:$16 sps:$4 sm:$0xff]   ;;  %v4264_v0 = vld [vmem:[#allocation5 + $0x28] ss:$16 sps:$4 sm:$0xff]  }
  0x3a   :  { %v389_v56 = vsel %vm388_vm1, %v387_v52, %v4220_v51  ;;  %6191 = vst [vmem:[#allocation15_spill] sm:$0xff] %v4252_v61  ;;  %6192 = vst [vmem:[#allocation16_spill] sm:$0xff] %v4254_v62  ;;  %v4270_v18 = vld [vmem:[#allocation5 + $0x44] ss:$16 sps:$4 sm:$0xff]   ;;  %v4272_v19 = vld [vmem:[#allocation5 + $0x4c] ss:$16 sps:$4 sm:$0xff]  }
  0x3b   :  { %310 = vmatpush1.bf16.msra.mxu0 %v4155_v22  ;;  %v390_v59 = vpack.c.b16 %v389_v56, %v389_v56  ;;  %6193 = vst [vmem:[#allocation17_spill] sm:$0xff] %v4256_v63  ;;  %6194 = vst [vmem:[#allocation18_spill] sm:$0xff] %v4264_v0  ;;  %v4274_v20 = vld [vmem:[#allocation5 + $0x40] ss:$16 sps:$4 sm:$0xff]   ;;  %v4276_v26 = vld [vmem:[#allocation5 + $0x48] ss:$16 sps:$4 sm:$0xff]  }
  0x3c   :  { %311 = vmatprep.subr.bf16.mxu0 %v4161_v24  ;;  %351 = vmatpush1.bf16.msra.mxu1 %v4166_v27  ;;  %6195 = vst [vmem:[#allocation19_spill] sm:$0xff] %v4270_v18  ;;  %6196 = vst [vmem:[#allocation20_spill] sm:$0xff] %v4272_v19  ;;  %v4282_v31 = vld [vmem:[#allocation5 + $0x64] ss:$16 sps:$4 sm:$0xff]   ;;  %v4284_v34 = vld [vmem:[#allocation5 + $0x6c] ss:$16 sps:$4 sm:$0xff]  }
  0x3d   :  { %352 = vmatprep.subr.bf16.mxu1 %v4172_v29  ;;  %6197 = vst [vmem:[#allocation21_spill] sm:$0xff] %v4274_v20  ;;  %6198 = vst [vmem:[#allocation22_spill] sm:$0xff] %v4276_v26  ;;  %v4286_v35 = vld [vmem:[#allocation5 + $0x60] ss:$16 sps:$4 sm:$0xff]   ;;  %v4288_v37 = vld [vmem:[#allocation5 + $0x68] ss:$16 sps:$4 sm:$0xff]  }
  0x3e   :  { %6199 = vst [vmem:[#allocation23_spill] sm:$0xff] %v4282_v31  ;;  %6200 = vst [vmem:[#allocation24_spill] sm:$0xff] %v4284_v34  ;;  %v4294_v39 = vld [vmem:[#allocation5 + $0x84] ss:$16 sps:$4 sm:$0xff]   ;;  %v4296_v40 = vld [vmem:[#allocation5 + $0x8c] ss:$16 sps:$4 sm:$0xff]  }
  0x3f   :  { %312 = vmatpush1.bf16.msra.mxu0 %v4169_v28  ;;  %6201 = vst [vmem:[#allocation25_spill] sm:$0xff] %v4286_v35  ;;  %6202 = vst [vmem:[#allocation26_spill] sm:$0xff] %v4288_v37  ;;  %v4298_v41 = vld [vmem:[#allocation5 + $0x80] ss:$16 sps:$4 sm:$0xff]   ;;  %v4300_v45 = vld [vmem:[#allocation5 + $0x88] ss:$16 sps:$4 sm:$0xff]  }
  0x40   :  { %313 = vmatprep.subr.bf16.mxu0 %v4175_v30  ;;  %353 = vmatpush1.bf16.msra.mxu1 %v4180_v33  ;;  %6203 = vst [vmem:[#allocation27_spill] sm:$0xff] %v4294_v39  ;;  %6204 = vst [vmem:[#allocation28_spill] sm:$0xff] %v4296_v40  ;;  %v4306_v49 = vld [vmem:[#allocation5 + $0xa4] ss:$16 sps:$4 sm:$0xff]   ;;  %v4308_v52 = vld [vmem:[#allocation5 + $0xac] ss:$16 sps:$4 sm:$0xff]  }
  0x41   :  { %354 = vmatprep.subr.bf16.mxu1 %v4191_v36  ;;  %6205 = vst [vmem:[#allocation29_spill] sm:$0xff] %v4298_v41  ;;  %6206 = vst [vmem:[#allocation30_spill] sm:$0xff] %v4300_v45  ;;  %v4310_v56 = vld [vmem:[#allocation5 + $0xa0] ss:$16 sps:$4 sm:$0xff]  }
  0x42   :  { %6207 = vst [vmem:[#allocation31_spill] sm:$0xff] %v4306_v49  ;;  %6208 = vst [vmem:[#allocation32_spill] sm:$0xff] %v4308_v52 }
  0x43   :  { %314 = vmatpush1.bf16.msra.mxu0 %v4178_v32  ;;  %6209 = vst [vmem:[#allocation33_spill] sm:$0xff] %v4310_v56 }
  0x44   :  { %315 = vmatprep.subr.bf16.mxu0 %v4194_v38  ;;  %355 = vmatpush1.bf16.msra.mxu1 %v4200_v42 }
  0x45   :  { %356 = vmatprep.subr.bf16.mxu1 %v4206_v44 }
  0x47   :  { %316 = vmatpush1.bf16.msra.mxu0 %v4203_v43 }
  0x48   :  { %3234 = vmatprep.subr.msk.bf16.mxu0 %vm413_vm0, %v4211_v47  ;;  %357 = vmatpush1.bf16.msra.mxu1 %v4213_v48 }
  0x49   :  { %3236 = vmatprep.subr.msk.bf16.mxu1 %vm413_vm0, %v4228_v54 }
  0x4a   :  { %334 = vmatmul.mubr.bf16.vlgmr.msra.gmra.mrb[0].mxu0 %v5789_v1 }
  0x4b   :  { %427 = vmatpush1.bf16.msra.mxu0 %v4226_v53  ;;  %458 = vmatprep.mubr.bf16.mxu0 %v5789_v1 }
  0x4c   :  { %921 = vmatprep.subr.bf16.mxu0 %v4216_v50  ;;  %375 = vmatmul.mubr.bf16.vlgmr.msra.gmra.mrb[0].mxu1 %v5789_v1 }
  0x4d   :  { %468 = vmatpush1.bf16.msra.mxu1 %v4239_v57  ;;  %499 = vmatprep.mubr.bf16.mxu1 %v5789_v1 }
  0x4e   :  { %962 = vmatprep.subr.bf16.mxu1 %v4230_v55 }
  0x52   :  { %3235 = vmatmul.mubr.msk.bf16.vlgmr.msra.gmra.mrb[4].mxu0 %vm409_vm2, %v390_v59 }
  0x53   :  { %922 = vmatpush1.bf16.msra.mxu0 %v4245_v58  ;;  %953 = vmatprep.mubr.bf16.mxu0 %v5789_v1 }
  0x54   :  { %923 = vmatprep.subr.bf16.mxu0 %v4249_v60  ;;  %3237 = vmatmul.mubr.msk.bf16.vlgmr.msra.gmra.mrb[4].mxu1 %vm409_vm2, %v390_v59  ;;  %v4312_v59 = vld [vmem:[#allocation5 + $0xa8] ss:$16 sps:$4 sm:$0xff]  }
  0x55   :  { %963 = vmatpush1.bf16.msra.mxu1 %v4252_v61  ;;  %994 = vmatprep.mubr.bf16.mxu1 %v5789_v1  ;;  %6210 = vst [vmem:[#allocation34_spill] sm:$0xff] %v4312_v59  ;;  %v4318_v1 = vld [vmem:[#allocation5 + $0xc4] ss:$16 sps:$4 sm:$0xff]  }
  0x56   :  { %964 = vmatprep.subr.bf16.mxu1 %v4254_v62  ;;  %6211 = vst [vmem:[#allocation35_spill] sm:$0xff] %v4318_v1 }
  0x57   :  { %924 = vmatpush1.bf16.msra.mxu0 %v4256_v63 }
  0x58   :  { %925 = vmatprep.subr.bf16.mxu0 %v4270_v18 }
  0x59   :  { %965 = vmatpush1.bf16.msra.mxu1 %v4264_v0 }
  0x5a   :  { %966 = vmatprep.subr.bf16.mxu1 %v4272_v19 }
  0x5b   :  { %926 = vmatpush1.bf16.msra.mxu0 %v4274_v20  ;;  %v5917_v20 = vsub.s32 3, %v4163_v25 }
  0x5c   :  { %927 = vmatprep.subr.bf16.mxu0 %v4282_v31 }
  0x5d   :  { %967 = vmatpush1.bf16.msra.mxu1 %v4276_v26 }
  0x5e   :  { %968 = vmatprep.subr.bf16.mxu1 %v4284_v34 }
  0x5f   :  { %928 = vmatpush1.bf16.msra.mxu0 %v4286_v35 }
  0x60   :  { %929 = vmatprep.subr.bf16.mxu0 %v4294_v39  ;;  %v4410_v39 = vld [vmem:[#allocation5 + $0x1c4] ss:$16 sps:$4 sm:$0xff]  }
  0x61   :  { %969 = vmatpush1.bf16.msra.mxu1 %v4288_v37  ;;  %6243 = vst [vmem:[#allocation67_spill] sm:$0xff] %v4410_v39  ;;  %v4412_v37 = vld [vmem:[#allocation5 + $0x1cc] ss:$16 sps:$4 sm:$0xff]  }
  0x62   :  { %970 = vmatprep.subr.bf16.mxu1 %v4296_v40  ;;  %v4324_v40 = vld [vmem:[#allocation5 + $0xc8] ss:$16 sps:$4 sm:$0xff]   ;;  %6244 = vst [vmem:[#allocation68_spill] sm:$0xff] %v4412_v37 }
  0x63   :  { %930 = vmatpush1.bf16.msra.mxu0 %v4298_v41  ;;  %v4320_v41 = vld [vmem:[#allocation5 + $0xcc] ss:$16 sps:$4 sm:$0xff]   ;;  %6214 = vst [vmem:[#allocation38_spill] sm:$0xff] %v4324_v40 }
  0x64   :  { %931 = vmatprep.subr.bf16.mxu0 %v4306_v49  ;;  %6212 = vst [vmem:[#allocation36_spill] sm:$0xff] %v4320_v41  ;;  %v4336_v49 = vld [vmem:[#allocation5 + $0xe8] ss:$16 sps:$4 sm:$0xff]  }
  0x65   :  { %971 = vmatpush1.bf16.msra.mxu1 %v4300_v45  ;;  %v4322_v45 = vld [vmem:[#allocation5 + $0xc0] ss:$16 sps:$4 sm:$0xff]   ;;  %6218 = vst [vmem:[#allocation42_spill] sm:$0xff] %v4336_v49 }
  0x66   :  { %972 = vmatprep.subr.bf16.mxu1 %v4308_v52  ;;  %6213 = vst [vmem:[#allocation37_spill] sm:$0xff] %v4322_v45  ;;  %v4330_v52 = vld [vmem:[#allocation5 + $0xe4] ss:$16 sps:$4 sm:$0xff]  }
  0x67   :  { %932 = vmatpush1.bf16.msra.mxu0 %v4310_v56  ;;  %6215 = vst [vmem:[#allocation39_spill] sm:$0xff] %v4330_v52  ;;  %v4332_v56 = vld [vmem:[#allocation5 + $0xec] ss:$16 sps:$4 sm:$0xff]  }
  0x68   :  { %933 = vmatprep.subr.bf16.mxu0 %v4318_v1  ;;  %6216 = vst [vmem:[#allocation40_spill] sm:$0xff] %v4332_v56  ;;  %v4348_v1 = vld [vmem:[#allocation5 + $0x108] ss:$16 sps:$4 sm:$0xff]  }
  0x69   :  { %973 = vmatpush1.bf16.msra.mxu1 %v4312_v59  ;;  %v4334_v59 = vld [vmem:[#allocation5 + $0xe0] ss:$16 sps:$4 sm:$0xff]   ;;  %6222 = vst [vmem:[#allocation46_spill] sm:$0xff] %v4348_v1 }
  0x6a   :  { %974 = vmatprep.subr.bf16.mxu1 %v4320_v41  ;;  %6217 = vst [vmem:[#allocation41_spill] sm:$0xff] %v4334_v59  ;;  %v4342_v41 = vld [vmem:[#allocation5 + $0x104] ss:$16 sps:$4 sm:$0xff]  }
  0x6b   :  { %934 = vmatpush1.bf16.msra.mxu0 %v4322_v45  ;;  %6219 = vst [vmem:[#allocation43_spill] sm:$0xff] %v4342_v41  ;;  %v4344_v45 = vld [vmem:[#allocation5 + $0x10c] ss:$16 sps:$4 sm:$0xff]  }
  0x6c   :  { %935 = vmatprep.subr.bf16.mxu0 %v4330_v52  ;;  %6220 = vst [vmem:[#allocation44_spill] sm:$0xff] %v4344_v45  ;;  %v4360_v52 = vld [vmem:[#allocation5 + $0x128] ss:$16 sps:$4 sm:$0xff]  }
  0x6d   :  { %975 = vmatpush1.bf16.msra.mxu1 %v4324_v40  ;;  %v4346_v40 = vld [vmem:[#allocation5 + $0x100] ss:$16 sps:$4 sm:$0xff]   ;;  %6226 = vst [vmem:[#allocation50_spill] sm:$0xff] %v4360_v52 }
  0x6e   :  { %976 = vmatprep.subr.bf16.mxu1 %v4332_v56  ;;  %6221 = vst [vmem:[#allocation45_spill] sm:$0xff] %v4346_v40  ;;  %v4354_v56 = vld [vmem:[#allocation5 + $0x124] ss:$16 sps:$4 sm:$0xff]  }
  0x6f   :  { %936 = vmatpush1.bf16.msra.mxu0 %v4334_v59  ;;  %6223 = vst [vmem:[#allocation47_spill] sm:$0xff] %v4354_v56  ;;  %v4356_v59 = vld [vmem:[#allocation5 + $0x12c] ss:$16 sps:$4 sm:$0xff]  }
  0x70   :  { %937 = vmatprep.subr.bf16.mxu0 %v4342_v41  ;;  %6224 = vst [vmem:[#allocation48_spill] sm:$0xff] %v4356_v59  ;;  %v4372_v41 = vld [vmem:[#allocation5 + $0x148] ss:$16 sps:$4 sm:$0xff]  }
  0x71   :  { %977 = vmatpush1.bf16.msra.mxu1 %v4336_v49  ;;  %v4358_v49 = vld [vmem:[#allocation5 + $0x120] ss:$16 sps:$4 sm:$0xff]   ;;  %6230 = vst [vmem:[#allocation54_spill] sm:$0xff] %v4372_v41 }
  0x72   :  { %978 = vmatprep.subr.bf16.mxu1 %v4344_v45  ;;  %6225 = vst [vmem:[#allocation49_spill] sm:$0xff] %v4358_v49  ;;  %v4366_v45 = vld [vmem:[#allocation5 + $0x144] ss:$16 sps:$4 sm:$0xff]  }
  0x73   :  { %938 = vmatpush1.bf16.msra.mxu0 %v4346_v40  ;;  %6227 = vst [vmem:[#allocation51_spill] sm:$0xff] %v4366_v45  ;;  %v4368_v40 = vld [vmem:[#allocation5 + $0x14c] ss:$16 sps:$4 sm:$0xff]  }
  0x74   :  { %939 = vmatprep.subr.bf16.mxu0 %v4354_v56  ;;  %6228 = vst [vmem:[#allocation52_spill] sm:$0xff] %v4368_v40  ;;  %v4384_v56 = vld [vmem:[#allocation5 + $0x168] ss:$16 sps:$4 sm:$0xff]  }
  0x75   :  { %979 = vmatpush1.bf16.msra.mxu1 %v4348_v1  ;;  %v4370_v1 = vld [vmem:[#allocation5 + $0x140] ss:$16 sps:$4 sm:$0xff]   ;;  %6234 = vst [vmem:[#allocation58_spill] sm:$0xff] %v4384_v56 }
  0x76   :  { %980 = vmatprep.subr.bf16.mxu1 %v4356_v59  ;;  %6229 = vst [vmem:[#allocation53_spill] sm:$0xff] %v4370_v1  ;;  %v4378_v59 = vld [vmem:[#allocation5 + $0x164] ss:$16 sps:$4 sm:$0xff]  }
  0x77   :  { %940 = vmatpush1.bf16.msra.mxu0 %v4358_v49  ;;  %6231 = vst [vmem:[#allocation55_spill] sm:$0xff] %v4378_v59  ;;  %v4380_v49 = vld [vmem:[#allocation5 + $0x16c] ss:$16 sps:$4 sm:$0xff]  }
  0x78   :  { %941 = vmatprep.subr.bf16.mxu0 %v4366_v45  ;;  %6232 = vst [vmem:[#allocation56_spill] sm:$0xff] %v4380_v49  ;;  %v4396_v45 = vld [vmem:[#allocation5 + $0x188] ss:$16 sps:$4 sm:$0xff]  }
  0x79   :  { %981 = vmatpush1.bf16.msra.mxu1 %v4360_v52  ;;  %v4382_v52 = vld [vmem:[#allocation5 + $0x160] ss:$16 sps:$4 sm:$0xff]   ;;  %6238 = vst [vmem:[#allocation62_spill] sm:$0xff] %v4396_v45 }
  0x7a   :  { %982 = vmatprep.subr.bf16.mxu1 %v4368_v40  ;;  %6233 = vst [vmem:[#allocation57_spill] sm:$0xff] %v4382_v52  ;;  %v4390_v40 = vld [vmem:[#allocation5 + $0x184] ss:$16 sps:$4 sm:$0xff]  }
  0x7b   :  { %942 = vmatpush1.bf16.msra.mxu0 %v4370_v1  ;;  %6235 = vst [vmem:[#allocation59_spill] sm:$0xff] %v4390_v40  ;;  %v4392_v1 = vld [vmem:[#allocation5 + $0x18c] ss:$16 sps:$4 sm:$0xff]  }
  0x7c   :  { %943 = vmatprep.subr.bf16.mxu0 %v4378_v59  ;;  %6236 = vst [vmem:[#allocation60_spill] sm:$0xff] %v4392_v1  ;;  %v4408_v59 = vld [vmem:[#allocation5 + $0x1a8] ss:$16 sps:$4 sm:$0xff]  }
  0x7d   :  { %983 = vmatpush1.bf16.msra.mxu1 %v4372_v41  ;;  %v4394_v41 = vld [vmem:[#allocation5 + $0x180] ss:$16 sps:$4 sm:$0xff]   ;;  %6242 = vst [vmem:[#allocation66_spill] sm:$0xff] %v4408_v59 }
  0x7e   :  { %984 = vmatprep.subr.bf16.mxu1 %v4380_v49  ;;  %6237 = vst [vmem:[#allocation61_spill] sm:$0xff] %v4394_v41  ;;  %v4402_v49 = vld [vmem:[#allocation5 + $0x1a4] ss:$16 sps:$4 sm:$0xff]  }
  0x7f   :  { %944 = vmatpush1.bf16.msra.mxu0 %v4382_v52  ;;  %6239 = vst [vmem:[#allocation63_spill] sm:$0xff] %v4402_v49  ;;  %v4404_v52 = vld [vmem:[#allocation5 + $0x1ac] ss:$16 sps:$4 sm:$0xff]  }
  0x80   :  { %945 = vmatprep.subr.bf16.mxu0 %v4390_v40  ;;  %6240 = vst [vmem:[#allocation64_spill] sm:$0xff] %v4404_v52  ;;  %v4426_v40 = vld [vmem:[#allocation5 + $0x1ec] ss:$16 sps:$4 sm:$0xff]  }
  0x81   :  { %985 = vmatpush1.bf16.msra.mxu1 %v4384_v56  ;;  %v4406_v56 = vld [vmem:[#allocation5 + $0x1a0] ss:$16 sps:$4 sm:$0xff]   ;;  %6248 = vst [vmem:[#allocation72_spill] sm:$0xff] %v4426_v40 }
  0x82   :  { %986 = vmatprep.subr.bf16.mxu1 %v4392_v1  ;;  %6241 = vst [vmem:[#allocation65_spill] sm:$0xff] %v4406_v56  ;;  %v4424_v1 = vld [vmem:[#allocation5 + $0x1e4] ss:$16 sps:$4 sm:$0xff]  }
  0x83   :  { %946 = vmatpush1.bf16.msra.mxu0 %v4394_v41  ;;  %v4420_v41 = vld [vmem:[#allocation5 + $0x1c8] ss:$16 sps:$4 sm:$0xff]   ;;  %6247 = vst [vmem:[#allocation71_spill] sm:$0xff] %v4424_v1 }
  0x84   :  { %947 = vmatprep.subr.bf16.mxu0 %v4402_v49  ;;  %6246 = vst [vmem:[#allocation70_spill] sm:$0xff] %v4420_v41 }
  0x85   :  { %987 = vmatpush1.bf16.msra.mxu1 %v4396_v45  ;;  %v4418_v45 = vld [vmem:[#allocation5 + $0x1c0] ss:$16 sps:$4 sm:$0xff]  }
  0x86   :  { %988 = vmatprep.subr.bf16.mxu1 %v4404_v52  ;;  %6245 = vst [vmem:[#allocation69_spill] sm:$0xff] %v4418_v45  ;;  %v4430_v52 = vld [vmem:[#allocation5 + $0x1e0] ss:$16 sps:$4 sm:$0xff]  }
  0x87   :  { %948 = vmatpush1.bf16.msra.mxu0 %v4406_v56  ;;  %6249 = vst [vmem:[#allocation73_spill] sm:$0xff] %v4430_v52  ;;  %v4432_v56 = vld [vmem:[#allocation5 + $0x1e8] ss:$16 sps:$4 sm:$0xff]  }
  0x88   :  { %949 = vmatprep.subr.bf16.mxu0 %v4410_v39  ;;  %6250 = vst [vmem:[#allocation74_spill] sm:$0xff] %v4432_v56 }
  0x89   :  { %989 = vmatpush1.bf16.msra.mxu1 %v4408_v59  ;;  %v5907_v59 = vsub.s32 0, %v4163_v25 }
  0x8a   :  { %990 = vmatprep.subr.bf16.mxu1 %v4412_v37 }
  0x8b   :  { %950 = vmatpush1.bf16.msra.mxu0 %v4418_v45 }
  0x8c   :  { %951 = vmatprep.subr.bf16.mxu0 %v4424_v1  ;;  %v63_v1 = vld [vmem:[%s5783_s3] sm:$0xf] }
  0x8d   :  { %991 = vmatpush1.bf16.msra.mxu1 %v4420_v41 }
  0x8e   :  { %992 = vmatprep.subr.bf16.mxu1 %v4426_v40  ;;  %v5918_v40 = vsub.s32 1, %v4163_v25 }
  0x8f   :  { %952 = vmatpush1.bf16.msra.mxu0 %v4430_v52 }
  0x90   :  { %1028 = vmatprep.subr.bf16.mxu0 %v4107_v2  ;;  %v4447_v2 = vrot.slane %v63_v1, %v5907_v59 }
  0x91   :  { %993 = vmatpush1.bf16.msra.mxu1 %v4432_v56 }
  0x92   :  { %1069 = vmatprep.subr.bf16.mxu1 %v4117_v6 }
 0x11d   :  { %v335_v37 = vpop.f32.mrb[0].mxu0 }
 0x11e   :  { %v337_v45 = vpop.f32.mrb[1].mxu0 }
 0x11f   :  { %v339_v39 = vpop.f32.mrb[2].mxu0  ;;  %v376_v49 = vpop.f32.mrb[0].mxu1 }
 0x120   :  { %v340_v41 = vpop.f32.mrb[3].mxu0  ;;  %v378_v52 = vpop.f32.mrb[1].mxu1  ;;  %v4451_v39 = vrot.slane %v63_v1, %v5918_v40  ;;  %v6300_v40 = vld [vmem:[#allocation62_spill] sm:$0xff] }
 0x121   :  { %v380_v35 = vpop.f32.mrb[2].mxu1 }
 0x122   :  { %v381_v56 = vpop.f32.mrb[3].mxu1 }
 0x125   :  { %v460_v6 = vpop.f32.mrb[4].mxu0 }
 0x126   :  { %v461_v41 = vadd.f32 %v460_v6, %v335_v37  ;;  %v462_v34 = vpop.f32.mrb[5].mxu0  ;;  %v4458_v6 = vrot.slane %v63_v1, %v5917_v20  ;;  %v6299_v20 = vld [vmem:[#allocation61_spill] sm:$0xff] }
 0x127   :  { %v463_v31 = vadd.f32 %v462_v34, %v337_v45  ;;  %v464_v26 = vpop.f32.mrb[6].mxu0  ;;  %v501_v35 = vpop.f32.mrb[4].mxu1 }
 0x128   :  { %v508_v19 = vadd.f32 %v461_v41, %v4447_v2  ;;  %v465_v18 = vpop.f32.mrb[7].mxu0  ;;  %v502_v0 = vadd.f32 %v501_v35, %v376_v49  ;;  %v503_v59 = vpop.f32.mrb[5].mxu1  ;;  %v5916_v26 = vsub.s32 2, %v4163_v25 }
 0x129   :  { %v509_v56 = vadd.f32 %v463_v31, %v4451_v39  ;;  %v504_v62 = vadd.f32 %v503_v59, %v378_v52  ;;  %v505_v60 = vpop.f32.mrb[6].mxu1 }
 0x12a   :  { %v3238_v63 = vmul.f32 -1.442695, %v508_v19  ;;  %v506_v34 = vpop.f32.mrb[7].mxu1  ;;  %v4464_v31 = vrot.slane %v63_v1, %v5916_v26  ;;  %v6298_v26 = vld [vmem:[#allocation60_spill] sm:$0xff] }
 0x12b   :  { %v3239_v61 = vmul.f32 -1.442695, %v509_v56  ;;  %v511_v18 = vadd.f32 %v504_v62, %v4458_v6 }
 0x12c   :  { %3531 = vpow2.f32 %v3238_v63  ;;  %v510_v19 = vadd.f32 %v502_v0, %v4464_v31 }
 0x12d   :  { %3533 = vpow2.f32 %v3239_v61  ;;  %v3240_v37 = vmul.f32 -1.442695, %v511_v18 }
 0x12f   :  { %3535 = vpow2.f32 %v3240_v37 }
 0x130   :  { %3537 = vtanh.f32 %v510_v19  ;;  %v6251_v19 = vmov 0  }
 0x136   :  { %v3532_v60 = vpop.eup %3531 }
 0x137   :  { %v3534_v45 = vpop.eup %3533  ;;  %v515_v49 = vadd.f32 1.0, %v3532_v60  ;;  %v6280_v60 = vld [vmem:[#allocation42_spill] sm:$0xff] }
 0x138   :  { %v521_v52 = vadd.f32 1.0, %v3534_v45  ;;  %v6281_v45 = vld [vmem:[#allocation43_spill] sm:$0xff] }
 0x139   :  { %3539 = vrcp.f32 %v515_v49  ;;  %v3536_v63 = vpop.eup %3535  ;;  %v6282_v49 = vld [vmem:[#allocation44_spill] sm:$0xff] }
 0x13a   :  { %3541 = vrcp.f32 %v521_v52  ;;  %v3538_v59 = vpop.eup %3537  ;;  %v528_v35 = vadd.f32 1.0, %v3536_v63  ;;  %v6283_v52 = vld [vmem:[#allocation45_spill] sm:$0xff]  ;;  %v6284_v63 = vld [vmem:[#allocation46_spill] sm:$0xff] }
 0x13c   :  { %3543 = vrcp.f32 %v528_v35  ;;  %v6289_v35 = vld [vmem:[#allocation51_spill] sm:$0xff] }
 0x143   :  { %v3540_v61 = vpop.eup %3539 }
 0x144   :  { %v3542_v41 = vpop.eup %3541  ;;  %v532_v62 = vmul.f32 %v3540_v61, %v3538_v59  ;;  %v6285_v59 = vld [vmem:[#allocation47_spill] sm:$0xff]  ;;  %v6286_v61 = vld [vmem:[#allocation48_spill] sm:$0xff] }
 0x145   :  { %v531_v56 = vmul.f32 0.0, %v3542_v41  ;;  %v6287_v41 = vld [vmem:[#allocation49_spill] sm:$0xff] }
 0x146   :  { %v3544_v0 = vpop.eup %3543 }
 0x147   :  { %v4467_v1 = vadd.f32 %v532_v62, %v531_v56  ;;  %v6288_v62 = vld [vmem:[#allocation50_spill] sm:$0xff]  ;;  %v6290_v56 = vld [vmem:[#allocation52_spill] sm:$0xff] }
 0x149   :  { %3545 = vtanh.f32 %v4467_v1 }
 0x153   :  { %v3546_v34 = vpop.eup %3545 }
 0x154   :  { %v535_v18 = vmul.f32 %v3546_v34, %v3544_v0  ;;  %v6291_v0 = vld [vmem:[#allocation53_spill] sm:$0xff]  ;;  %v6292_v34 = vld [vmem:[#allocation54_spill] sm:$0xff] }
 0x156   :  { %v536_v37 = vpack.c.bf16 %v535_v18, %v535_v18  ;;  %v6293_v18 = vld [vmem:[#allocation55_spill] sm:$0xff] }
 0x158   :  { %954 = vmatmul.mubr.bf16.vlgmr.msra.gmra.mrb[8].mxu0 %v536_v37  ;;  %995 = vmatmul.mubr.bf16.vlgmr.msra.gmra.mrb[8].mxu1 %v536_v37 }
 0x159   :  { %1029 = vmatpush1.bf16.msra.mxu0 %v4109_v3  ;;  %1070 = vmatpush1.bf16.msra.mxu1 %v4119_v7  ;;  %v1110_v3 = vrot.slane %v4220_v51, 1  ;;  %v6252_v7 = vld [vmem:[#allocation15_spill] sm:$0xff] }
 0x15a   :  { %1030 = vmatprep.subr.bf16.mxu0 %v4112_v4  ;;  %1071 = vmatprep.subr.bf16.mxu1 %v4126_v9  ;;  %v6254_v9 = vld [vmem:[#allocation16_spill] sm:$0xff] }
 0x15b   :  { %1060 = vmatprep.mubr.bf16.mxu0 %v6251_v19  ;;  %1101 = vmatprep.mubr.bf16.mxu1 %v6251_v19  ;;  %v1111_v4 = vsel %vm388_vm1, %v4208_v46, %v1110_v3  ;;  %v6295_v3 = vld [vmem:[#allocation57_spill] sm:$0xff] }
 0x15d   :  { %1031 = vmatpush1.bf16.msra.mxu0 %v4114_v5  ;;  %1072 = vmatpush1.bf16.msra.mxu1 %v4128_v10  ;;  %v1112_v5 = vpack.c.b16 %v1111_v4, %v1111_v4  ;;  %v6255_v10 = vld [vmem:[#allocation17_spill] sm:$0xff]  ;;  %v6296_v4 = vld [vmem:[#allocation58_spill] sm:$0xff] }
 0x15e   :  { %1032 = vmatprep.subr.bf16.mxu0 %v4122_v8  ;;  %1073 = vmatprep.subr.bf16.mxu1 %v4137_v13  ;;  %v6253_v8 = vld [vmem:[#allocation14_spill] sm:$0xff]  ;;  %v6258_v13 = vld [vmem:[#allocation20_spill] sm:$0xff] }
 0x161   :  { %1033 = vmatpush1.bf16.msra.mxu0 %v4131_v11  ;;  %1074 = vmatpush1.bf16.msra.mxu1 %v4140_v14  ;;  %v6256_v11 = vld [vmem:[#allocation18_spill] sm:$0xff]  ;;  %v6259_v14 = vld [vmem:[#allocation21_spill] sm:$0xff] }
 0x162   :  { %1034 = vmatprep.subr.bf16.mxu0 %v4133_v12  ;;  %1075 = vmatprep.subr.bf16.mxu1 %v4146_v16  ;;  %v6257_v12 = vld [vmem:[#allocation19_spill] sm:$0xff] }
 0x163   :  { %v6261_v16 = vld [vmem:[#allocation23_spill] sm:$0xff] }
 0x165   :  { %1035 = vmatpush1.bf16.msra.mxu0 %v4143_v15  ;;  %1076 = vmatpush1.bf16.msra.mxu1 %v4152_v21  ;;  %v6260_v15 = vld [vmem:[#allocation22_spill] sm:$0xff]  ;;  %v6263_v21 = vld [vmem:[#allocation25_spill] sm:$0xff] }
 0x166   :  { %1036 = vmatprep.subr.bf16.mxu0 %v4149_v17  ;;  %1077 = vmatprep.subr.bf16.mxu1 %v4158_v23  ;;  %v6262_v17 = vld [vmem:[#allocation24_spill] sm:$0xff]  ;;  %v6265_v23 = vld [vmem:[#allocation27_spill] sm:$0xff] }
 0x169   :  { %1037 = vmatpush1.bf16.msra.mxu0 %v4155_v22  ;;  %1078 = vmatpush1.bf16.msra.mxu1 %v4166_v27  ;;  %v6264_v22 = vld [vmem:[#allocation26_spill] sm:$0xff]  ;;  %v6267_v27 = vld [vmem:[#allocation29_spill] sm:$0xff] }
 0x16a   :  { %1038 = vmatprep.subr.bf16.mxu0 %v4161_v24  ;;  %1079 = vmatprep.subr.bf16.mxu1 %v4172_v29  ;;  %v6266_v24 = vld [vmem:[#allocation28_spill] sm:$0xff]  ;;  %v6269_v29 = vld [vmem:[#allocation31_spill] sm:$0xff] }
 0x16d   :  { %1039 = vmatpush1.bf16.msra.mxu0 %v4169_v28  ;;  %1080 = vmatpush1.bf16.msra.mxu1 %v4180_v33  ;;  %v6268_v28 = vld [vmem:[#allocation30_spill] sm:$0xff] }
 0x16e   :  { %1040 = vmatprep.subr.bf16.mxu0 %v4175_v30  ;;  %1081 = vmatprep.subr.bf16.mxu1 %v4191_v36  ;;  %v6270_v30 = vld [vmem:[#allocation32_spill] sm:$0xff]  ;;  %v6272_v33 = vld [vmem:[#allocation34_spill] sm:$0xff]  ;;  %v6273_v36 = vld [vmem:[#allocation35_spill] sm:$0xff] }
 0x171   :  { %1041 = vmatpush1.bf16.msra.mxu0 %v4178_v32  ;;  %1082 = vmatpush1.bf16.msra.mxu1 %v4200_v42  ;;  %v6271_v32 = vld [vmem:[#allocation33_spill] sm:$0xff] }
 0x172   :  { %1042 = vmatprep.subr.bf16.mxu0 %v4194_v38  ;;  %1083 = vmatprep.subr.bf16.mxu1 %v4206_v44  ;;  %v6274_v38 = vld [vmem:[#allocation36_spill] sm:$0xff]  ;;  %v6275_v42 = vld [vmem:[#allocation37_spill] sm:$0xff]  ;;  %v6277_v44 = vld [vmem:[#allocation39_spill] sm:$0xff] }
 0x175   :  { %1043 = vmatpush1.bf16.msra.mxu0 %v4203_v43  ;;  %1084 = vmatpush1.bf16.msra.mxu1 %v4213_v48  ;;  %v6276_v43 = vld [vmem:[#allocation38_spill] sm:$0xff]  ;;  %v6278_v48 = vld [vmem:[#allocation40_spill] sm:$0xff] }
 0x176   :  { %3308 = vmatprep.subr.msk.bf16.mxu0 %vm413_vm0, %v4211_v47  ;;  %3310 = vmatprep.subr.msk.bf16.mxu1 %vm413_vm0, %v4228_v54 }
 0x178   :  { %1061 = vmatmul.mubr.bf16.vlgmr.msra.gmra.mrb[12].mxu0 %v536_v37  ;;  %1102 = vmatmul.mubr.bf16.vlgmr.msra.gmra.mrb[12].mxu1 %v536_v37  ;;  %v6294_v37 = vld [vmem:[#allocation56_spill] sm:$0xff] }
 0x179   :  { %1117 = vmatpush1.bf16.msra.mxu0 %v4226_v53  ;;  %1158 = vmatpush1.bf16.msra.mxu1 %v4239_v57 }
 0x17a   :  { %1148 = vmatprep.mubr.bf16.mxu0 %v6251_v19  ;;  %1189 = vmatprep.mubr.bf16.mxu1 %v6251_v19 }
 0x17b   :  { %1227 = vmatprep.subr.bf16.mxu0 %v4216_v50  ;;  %1268 = vmatprep.subr.bf16.mxu1 %v4230_v55  ;;  %v6279_v50 = vld [vmem:[#allocation41_spill] sm:$0xff] }
 0x180   :  { %3309 = vmatmul.mubr.msk.bf16.vlgmr.msra.gmra.mrb[16].mxu0 %vm409_vm2, %v1112_v5  ;;  %3311 = vmatmul.mubr.msk.bf16.vlgmr.msra.gmra.mrb[16].mxu1 %vm409_vm2, %v1112_v5  ;;  %v6297_v5 = vld [vmem:[#allocation59_spill] sm:$0xff] }
 0x181   :  { %1228 = vmatpush1.bf16.msra.mxu0 %v4245_v58  ;;  %1269 = vmatpush1.bf16.msra.mxu1 %v6252_v7 }
 0x182   :  { %1229 = vmatprep.subr.bf16.mxu0 %v6253_v8  ;;  %1270 = vmatprep.subr.bf16.mxu1 %v6254_v9 }
 0x185   :  { %1230 = vmatpush1.bf16.msra.mxu0 %v6255_v10  ;;  %1271 = vmatpush1.bf16.msra.mxu1 %v6256_v11 }
 0x186   :  { %1231 = vmatprep.subr.bf16.mxu0 %v6257_v12  ;;  %1272 = vmatprep.subr.bf16.mxu1 %v6258_v13 }
 0x189   :  { %1232 = vmatpush1.bf16.msra.mxu0 %v6259_v14  ;;  %1273 = vmatpush1.bf16.msra.mxu1 %v6260_v15 }
 0x18a   :  { %1233 = vmatprep.subr.bf16.mxu0 %v6261_v16  ;;  %1274 = vmatprep.subr.bf16.mxu1 %v6262_v17 }
 0x18d   :  { %1234 = vmatpush1.bf16.msra.mxu0 %v6263_v21  ;;  %1275 = vmatpush1.bf16.msra.mxu1 %v6264_v22 }
 0x18e   :  { %1235 = vmatprep.subr.bf16.mxu0 %v6265_v23  ;;  %1276 = vmatprep.subr.bf16.mxu1 %v6266_v24 }
 0x191   :  { %1236 = vmatpush1.bf16.msra.mxu0 %v6267_v27  ;;  %1277 = vmatpush1.bf16.msra.mxu1 %v6268_v28 }
 0x192   :  { %1237 = vmatprep.subr.bf16.mxu0 %v6269_v29  ;;  %1278 = vmatprep.subr.bf16.mxu1 %v6270_v30 }
 0x195   :  { %1238 = vmatpush1.bf16.msra.mxu0 %v6271_v32  ;;  %1279 = vmatpush1.bf16.msra.mxu1 %v6272_v33 }
 0x196   :  { %1239 = vmatprep.subr.bf16.mxu0 %v6273_v36  ;;  %1280 = vmatprep.subr.bf16.mxu1 %v6274_v38 }
 0x199   :  { %1240 = vmatpush1.bf16.msra.mxu0 %v6275_v42  ;;  %1281 = vmatpush1.bf16.msra.mxu1 %v6276_v43 }
 0x19a   :  { %1241 = vmatprep.subr.bf16.mxu0 %v6277_v44  ;;  %1282 = vmatprep.subr.bf16.mxu1 %v6278_v48 }
 0x19d   :  { %1242 = vmatpush1.bf16.msra.mxu0 %v6279_v50  ;;  %1283 = vmatpush1.bf16.msra.mxu1 %v6280_v60 }
 0x19e   :  { %1243 = vmatprep.subr.bf16.mxu0 %v6281_v45  ;;  %1284 = vmatprep.subr.bf16.mxu1 %v6282_v49 }
 0x1a1   :  { %1244 = vmatpush1.bf16.msra.mxu0 %v6283_v52  ;;  %1285 = vmatpush1.bf16.msra.mxu1 %v6284_v63 }
 0x1a2   :  { %1245 = vmatprep.subr.bf16.mxu0 %v6285_v59  ;;  %1286 = vmatprep.subr.bf16.mxu1 %v6286_v61 }
 0x1a5   :  { %1246 = vmatpush1.bf16.msra.mxu0 %v6287_v41  ;;  %1287 = vmatpush1.bf16.msra.mxu1 %v6288_v62 }
 0x1a6   :  { %1247 = vmatprep.subr.bf16.mxu0 %v6289_v35  ;;  %1288 = vmatprep.subr.bf16.mxu1 %v6290_v56  ;;  %v6301_v56 = vld [vmem:[#allocation63_spill] sm:$0xff] }
 0x1a9   :  { %1248 = vmatpush1.bf16.msra.mxu0 %v6291_v0  ;;  %1289 = vmatpush1.bf16.msra.mxu1 %v6292_v34  ;;  %v6302_v0 = vld [vmem:[#allocation64_spill] sm:$0xff]  ;;  %v6303_v34 = vld [vmem:[#allocation65_spill] sm:$0xff] }
 0x1aa   :  { %1249 = vmatprep.subr.bf16.mxu0 %v6293_v18  ;;  %1290 = vmatprep.subr.bf16.mxu1 %v6294_v37  ;;  %v6304_v18 = vld [vmem:[#allocation66_spill] sm:$0xff]  ;;  %v6305_v37 = vld [vmem:[#allocation67_spill] sm:$0xff] }
 0x1ad   :  { %1250 = vmatpush1.bf16.msra.mxu0 %v6295_v3  ;;  %1291 = vmatpush1.bf16.msra.mxu1 %v6296_v4  ;;  %v6306_v3 = vld [vmem:[#allocation68_spill] sm:$0xff]  ;;  %v6307_v4 = vld [vmem:[#allocation69_spill] sm:$0xff] }
 0x1ae   :  { %1251 = vmatprep.subr.bf16.mxu0 %v6297_v5  ;;  %1292 = vmatprep.subr.bf16.mxu1 %v6298_v26  ;;  %v6308_v5 = vld [vmem:[#allocation70_spill] sm:$0xff]  ;;  %v6309_v26 = vld [vmem:[#allocation71_spill] sm:$0xff] }
 0x1b1   :  { %1252 = vmatpush1.bf16.msra.mxu0 %v6299_v20  ;;  %1293 = vmatpush1.bf16.msra.mxu1 %v6300_v40  ;;  %v6310_v20 = vld [vmem:[#allocation72_spill] sm:$0xff]  ;;  %v6311_v40 = vld [vmem:[#allocation73_spill] sm:$0xff] }
 0x1b2   :  { %1253 = vmatprep.subr.bf16.mxu0 %v6301_v56  ;;  %1294 = vmatprep.subr.bf16.mxu1 %v6302_v0  ;;  %v6312_v56 = vld [vmem:[#allocation74_spill] sm:$0xff]  ;;  %v6313_v0 = vld [vmem:[#allocation9_spill] sm:$0xff] }
 0x1b5   :  { %1254 = vmatpush1.bf16.msra.mxu0 %v6303_v34  ;;  %1295 = vmatpush1.bf16.msra.mxu1 %v6304_v18  ;;  %v6314_v34 = vld [vmem:[#allocation10_spill] sm:$0xff] }
 0x1b6   :  { %1255 = vmatprep.subr.bf16.mxu0 %v6305_v37  ;;  %1296 = vmatprep.subr.bf16.mxu1 %v6306_v3  ;;  %v85_v3 = vld [vmem:[%s5785_s5] sm:$0xf] }
 0x1b9   :  { %1256 = vmatpush1.bf16.msra.mxu0 %v6307_v4  ;;  %1297 = vmatpush1.bf16.msra.mxu1 %v6308_v5  ;;  %v6315_v4 = vsub.s32 0, %v4163_v25 }
 0x1ba   :  { %1257 = vmatprep.subr.bf16.mxu0 %v6309_v26  ;;  %1298 = vmatprep.subr.bf16.mxu1 %v6310_v20  ;;  %v6317_v26 = vsub.s32 1, %v4163_v25 }
 0x1bb   :  { %v4586_v37 = vrot.slane %v85_v3, %v6315_v4  ;;  %v6319_v4 = vsub.s32 3, %v4163_v25 }
 0x1bc   :  { %v4590_v5 = vrot.slane %v85_v3, %v6317_v26 }
 0x1bd   :  { %1258 = vmatpush1.bf16.msra.mxu0 %v6311_v40  ;;  %1299 = vmatpush1.bf16.msra.mxu1 %v6312_v56  ;;  %6316 = vst [vmem:[#allocation15_spill] sm:$0xff] %v4586_v37  ;;  %v4596_v52 = vrot.slane %v85_v3, %v6319_v4 }
 0x1be   :  { %1334 = vmatprep.subr.bf16.mxu0 %v6313_v0  ;;  %1375 = vmatprep.subr.bf16.mxu1 %v6314_v34  ;;  %6318 = vst [vmem:[#allocation14_spill] sm:$0xff] %v4590_v5 }
 0x1bf   :  { %6320 = vst [vmem:[#allocation16_spill] sm:$0xff] %v4596_v52 }
 0x22b   :  { %v955_v20 = vpop.f32.mrb[8].mxu0  ;;  %v996_v40 = vpop.f32.mrb[8].mxu1 }
 0x22c   :  { %v956_v56 = vadd.f32 %v955_v20, %v4586_v37  ;;  %v957_v18 = vpop.f32.mrb[9].mxu0  ;;  %v998_v0 = vpop.f32.mrb[9].mxu1  ;;  %v6321_v20 = vsub.s32 2, %v4163_v25 }
 0x22d   :  { %v958_v34 = vadd.f32 %v957_v18, %v4590_v5  ;;  %v959_v35 = vpop.f32.mrb[10].mxu0  ;;  %v1000_v62 = vpop.f32.mrb[10].mxu1  ;;  %v999_v26 = vadd.f32 %v998_v0, %v4596_v52 }
 0x22e   :  { %v3305_v41 = vmul.f32 -1.442695, %v956_v56  ;;  %v960_v61 = vpop.f32.mrb[11].mxu0  ;;  %v1001_v59 = vpop.f32.mrb[11].mxu1  ;;  %v4601_v37 = vrot.slane %v85_v3, %v6321_v20 }
 0x22f   :  { %v3306_v63 = vmul.f32 -1.442695, %v958_v34  ;;  %v3307_v49 = vmul.f32 -1.442695, %v999_v26 }
 0x230   :  { %3547 = vpow2.f32 %v3305_v41  ;;  %6322 = vst [vmem:[#allocation17_spill] sm:$0xff] %v4601_v37  ;;  %v997_v35 = vadd.f32 %v996_v40, %v4601_v37 }
 0x231   :  { %3549 = vpow2.f32 %v3306_v63 }
 0x232   :  { %3551 = vpow2.f32 %v3307_v49 }
 0x233   :  { %3553 = vtanh.f32 %v997_v35 }
 0x23a   :  { %v3548_v62 = vpop.eup %3547 }
 0x23b   :  { %v3550_v56 = vpop.eup %3549  ;;  %v1006_v61 = vadd.f32 1.0, %v3548_v62 }
 0x23c   :  { %v1012_v59 = vadd.f32 1.0, %v3550_v56  ;;  %v3552_v18 = vpop.eup %3551 }
 0x23d   :  { %3555 = vrcp.f32 %v1006_v61  ;;  %v3554_v41 = vpop.eup %3553  ;;  %v1019_v4 = vadd.f32 1.0, %v3552_v18 }
 0x23e   :  { %3557 = vrcp.f32 %v1012_v59 }
 0x23f   :  { %3559 = vrcp.f32 %v1019_v4 }
 0x247   :  { %v3556_v63 = vpop.eup %3555 }
 0x248   :  { %v3558_v34 = vpop.eup %3557  ;;  %v1023_v0 = vmul.f32 %v3556_v63, %v3554_v41 }
 0x249   :  { %v1022_v25 = vmul.f32 0.0, %v3558_v34  ;;  %v3560_v45 = vpop.eup %3559 }
 0x24b   :  { %v4604_v3 = vadd.f32 %v1023_v0, %v1022_v25  ;;  %v1062_v26 = vpop.f32.mrb[12].mxu0  ;;  %v1103_v20 = vpop.f32.mrb[12].mxu1 }
 0x24c   :  { %v1064_v40 = vpop.f32.mrb[13].mxu0  ;;  %v1105_v37 = vpop.f32.mrb[13].mxu1 }
 0x24d   :  { %6323 = vst [vmem:[#allocation18_spill] sm:$0xff] %v4604_v3  ;;  %3561 = vtanh.f32 %v4604_v3  ;;  %v1066_v49 = vpop.f32.mrb[14].mxu0  ;;  %v1107_v35 = vpop.f32.mrb[14].mxu1 }
 0x24e   :  { %v1067_v62 = vpop.f32.mrb[15].mxu0  ;;  %v1108_v56 = vpop.f32.mrb[15].mxu1 }
 0x253   :  { %v1150_v61 = vpop.f32.mrb[16].mxu0  ;;  %v1191_v59 = vpop.f32.mrb[16].mxu1 }
 0x254   :  { %v1151_v52 = vadd.f32 %v1150_v61, %v1062_v26  ;;  %v1192_v5 = vadd.f32 %v1191_v59, %v1103_v20  ;;  %v1152_v41 = vpop.f32.mrb[17].mxu0  ;;  %v1193_v18 = vpop.f32.mrb[17].mxu1 }
 0x255   :  { %v1153_v63 = vadd.f32 %v1152_v41, %v1064_v40  ;;  %v1194_v34 = vadd.f32 %v1193_v18, %v1105_v37  ;;  %v1154_v0 = vpop.f32.mrb[18].mxu0  ;;  %v1195_v25 = vpop.f32.mrb[18].mxu1 }
 0x256   :  { %v1198_v4 = vadd.f32 %v1151_v52, %v4447_v2  ;;  %v1155_v60 = vpop.f32.mrb[19].mxu0  ;;  %v1196_v50 = vpop.f32.mrb[19].mxu1  ;;  %v1200_v40 = vadd.f32 %v1192_v5, %v4464_v31 }
 0x257   :  { %v3562_v3 = vpop.eup %3561  ;;  %v1199_v49 = vadd.f32 %v1153_v63, %v4451_v39  ;;  %v1201_v37 = vadd.f32 %v1194_v34, %v4458_v6 }
 0x258   :  { %v3312_v35 = vmul.f32 -1.442695, %v1198_v4  ;;  %v1026_v62 = vmul.f32 %v3562_v3, %v3560_v45 }
 0x259   :  { %v3313_v56 = vmul.f32 -1.442695, %v1199_v49  ;;  %v3314_v20 = vmul.f32 -1.442695, %v1201_v37  ;;  %v4636_v37 = vld [vmem:[#allocation3 + $0x28] ss:$16 sps:$4 sm:$0xff]  }
 0x25a   :  { %3563 = vpow2.f32 %v3312_v35  ;;  %v1027_v26 = vpack.c.bf16 %v1026_v62, %v1026_v62  ;;  %v4619_v35 = vld [vmem:[#allocation3] ss:$16 sps:$4 sm:$0xff]   ;;  %v4622_v62 = vld [vmem:[#allocation3 + $0x8] ss:$16 sps:$4 sm:$0xff]  }
 0x25b   :  { %3565 = vpow2.f32 %v3313_v56  ;;  %v4628_v56 = vld [vmem:[#allocation3 + $0x2c] ss:$16 sps:$4 sm:$0xff]  }
 0x25c   :  { %1259 = vmatprep.mubr.bf16.mxu0 %v1027_v26  ;;  %1300 = vmatprep.mubr.bf16.mxu1 %v1027_v26  ;;  %3567 = vpow2.f32 %v3314_v20  ;;  %v4633_v26 = vld [vmem:[#allocation3 + $0x20] ss:$16 sps:$4 sm:$0xff]   ;;  %v4639_v20 = vld [vmem:[#allocation3 + $0x44] ss:$16 sps:$4 sm:$0xff]  }
 0x25d   :  { %3569 = vtanh.f32 %v1200_v40  ;;  %v4642_v40 = vld [vmem:[#allocation3 + $0x4c] ss:$16 sps:$4 sm:$0xff]  }
 0x264   :  { %v3564_v61 = vpop.eup %3563 }
 0x265   :  { %v3566_v52 = vpop.eup %3565  ;;  %v1205_v60 = vadd.f32 1.0, %v3564_v61  ;;  %v4645_v61 = vld [vmem:[#allocation3 + $0x40] ss:$16 sps:$4 sm:$0xff]  }
 0x266   :  { %v1211_v50 = vadd.f32 1.0, %v3566_v52  ;;  %v3568_v45 = vpop.eup %3567  ;;  %v4648_v52 = vld [vmem:[#allocation3 + $0x48] ss:$16 sps:$4 sm:$0xff]  }
 0x267   :  { %3571 = vrcp.f32 %v1205_v60  ;;  %v3570_v3 = vpop.eup %3569  ;;  %v1218_v63 = vadd.f32 1.0, %v3568_v45  ;;  %v4651_v60 = vld [vmem:[#allocation3 + $0x64] ss:$16 sps:$4 sm:$0xff]   ;;  %v4657_v45 = vld [vmem:[#allocation3 + $0x60] ss:$16 sps:$4 sm:$0xff]  }
 0x268   :  { %3573 = vrcp.f32 %v1211_v50  ;;  %v4654_v50 = vld [vmem:[#allocation3 + $0x6c] ss:$16 sps:$4 sm:$0xff]  }
 0x269   :  { %3575 = vrcp.f32 %v1218_v63  ;;  %v4672_v63 = vld [vmem:[#allocation3 + $0x88] ss:$16 sps:$4 sm:$0xff]  }
 0x26a   :  { %6325 = vst [vmem:[#allocation20_spill] sm:$0xff] %v4672_v63 }
 0x271   :  { %v3572_v59 = vpop.eup %3571 }
 0x272   :  { %v3574_v41 = vpop.eup %3573  ;;  %v1222_v18 = vmul.f32 %v3572_v59, %v3570_v3  ;;  %v4660_v3 = vld [vmem:[#allocation3 + $0x68] ss:$16 sps:$4 sm:$0xff]   ;;  %v4663_v59 = vld [vmem:[#allocation3 + $0x84] ss:$16 sps:$4 sm:$0xff]  }
 0x273   :  { %v1221_v0 = vmul.f32 %v3574_v41, %v4467_v1  ;;  %v3576_v5 = vpop.eup %3575  ;;  %v4625_v1 = vld [vmem:[#allocation3 + $0x24] ss:$16 sps:$4 sm:$0xff]   ;;  %v4666_v41 = vld [vmem:[#allocation3 + $0x8c] ss:$16 sps:$4 sm:$0xff]  }
 0x275   :  { %v4612_v34 = vadd.f32 %v1222_v18, %v1221_v0  ;;  %v4669_v18 = vld [vmem:[#allocation3 + $0x80] ss:$16 sps:$4 sm:$0xff]   ;;  %v4675_v0 = vld [vmem:[#allocation3 + $0xa4] ss:$16 sps:$4 sm:$0xff]  }
 0x276   :  { %6324 = vst [vmem:[#allocation19_spill] sm:$0xff] %v4669_v18  ;;  %6326 = vst [vmem:[#allocation21_spill] sm:$0xff] %v4675_v0 }
 0x277   :  { %3577 = vtanh.f32 %v4612_v34 }
 0x281   :  { %v3578_v25 = vpop.eup %3577 }
 0x282   :  { %v1225_v4 = vmul.f32 %v3578_v25, %v3576_v5  ;;  %v4678_v5 = vld [vmem:[#allocation3 + $0xac] ss:$16 sps:$4 sm:$0xff]   ;;  %v4681_v25 = vld [vmem:[#allocation3 + $0xa0] ss:$16 sps:$4 sm:$0xff]  }
 0x283   :  { %6327 = vst [vmem:[#allocation22_spill] sm:$0xff] %v4678_v5  ;;  %6328 = vst [vmem:[#allocation23_spill] sm:$0xff] %v4681_v25 }
 0x284   :  { %v4615_v49 = vpack.c.bf16 %v1225_v4, %v1225_v4  ;;  %v4684_v4 = vld [vmem:[#allocation3 + $0xa8] ss:$16 sps:$4 sm:$0xff]  }
 0x285   :  { %6329 = vst [vmem:[#allocation24_spill] sm:$0xff] %v4684_v4 }
 0x286   :  { %1260 = vmatmul.mubr.bf16.vlgmr.msra.gmra.mrb[20].mxu0 %v4615_v49  ;;  %1301 = vmatmul.mubr.bf16.vlgmr.msra.gmra.mrb[20].mxu1 %v4615_v49 }
 0x287   :  { %1335 = vmatpush1.bf16.msra.mxu0 %v4619_v35  ;;  %1376 = vmatpush1.bf16.msra.mxu1 %v4622_v62 }
 0x288   :  { %1336 = vmatprep.subr.bf16.mxu0 %v4625_v1  ;;  %1377 = vmatprep.subr.bf16.mxu1 %v4628_v56 }
 0x289   :  { %1366 = vmatprep.mubr.bf16.mxu0 %v6251_v19  ;;  %1407 = vmatprep.mubr.bf16.mxu1 %v6251_v19 }
 0x28b   :  { %1337 = vmatpush1.bf16.msra.mxu0 %v4633_v26  ;;  %1378 = vmatpush1.bf16.msra.mxu1 %v4636_v37 }
 0x28c   :  { %1338 = vmatprep.subr.bf16.mxu0 %v4639_v20  ;;  %1379 = vmatprep.subr.bf16.mxu1 %v4642_v40 }
 0x28f   :  { %1339 = vmatpush1.bf16.msra.mxu0 %v4645_v61  ;;  %1380 = vmatpush1.bf16.msra.mxu1 %v4648_v52 }
 0x290   :  { %1340 = vmatprep.subr.bf16.mxu0 %v4651_v60  ;;  %1381 = vmatprep.subr.bf16.mxu1 %v4654_v50 }
 0x293   :  { %1341 = vmatpush1.bf16.msra.mxu0 %v4657_v45  ;;  %1382 = vmatpush1.bf16.msra.mxu1 %v4660_v3 }
 0x294   :  { %1342 = vmatprep.subr.bf16.mxu0 %v4663_v59  ;;  %1383 = vmatprep.subr.bf16.mxu1 %v4666_v41 }
 0x297   :  { %1343 = vmatpush1.bf16.msra.mxu0 %v4669_v18  ;;  %1384 = vmatpush1.bf16.msra.mxu1 %v4672_v63  ;;  %v4687_v18 = vld [vmem:[#allocation3 + $0xc4] ss:$16 sps:$4 sm:$0xff]   ;;  %v4690_v63 = vld [vmem:[#allocation3 + $0xcc] ss:$16 sps:$4 sm:$0xff]  }
 0x298   :  { %1344 = vmatprep.subr.bf16.mxu0 %v4675_v0  ;;  %1385 = vmatprep.subr.bf16.mxu1 %v4678_v5  ;;  %6330 = vst [vmem:[#allocation25_spill] sm:$0xff] %v4687_v18  ;;  %6331 = vst [vmem:[#allocation26_spill] sm:$0xff] %v4690_v63  ;;  %v4693_v0 = vld [vmem:[#allocation3 + $0xc0] ss:$16 sps:$4 sm:$0xff]   ;;  %v4696_v5 = vld [vmem:[#allocation3 + $0xc8] ss:$16 sps:$4 sm:$0xff]  }
 0x299   :  { %6332 = vst [vmem:[#allocation27_spill] sm:$0xff] %v4693_v0  ;;  %6333 = vst [vmem:[#allocation28_spill] sm:$0xff] %v4696_v5 }
 0x29b   :  { %1345 = vmatpush1.bf16.msra.mxu0 %v4681_v25  ;;  %1386 = vmatpush1.bf16.msra.mxu1 %v4684_v4  ;;  %v4699_v25 = vld [vmem:[#allocation3 + $0xe4] ss:$16 sps:$4 sm:$0xff]   ;;  %v4702_v4 = vld [vmem:[#allocation3 + $0xec] ss:$16 sps:$4 sm:$0xff]  }
 0x29c   :  { %1346 = vmatprep.subr.bf16.mxu0 %v4687_v18  ;;  %1387 = vmatprep.subr.bf16.mxu1 %v4690_v63  ;;  %v4705_v18 = vld [vmem:[#allocation3 + $0xe0] ss:$16 sps:$4 sm:$0xff]   ;;  %v4708_v63 = vld [vmem:[#allocation3 + $0xe8] ss:$16 sps:$4 sm:$0xff]  }
 0x29d   :  { %6334 = vst [vmem:[#allocation29_spill] sm:$0xff] %v4708_v63 }
 0x29f   :  { %1347 = vmatpush1.bf16.msra.mxu0 %v4693_v0  ;;  %1388 = vmatpush1.bf16.msra.mxu1 %v4696_v5  ;;  %v1416_v0 = vrot.slane %v4220_v51, 2  ;;  %v1417_v5 = vrot.slane %v4208_v46, 1  ;;  %v4724_v46 = vld [vmem:[#allocation5 + $0x4] ss:$16 sps:$4 sm:$0xff]  }
 0x2a0   :  { %1348 = vmatprep.subr.bf16.mxu0 %v4699_v25  ;;  %1389 = vmatprep.subr.bf16.mxu1 %v4702_v4  ;;  %6335 = vst [vmem:[#allocation30_spill] sm:$0xff] %v4724_v46 }
 0x2a3   :  { %1349 = vmatpush1.bf16.msra.mxu0 %v4705_v18  ;;  %1390 = vmatpush1.bf16.msra.mxu1 %v4708_v63  ;;  %v1418_v63 = vsel %vm388_vm1, %v1417_v5, %v1416_v0  ;;  %v6368_v0 = vld [vmem:[#allocation73_spill] sm:$0xff]  ;;  %v6369_v5 = vld [vmem:[#allocation74_spill] sm:$0xff] }
 0x2a4   :  { %3318 = vmatprep.subr.msk.bf16.mxu0 %vm413_vm0, %v4211_v47  ;;  %3320 = vmatprep.subr.msk.bf16.mxu1 %vm413_vm0, %v4228_v54  ;;  %v1419_v54 = vpack.c.b16 %v1418_v63, %v1418_v63  ;;  %v6367_v63 = vld [vmem:[#allocation72_spill] sm:$0xff] }
 0x2a6   :  { %1367 = vmatmul.mubr.bf16.vlgmr.msra.gmra.mrb[24].mxu0 %v4615_v49  ;;  %1408 = vmatmul.mubr.bf16.vlgmr.msra.gmra.mrb[24].mxu1 %v4615_v49  ;;  %v6366_v49 = vld [vmem:[#allocation71_spill] sm:$0xff] }
 0x2a7   :  { %1424 = vmatpush1.bf16.msra.mxu0 %v4226_v53  ;;  %1465 = vmatpush1.bf16.msra.mxu1 %v4239_v57 }
 0x2a8   :  { %1455 = vmatprep.mubr.bf16.mxu0 %v6251_v19  ;;  %1496 = vmatprep.mubr.bf16.mxu1 %v6251_v19 }
 0x2a9   :  { %1534 = vmatprep.subr.bf16.mxu0 %v4724_v46  ;;  %1575 = vmatprep.subr.bf16.mxu1 %v4230_v55  ;;  %v6337_v55 = vld [vmem:[#allocation42_spill] sm:$0xff] }
 0x2ae   :  { %3319 = vmatmul.mubr.msk.bf16.vlgmr.msra.gmra.mrb[28].mxu0 %vm409_vm2, %v1419_v54  ;;  %3321 = vmatmul.mubr.msk.bf16.vlgmr.msra.gmra.mrb[28].mxu1 %vm409_vm2, %v1419_v54  ;;  %v6336_v54 = vld [vmem:[#allocation41_spill] sm:$0xff] }
 0x2af   :  { %1535 = vmatpush1.bf16.msra.mxu0 %v4245_v58  ;;  %1576 = vmatpush1.bf16.msra.mxu1 %v6252_v7  ;;  %v6338_v58 = vld [vmem:[#allocation43_spill] sm:$0xff]  ;;  %v6339_v7 = vld [vmem:[#allocation44_spill] sm:$0xff] }
 0x2b0   :  { %1536 = vmatprep.subr.bf16.mxu0 %v6253_v8  ;;  %1577 = vmatprep.subr.bf16.mxu1 %v6254_v9  ;;  %v6340_v8 = vld [vmem:[#allocation45_spill] sm:$0xff]  ;;  %v6341_v9 = vld [vmem:[#allocation46_spill] sm:$0xff] }
 0x2b3   :  { %1537 = vmatpush1.bf16.msra.mxu0 %v6255_v10  ;;  %1578 = vmatpush1.bf16.msra.mxu1 %v6256_v11  ;;  %v6342_v10 = vld [vmem:[#allocation47_spill] sm:$0xff]  ;;  %v6343_v11 = vld [vmem:[#allocation48_spill] sm:$0xff] }
 0x2b4   :  { %1538 = vmatprep.subr.bf16.mxu0 %v6257_v12  ;;  %1579 = vmatprep.subr.bf16.mxu1 %v6258_v13  ;;  %v6344_v12 = vld [vmem:[#allocation49_spill] sm:$0xff]  ;;  %v6345_v13 = vld [vmem:[#allocation50_spill] sm:$0xff] }
 0x2b7   :  { %1539 = vmatpush1.bf16.msra.mxu0 %v6259_v14  ;;  %1580 = vmatpush1.bf16.msra.mxu1 %v6260_v15  ;;  %v6346_v14 = vld [vmem:[#allocation51_spill] sm:$0xff]  ;;  %v6347_v15 = vld [vmem:[#allocation52_spill] sm:$0xff] }
 0x2b8   :  { %1540 = vmatprep.subr.bf16.mxu0 %v6261_v16  ;;  %1581 = vmatprep.subr.bf16.mxu1 %v6262_v17  ;;  %v6348_v16 = vld [vmem:[#allocation53_spill] sm:$0xff]  ;;  %v6349_v17 = vld [vmem:[#allocation54_spill] sm:$0xff] }
 0x2bb   :  { %1541 = vmatpush1.bf16.msra.mxu0 %v6263_v21  ;;  %1582 = vmatpush1.bf16.msra.mxu1 %v6264_v22  ;;  %v6350_v21 = vld [vmem:[#allocation55_spill] sm:$0xff]  ;;  %v6351_v22 = vld [vmem:[#allocation56_spill] sm:$0xff] }
 0x2bc   :  { %1542 = vmatprep.subr.bf16.mxu0 %v6265_v23  ;;  %1583 = vmatprep.subr.bf16.mxu1 %v6266_v24  ;;  %v6352_v23 = vld [vmem:[#allocation57_spill] sm:$0xff]  ;;  %v6353_v24 = vld [vmem:[#allocation58_spill] sm:$0xff] }
 0x2bf   :  { %1543 = vmatpush1.bf16.msra.mxu0 %v6267_v27  ;;  %1584 = vmatpush1.bf16.msra.mxu1 %v6268_v28  ;;  %v6354_v27 = vld [vmem:[#allocation59_spill] sm:$0xff]  ;;  %v6355_v28 = vld [vmem:[#allocation60_spill] sm:$0xff] }
 0x2c0   :  { %1544 = vmatprep.subr.bf16.mxu0 %v6269_v29  ;;  %1585 = vmatprep.subr.bf16.mxu1 %v6270_v30  ;;  %v6356_v29 = vld [vmem:[#allocation61_spill] sm:$0xff]  ;;  %v6357_v30 = vld [vmem:[#allocation62_spill] sm:$0xff] }
 0x2c3   :  { %1545 = vmatpush1.bf16.msra.mxu0 %v6271_v32  ;;  %1586 = vmatpush1.bf16.msra.mxu1 %v6272_v33  ;;  %v6358_v32 = vld [vmem:[#allocation63_spill] sm:$0xff]  ;;  %v6359_v33 = vld [vmem:[#allocation64_spill] sm:$0xff] }
 0x2c4   :  { %1546 = vmatprep.subr.bf16.mxu0 %v6273_v36  ;;  %1587 = vmatprep.subr.bf16.mxu1 %v6274_v38  ;;  %v6360_v36 = vld [vmem:[#allocation65_spill] sm:$0xff]  ;;  %v6361_v38 = vld [vmem:[#allocation66_spill] sm:$0xff] }
 0x2c7   :  { %1547 = vmatpush1.bf16.msra.mxu0 %v6275_v42  ;;  %1588 = vmatpush1.bf16.msra.mxu1 %v6276_v43  ;;  %v6362_v42 = vld [vmem:[#allocation67_spill] sm:$0xff]  ;;  %v6363_v43 = vld [vmem:[#allocation68_spill] sm:$0xff] }
 0x2c8   :  { %1548 = vmatprep.subr.bf16.mxu0 %v6277_v44  ;;  %1589 = vmatprep.subr.bf16.mxu1 %v6278_v48  ;;  %v6364_v44 = vld [vmem:[#allocation69_spill] sm:$0xff]  ;;  %v6365_v48 = vld [vmem:[#allocation70_spill] sm:$0xff] }
 0x2cb   :  { %1549 = vmatpush1.bf16.msra.mxu0 %v6336_v54  ;;  %1590 = vmatpush1.bf16.msra.mxu1 %v6337_v55  ;;  %v4792_v54 = vld [vmem:[#allocation3 + $0x4] ss:$16 sps:$4 sm:$0xff]   ;;  %v4795_v55 = vld [vmem:[#allocation3 + $0xc] ss:$16 sps:$4 sm:$0xff]  }
 0x2cc   :  { %1550 = vmatprep.subr.bf16.mxu0 %v6338_v58  ;;  %1591 = vmatprep.subr.bf16.mxu1 %v6339_v7  ;;  %6370 = vst [vmem:[#allocation31_spill] sm:$0xff] %v4792_v54  ;;  %6371 = vst [vmem:[#allocation32_spill] sm:$0xff] %v4795_v55 }
 0x2cf   :  { %1551 = vmatpush1.bf16.msra.mxu0 %v6340_v8  ;;  %1592 = vmatpush1.bf16.msra.mxu1 %v6341_v9  ;;  %v6372_v8 = vld [vmem:[#allocation15_spill] sm:$0xff] }
 0x2d0   :  { %1552 = vmatprep.subr.bf16.mxu0 %v6342_v10  ;;  %1593 = vmatprep.subr.bf16.mxu1 %v6343_v11 }
 0x2d3   :  { %1553 = vmatpush1.bf16.msra.mxu0 %v6344_v12  ;;  %1594 = vmatpush1.bf16.msra.mxu1 %v6345_v13  ;;  %v6373_v12 = vld [vmem:[#allocation14_spill] sm:$0xff] }
 0x2d4   :  { %1554 = vmatprep.subr.bf16.mxu0 %v6346_v14  ;;  %1595 = vmatprep.subr.bf16.mxu1 %v6347_v15 }
 0x2d7   :  { %1555 = vmatpush1.bf16.msra.mxu0 %v6348_v16  ;;  %1596 = vmatpush1.bf16.msra.mxu1 %v6349_v17 }
 0x2d8   :  { %1556 = vmatprep.subr.bf16.mxu0 %v6350_v21  ;;  %1597 = vmatprep.subr.bf16.mxu1 %v6351_v22 }
 0x2db   :  { %1557 = vmatpush1.bf16.msra.mxu0 %v6352_v23  ;;  %1598 = vmatpush1.bf16.msra.mxu1 %v6353_v24  ;;  %v6374_v23 = vld [vmem:[#allocation16_spill] sm:$0xff] }
 0x2dc   :  { %1558 = vmatprep.subr.bf16.mxu0 %v6354_v27  ;;  %1599 = vmatprep.subr.bf16.mxu1 %v6355_v28  ;;  %v6375_v28 = vld [vmem:[#allocation17_spill] sm:$0xff] }
 0x2df   :  { %1559 = vmatpush1.bf16.msra.mxu0 %v6356_v29  ;;  %1600 = vmatpush1.bf16.msra.mxu1 %v6357_v30 }
 0x2e0   :  { %1560 = vmatprep.subr.bf16.mxu0 %v6358_v32  ;;  %1601 = vmatprep.subr.bf16.mxu1 %v6359_v33 }
 0x2e3   :  { %1561 = vmatpush1.bf16.msra.mxu0 %v6360_v36  ;;  %1602 = vmatpush1.bf16.msra.mxu1 %v6361_v38 }
 0x2e4   :  { %1562 = vmatprep.subr.bf16.mxu0 %v6362_v42  ;;  %1603 = vmatprep.subr.bf16.mxu1 %v6363_v43 }
 0x2e7   :  { %1563 = vmatpush1.bf16.msra.mxu0 %v6364_v44  ;;  %1604 = vmatpush1.bf16.msra.mxu1 %v6365_v48 }
 0x2e8   :  { %1564 = vmatprep.subr.bf16.mxu0 %v6366_v49  ;;  %1605 = vmatprep.subr.bf16.mxu1 %v6367_v63  ;;  %v6376_v63 = vld [vmem:[#allocation18_spill] sm:$0xff] }
 0x2eb   :  { %1565 = vmatpush1.bf16.msra.mxu0 %v6368_v0  ;;  %1606 = vmatpush1.bf16.msra.mxu1 %v6369_v5 }
 0x2ec   :  { %1641 = vmatprep.subr.bf16.mxu0 %v4792_v54  ;;  %1682 = vmatprep.subr.bf16.mxu1 %v4795_v55 }
 0x359   :  { %v1261_v58 = vpop.f32.mrb[20].mxu0  ;;  %v1302_v7 = vpop.f32.mrb[20].mxu1 }
 0x35a   :  { %v1262_v9 = vadd.f32 %v1261_v58, %v6372_v8  ;;  %v1263_v10 = vpop.f32.mrb[21].mxu0  ;;  %v1304_v11 = vpop.f32.mrb[21].mxu1  ;;  %v1303_v29 = vadd.f32 %v1302_v7, %v6375_v28 }
 0x35b   :  { %v1264_v13 = vadd.f32 %v1263_v10, %v6373_v12  ;;  %v1265_v14 = vpop.f32.mrb[22].mxu0  ;;  %v1306_v15 = vpop.f32.mrb[22].mxu1  ;;  %v1305_v24 = vadd.f32 %v1304_v11, %v6374_v23 }
 0x35c   :  { %v3315_v16 = vmul.f32 -1.442695, %v1262_v9  ;;  %v1266_v17 = vpop.f32.mrb[23].mxu0  ;;  %v1307_v21 = vpop.f32.mrb[23].mxu1 }
 0x35d   :  { %v3316_v22 = vmul.f32 -1.442695, %v1264_v13  ;;  %v3317_v27 = vmul.f32 -1.442695, %v1305_v24 }
 0x35e   :  { %3579 = vpow2.f32 %v3315_v16 }
 0x35f   :  { %3581 = vpow2.f32 %v3316_v22 }
 0x360   :  { %3583 = vpow2.f32 %v3317_v27 }
 0x361   :  { %3585 = vtanh.f32 %v1303_v29 }
 0x368   :  { %v3580_v30 = vpop.eup %3579 }
 0x369   :  { %v3582_v32 = vpop.eup %3581  ;;  %v1312_v33 = vadd.f32 1.0, %v3580_v30 }
 0x36a   :  { %v1318_v36 = vadd.f32 1.0, %v3582_v32  ;;  %v3584_v38 = vpop.eup %3583 }
 0x36b   :  { %3587 = vrcp.f32 %v1312_v33  ;;  %v3586_v42 = vpop.eup %3585  ;;  %v1325_v49 = vadd.f32 1.0, %v3584_v38 }
 0x36c   :  { %3589 = vrcp.f32 %v1318_v36 }
 0x36d   :  { %3591 = vrcp.f32 %v1325_v49 }
 0x375   :  { %v3588_v43 = vpop.eup %3587 }
 0x376   :  { %v3590_v44 = vpop.eup %3589  ;;  %v1329_v48 = vmul.f32 %v3588_v43, %v3586_v42 }
 0x377   :  { %v1328_v0 = vmul.f32 %v3590_v44, %v6376_v63  ;;  %v3592_v36 = vpop.eup %3591 }
 0x379   :  { %v1368_v5 = vpop.f32.mrb[24].mxu0  ;;  %v1409_v58 = vpop.f32.mrb[24].mxu1  ;;  %v4803_v9 = vadd.f32 %v1329_v48, %v1328_v0 }
 0x37a   :  { %v1370_v7 = vpop.f32.mrb[25].mxu0  ;;  %v1411_v10 = vpop.f32.mrb[25].mxu1 }
 0x37b   :  { %v1372_v11 = vpop.f32.mrb[26].mxu0  ;;  %v1413_v13 = vpop.f32.mrb[26].mxu1  ;;  %3593 = vtanh.f32 %v4803_v9 }
 0x37c   :  { %v1373_v14 = vpop.f32.mrb[27].mxu0  ;;  %v1414_v15 = vpop.f32.mrb[27].mxu1 }
 0x381   :  { %v1457_v16 = vpop.f32.mrb[28].mxu0  ;;  %v1498_v17 = vpop.f32.mrb[28].mxu1 }
 0x382   :  { %v1458_v21 = vadd.f32 %v1457_v16, %v1368_v5  ;;  %v1499_v22 = vadd.f32 %v1498_v17, %v1409_v58  ;;  %v1459_v24 = vpop.f32.mrb[29].mxu0  ;;  %v1500_v27 = vpop.f32.mrb[29].mxu1 }
 0x383   :  { %v1460_v29 = vadd.f32 %v1459_v24, %v1370_v7  ;;  %v1501_v30 = vadd.f32 %v1500_v27, %v1411_v10  ;;  %v1461_v32 = vpop.f32.mrb[30].mxu0  ;;  %v1502_v33 = vpop.f32.mrb[30].mxu1 }
 0x384   :  { %v1505_v38 = vadd.f32 %v1458_v21, %v4447_v2  ;;  %v1462_v42 = vpop.f32.mrb[31].mxu0  ;;  %v1503_v43 = vpop.f32.mrb[31].mxu1  ;;  %v1507_v10 = vadd.f32 %v1499_v22, %v4464_v31 }
 0x385   :  { %v3594_v44 = vpop.eup %3593  ;;  %v1506_v48 = vadd.f32 %v1460_v29, %v4451_v39  ;;  %v1508_v58 = vadd.f32 %v1501_v30, %v4458_v6  ;;  %v6378_v42 = vld [vmem:[#allocation20_spill] sm:$0xff]  ;;  %v6379_v43 = vld [vmem:[#allocation21_spill] sm:$0xff] }
 0x386   :  { %v3322_v49 = vmul.f32 -1.442695, %v1505_v38  ;;  %v1332_v63 = vmul.f32 %v3594_v44, %v3592_v36  ;;  %v6380_v44 = vld [vmem:[#allocation22_spill] sm:$0xff] }
 0x387   :  { %v3323_v0 = vmul.f32 -1.442695, %v1506_v48  ;;  %v3324_v7 = vmul.f32 -1.442695, %v1508_v58  ;;  %v6381_v48 = vld [vmem:[#allocation23_spill] sm:$0xff]  ;;  %v6386_v58 = vld [vmem:[#allocation28_spill] sm:$0xff] }
 0x388   :  { %3595 = vpow2.f32 %v3322_v49  ;;  %v1333_v5 = vpack.c.bf16 %v1332_v63, %v1332_v63  ;;  %v6382_v49 = vld [vmem:[#allocation24_spill] sm:$0xff]  ;;  %v6383_v63 = vld [vmem:[#allocation25_spill] sm:$0xff] }
 0x389   :  { %3597 = vpow2.f32 %v3323_v0  ;;  %v6384_v0 = vld [vmem:[#allocation26_spill] sm:$0xff] }
 0x38a   :  { %1566 = vmatprep.mubr.bf16.mxu0 %v1333_v5  ;;  %1607 = vmatprep.mubr.bf16.mxu1 %v1333_v5  ;;  %3599 = vpow2.f32 %v3324_v7  ;;  %v6385_v5 = vld [vmem:[#allocation27_spill] sm:$0xff]  ;;  %v6387_v7 = vld [vmem:[#allocation29_spill] sm:$0xff] }
 0x38b   :  { %3601 = vtanh.f32 %v1507_v10  ;;  %v1723_v10 = vrot.slane %v4220_v51, 3 }
 0x392   :  { %v3596_v11 = vpop.eup %3595 }
 0x393   :  { %v3598_v13 = vpop.eup %3597  ;;  %v1512_v14 = vadd.f32 1.0, %v3596_v11  ;;  %v6388_v11 = vld [vmem:[#allocation11_spill] sm:$0xff] }
 0x394   :  { %v1518_v15 = vadd.f32 1.0, %v3598_v13  ;;  %v3600_v16 = vpop.eup %3599  ;;  %v1724_v13 = vrot.slane %v6388_v11, 2 }
 0x395   :  { %3603 = vrcp.f32 %v1512_v14  ;;  %v3602_v17 = vpop.eup %3601  ;;  %v1525_v29 = vadd.f32 1.0, %v3600_v16  ;;  %v6389_v14 = vld [vmem:[#allocation12_spill] sm:$0xff] }
 0x396   :  { %3605 = vrcp.f32 %v1518_v15  ;;  %v1725_v15 = vsel %vm388_vm1, %v1724_v13, %v1723_v10  ;;  %v4858_v16 = vld [vmem:[#allocation5 + $0xc] ss:$16 sps:$4 sm:$0xff]   ;;  %v4890_v10 = vld [vmem:[#allocation5 + $0x48] ss:$16 sps:$4 sm:$0xff]   ;;  %v4893_v13 = vld [vmem:[#allocation5 + $0x64] ss:$16 sps:$4 sm:$0xff]  }
 0x397   :  { %3607 = vrcp.f32 %v1525_v29  ;;  %6390 = vst [vmem:[#allocation33_spill] sm:$0xff] %v4858_v16  ;;  %v4872_v29 = vld [vmem:[#allocation5 + $0x2c] ss:$16 sps:$4 sm:$0xff]   ;;  %6400 = vst [vmem:[#allocation41_spill] sm:$0xff] %v4890_v10 }
 0x398   :  { %6394 = vst [vmem:[#allocation37_spill] sm:$0xff] %v4872_v29  ;;  %6401 = vst [vmem:[#allocation42_spill] sm:$0xff] %v4893_v13 }
 0x39f   :  { %v3604_v21 = vpop.eup %3603 }
 0x3a0   :  { %v3606_v24 = vpop.eup %3605  ;;  %v1529_v27 = vmul.f32 %v3604_v21, %v3602_v17  ;;  %v1726_v17 = vpack.c.b16 %v1725_v15, %v1725_v15  ;;  %v4863_v21 = vld [vmem:[#allocation5] ss:$16 sps:$4 sm:$0xff]   ;;  %v4896_v15 = vld [vmem:[#allocation5 + $0x6c] ss:$16 sps:$4 sm:$0xff]  }
 0x3a1   :  { %v1528_v32 = vmul.f32 %v3606_v24, %v4612_v34  ;;  %v3608_v22 = vpop.eup %3607  ;;  %v6377_v34 = vld [vmem:[#allocation19_spill] sm:$0xff]  ;;  %6391 = vst [vmem:[#allocation34_spill] sm:$0xff] %v4863_v21  ;;  %v4866_v24 = vld [vmem:[#allocation5 + $0x8] ss:$16 sps:$4 sm:$0xff]   ;;  %6402 = vst [vmem:[#allocation43_spill] sm:$0xff] %v4896_v15 }
 0x3a2   :  { %6392 = vst [vmem:[#allocation35_spill] sm:$0xff] %v4866_v24 }
 0x3a3   :  { %v4811_v30 = vadd.f32 %v1529_v27, %v1528_v32  ;;  %v4869_v27 = vld [vmem:[#allocation5 + $0x24] ss:$16 sps:$4 sm:$0xff]   ;;  %v4875_v32 = vld [vmem:[#allocation5 + $0x20] ss:$16 sps:$4 sm:$0xff]  }
 0x3a4   :  { %6393 = vst [vmem:[#allocation36_spill] sm:$0xff] %v4869_v27  ;;  %6395 = vst [vmem:[#allocation38_spill] sm:$0xff] %v4875_v32 }
 0x3a5   :  { %3609 = vtanh.f32 %v4811_v30 }
 0x3af   :  { %v3610_v33 = vpop.eup %3609 }
 0x3b0   :  { %v1532_v36 = vmul.f32 %v3610_v33, %v3608_v22  ;;  %v4878_v22 = vld [vmem:[#allocation5 + $0x28] ss:$16 sps:$4 sm:$0xff]   ;;  %v4881_v33 = vld [vmem:[#allocation5 + $0x44] ss:$16 sps:$4 sm:$0xff]  }
 0x3b1   :  { %6396 = vst [vmem:[#allocation39_spill] sm:$0xff] %v4878_v22  ;;  %6397 = vst [vmem:[#allocation40_spill] sm:$0xff] %v4881_v33 }
 0x3b2   :  { %v1533_v38 = vpack.c.bf16 %v1532_v36, %v1532_v36  ;;  %v4884_v36 = vld [vmem:[#allocation5 + $0x4c] ss:$16 sps:$4 sm:$0xff]  }
 0x3b3   :  { %6398 = vst [vmem:[#allocation9_spill] sm:$0xff] %v4884_v36 }
 0x3b4   :  { %1567 = vmatmul.mubr.bf16.vlgmr.msra.gmra.mrb[32].mxu0 %v1533_v38  ;;  %1608 = vmatmul.mubr.bf16.vlgmr.msra.gmra.mrb[32].mxu1 %v1533_v38 }
 0x3b5   :  { %1642 = vmatpush1.bf16.msra.mxu0 %v4619_v35  ;;  %1683 = vmatpush1.bf16.msra.mxu1 %v4622_v62 }
 0x3b6   :  { %1643 = vmatprep.subr.bf16.mxu0 %v4625_v1  ;;  %1684 = vmatprep.subr.bf16.mxu1 %v4628_v56 }
 0x3b7   :  { %1673 = vmatprep.mubr.bf16.mxu0 %v6251_v19  ;;  %1714 = vmatprep.mubr.bf16.mxu1 %v6251_v19 }
 0x3b9   :  { %1644 = vmatpush1.bf16.msra.mxu0 %v4633_v26  ;;  %1685 = vmatpush1.bf16.msra.mxu1 %v4636_v37 }
 0x3ba   :  { %1645 = vmatprep.subr.bf16.mxu0 %v4639_v20  ;;  %1686 = vmatprep.subr.bf16.mxu1 %v4642_v40 }
 0x3bd   :  { %1646 = vmatpush1.bf16.msra.mxu0 %v4645_v61  ;;  %1687 = vmatpush1.bf16.msra.mxu1 %v4648_v52 }
 0x3be   :  { %1647 = vmatprep.subr.bf16.mxu0 %v4651_v60  ;;  %1688 = vmatprep.subr.bf16.mxu1 %v4654_v50 }
 0x3c1   :  { %1648 = vmatpush1.bf16.msra.mxu0 %v4657_v45  ;;  %1689 = vmatpush1.bf16.msra.mxu1 %v4660_v3 }
 0x3c2   :  { %1649 = vmatprep.subr.bf16.mxu0 %v4663_v59  ;;  %1690 = vmatprep.subr.bf16.mxu1 %v4666_v41 }
 0x3c5   :  { %1650 = vmatpush1.bf16.msra.mxu0 %v6377_v34  ;;  %1691 = vmatpush1.bf16.msra.mxu1 %v6378_v42 }
 0x3c6   :  { %1651 = vmatprep.subr.bf16.mxu0 %v6379_v43  ;;  %1692 = vmatprep.subr.bf16.mxu1 %v6380_v44 }
 0x3c9   :  { %1652 = vmatpush1.bf16.msra.mxu0 %v6381_v48  ;;  %1693 = vmatpush1.bf16.msra.mxu1 %v6382_v49 }
 0x3ca   :  { %1653 = vmatprep.subr.bf16.mxu0 %v6383_v63  ;;  %1694 = vmatprep.subr.bf16.mxu1 %v6384_v0 }
 0x3cd   :  { %1654 = vmatpush1.bf16.msra.mxu0 %v6385_v5  ;;  %1695 = vmatpush1.bf16.msra.mxu1 %v6386_v58 }
 0x3ce   :  { %1655 = vmatprep.subr.bf16.mxu0 %v4699_v25  ;;  %1696 = vmatprep.subr.bf16.mxu1 %v4702_v4 }
 0x3d1   :  { %1656 = vmatpush1.bf16.msra.mxu0 %v4705_v18  ;;  %1697 = vmatpush1.bf16.msra.mxu1 %v6387_v7 }
 0x3d2   :  { %3328 = vmatprep.subr.msk.bf16.mxu0 %vm413_vm0, %v4211_v47  ;;  %3330 = vmatprep.subr.msk.bf16.mxu1 %vm413_vm0, %v6389_v14 }
 0x3d4   :  { %1674 = vmatmul.mubr.bf16.vlgmr.msra.gmra.mrb[36].mxu0 %v1533_v38  ;;  %1715 = vmatmul.mubr.bf16.vlgmr.msra.gmra.mrb[36].mxu1 %v1533_v38  ;;  %v4887_v38 = vld [vmem:[#allocation5 + $0x40] ss:$16 sps:$4 sm:$0xff]  }
 0x3d5   :  { %1731 = vmatpush1.bf16.msra.mxu0 %v4226_v53  ;;  %1772 = vmatpush1.bf16.msra.mxu1 %v4239_v57  ;;  %6399 = vst [vmem:[#allocation10_spill] sm:$0xff] %v4887_v38 }
 0x3d6   :  { %1762 = vmatprep.mubr.bf16.mxu0 %v6251_v19  ;;  %1803 = vmatprep.mubr.bf16.mxu1 %v6251_v19 }
 0x3d7   :  { %1841 = vmatprep.subr.bf16.mxu0 %v4724_v46  ;;  %1882 = vmatprep.subr.bf16.mxu1 %v4858_v16 }
 0x3dc   :  { %3329 = vmatmul.mubr.msk.bf16.vlgmr.msra.gmra.mrb[40].mxu0 %vm409_vm2, %v1726_v17  ;;  %3331 = vmatmul.mubr.msk.bf16.vlgmr.msra.gmra.mrb[40].mxu1 %vm409_vm2, %v1726_v17  ;;  %v4899_v17 = vld [vmem:[#allocation5 + $0x60] ss:$16 sps:$4 sm:$0xff]  }
 0x3dd   :  { %1842 = vmatpush1.bf16.msra.mxu0 %v4863_v21  ;;  %1883 = vmatpush1.bf16.msra.mxu1 %v4866_v24  ;;  %6403 = vst [vmem:[#allocation44_spill] sm:$0xff] %v4899_v17 }
 0x3de   :  { %1843 = vmatprep.subr.bf16.mxu0 %v4869_v27  ;;  %1884 = vmatprep.subr.bf16.mxu1 %v4872_v29 }
 0x3e1   :  { %1844 = vmatpush1.bf16.msra.mxu0 %v4875_v32  ;;  %1885 = vmatpush1.bf16.msra.mxu1 %v4878_v22 }
 0x3e2   :  { %1845 = vmatprep.subr.bf16.mxu0 %v4881_v33  ;;  %1886 = vmatprep.subr.bf16.mxu1 %v4884_v36  ;;  %v4902_v36 = vld [vmem:[#allocation5 + $0x68] ss:$16 sps:$4 sm:$0xff]  }
 0x3e3   :  { %6404 = vst [vmem:[#allocation45_spill] sm:$0xff] %v4902_v36 }
 0x3e5   :  { %1846 = vmatpush1.bf16.msra.mxu0 %v4887_v38  ;;  %1887 = vmatpush1.bf16.msra.mxu1 %v4890_v10  ;;  %v4905_v38 = vld [vmem:[#allocation5 + $0x84] ss:$16 sps:$4 sm:$0xff]   ;;  %v4908_v10 = vld [vmem:[#allocation5 + $0x8c] ss:$16 sps:$4 sm:$0xff]  }
 0x3e6   :  { %1847 = vmatprep.subr.bf16.mxu0 %v4893_v13  ;;  %1888 = vmatprep.subr.bf16.mxu1 %v4896_v15  ;;  %6405 = vst [vmem:[#allocation46_spill] sm:$0xff] %v4905_v38  ;;  %6406 = vst [vmem:[#allocation47_spill] sm:$0xff] %v4908_v10  ;;  %v4911_v13 = vld [vmem:[#allocation5 + $0x80] ss:$16 sps:$4 sm:$0xff]   ;;  %v4914_v15 = vld [vmem:[#allocation5 + $0x88] ss:$16 sps:$4 sm:$0xff]  }
 0x3e7   :  { %6407 = vst [vmem:[#allocation48_spill] sm:$0xff] %v4911_v13  ;;  %6408 = vst [vmem:[#allocation49_spill] sm:$0xff] %v4914_v15 }
 0x3e9   :  { %1848 = vmatpush1.bf16.msra.mxu0 %v4899_v17  ;;  %1889 = vmatpush1.bf16.msra.mxu1 %v4902_v36  ;;  %v4917_v17 = vld [vmem:[#allocation5 + $0xa4] ss:$16 sps:$4 sm:$0xff]   ;;  %v4920_v36 = vld [vmem:[#allocation5 + $0xac] ss:$16 sps:$4 sm:$0xff]  }
 0x3ea   :  { %1849 = vmatprep.subr.bf16.mxu0 %v4905_v38  ;;  %1890 = vmatprep.subr.bf16.mxu1 %v4908_v10  ;;  %6409 = vst [vmem:[#allocation50_spill] sm:$0xff] %v4917_v17  ;;  %6410 = vst [vmem:[#allocation51_spill] sm:$0xff] %v4920_v36  ;;  %v4923_v38 = vld [vmem:[#allocation5 + $0xa0] ss:$16 sps:$4 sm:$0xff]   ;;  %v4926_v10 = vld [vmem:[#allocation5 + $0xa8] ss:$16 sps:$4 sm:$0xff]  }
 0x3eb   :  { %6411 = vst [vmem:[#allocation52_spill] sm:$0xff] %v4923_v38  ;;  %6412 = vst [vmem:[#allocation53_spill] sm:$0xff] %v4926_v10 }
 0x3ed   :  { %1850 = vmatpush1.bf16.msra.mxu0 %v4911_v13  ;;  %1891 = vmatpush1.bf16.msra.mxu1 %v4914_v15  ;;  %v4929_v13 = vld [vmem:[#allocation5 + $0xc4] ss:$16 sps:$4 sm:$0xff]   ;;  %v4932_v15 = vld [vmem:[#allocation5 + $0xcc] ss:$16 sps:$4 sm:$0xff]  }
 0x3ee   :  { %1851 = vmatprep.subr.bf16.mxu0 %v4917_v17  ;;  %1892 = vmatprep.subr.bf16.mxu1 %v4920_v36  ;;  %6413 = vst [vmem:[#allocation54_spill] sm:$0xff] %v4929_v13  ;;  %6414 = vst [vmem:[#allocation55_spill] sm:$0xff] %v4932_v15  ;;  %v4935_v17 = vld [vmem:[#allocation5 + $0xc0] ss:$16 sps:$4 sm:$0xff]   ;;  %v4938_v36 = vld [vmem:[#allocation5 + $0xc8] ss:$16 sps:$4 sm:$0xff]  }
 0x3ef   :  { %6415 = vst [vmem:[#allocation56_spill] sm:$0xff] %v4935_v17  ;;  %6416 = vst [vmem:[#allocation57_spill] sm:$0xff] %v4938_v36 }
 0x3f1   :  { %1852 = vmatpush1.bf16.msra.mxu0 %v4923_v38  ;;  %1893 = vmatpush1.bf16.msra.mxu1 %v4926_v10  ;;  %v4941_v38 = vld [vmem:[#allocation5 + $0xe4] ss:$16 sps:$4 sm:$0xff]   ;;  %v4944_v10 = vld [vmem:[#allocation5 + $0xec] ss:$16 sps:$4 sm:$0xff]  }
 0x3f2   :  { %1853 = vmatprep.subr.bf16.mxu0 %v4929_v13  ;;  %1894 = vmatprep.subr.bf16.mxu1 %v4932_v15  ;;  %6417 = vst [vmem:[#allocation58_spill] sm:$0xff] %v4941_v38  ;;  %6418 = vst [vmem:[#allocation59_spill] sm:$0xff] %v4944_v10  ;;  %v4947_v13 = vld [vmem:[#allocation5 + $0xe0] ss:$16 sps:$4 sm:$0xff]   ;;  %v4950_v15 = vld [vmem:[#allocation5 + $0xe8] ss:$16 sps:$4 sm:$0xff]  }
 0x3f3   :  { %6419 = vst [vmem:[#allocation60_spill] sm:$0xff] %v4947_v13  ;;  %6420 = vst [vmem:[#allocation61_spill] sm:$0xff] %v4950_v15 }
 0x3f5   :  { %1854 = vmatpush1.bf16.msra.mxu0 %v4935_v17  ;;  %1895 = vmatpush1.bf16.msra.mxu1 %v4938_v36  ;;  %v4953_v17 = vld [vmem:[#allocation5 + $0x104] ss:$16 sps:$4 sm:$0xff]   ;;  %v4956_v36 = vld [vmem:[#allocation5 + $0x10c] ss:$16 sps:$4 sm:$0xff]  }
 0x3f6   :  { %1855 = vmatprep.subr.bf16.mxu0 %v4941_v38  ;;  %1896 = vmatprep.subr.bf16.mxu1 %v4944_v10  ;;  %6421 = vst [vmem:[#allocation62_spill] sm:$0xff] %v4953_v17  ;;  %6422 = vst [vmem:[#allocation63_spill] sm:$0xff] %v4956_v36  ;;  %v4959_v38 = vld [vmem:[#allocation5 + $0x100] ss:$16 sps:$4 sm:$0xff]   ;;  %v4962_v10 = vld [vmem:[#allocation5 + $0x108] ss:$16 sps:$4 sm:$0xff]  }
 0x3f7   :  { %6423 = vst [vmem:[#allocation64_spill] sm:$0xff] %v4959_v38  ;;  %6424 = vst [vmem:[#allocation65_spill] sm:$0xff] %v4962_v10 }
 0x3f9   :  { %1856 = vmatpush1.bf16.msra.mxu0 %v4947_v13  ;;  %1897 = vmatpush1.bf16.msra.mxu1 %v4950_v15  ;;  %v4965_v13 = vld [vmem:[#allocation5 + $0x124] ss:$16 sps:$4 sm:$0xff]   ;;  %v4968_v15 = vld [vmem:[#allocation5 + $0x12c] ss:$16 sps:$4 sm:$0xff]  }
 0x3fa   :  { %1857 = vmatprep.subr.bf16.mxu0 %v4953_v17  ;;  %1898 = vmatprep.subr.bf16.mxu1 %v4956_v36  ;;  %6425 = vst [vmem:[#allocation66_spill] sm:$0xff] %v4965_v13  ;;  %6426 = vst [vmem:[#allocation67_spill] sm:$0xff] %v4968_v15  ;;  %v4971_v17 = vld [vmem:[#allocation5 + $0x120] ss:$16 sps:$4 sm:$0xff]   ;;  %v4974_v36 = vld [vmem:[#allocation5 + $0x128] ss:$16 sps:$4 sm:$0xff]  }
 0x3fb   :  { %6427 = vst [vmem:[#allocation68_spill] sm:$0xff] %v4971_v17  ;;  %6428 = vst [vmem:[#allocation69_spill] sm:$0xff] %v4974_v36 }
 0x3fd   :  { %1858 = vmatpush1.bf16.msra.mxu0 %v4959_v38  ;;  %1899 = vmatpush1.bf16.msra.mxu1 %v4962_v10  ;;  %v4977_v38 = vld [vmem:[#allocation5 + $0x144] ss:$16 sps:$4 sm:$0xff]   ;;  %v4980_v10 = vld [vmem:[#allocation5 + $0x14c] ss:$16 sps:$4 sm:$0xff]  }
 0x3fe   :  { %1859 = vmatprep.subr.bf16.mxu0 %v4965_v13  ;;  %1900 = vmatprep.subr.bf16.mxu1 %v4968_v15  ;;  %6429 = vst [vmem:[#allocation70_spill] sm:$0xff] %v4977_v38  ;;  %6430 = vst [vmem:[#allocation71_spill] sm:$0xff] %v4980_v10  ;;  %v4983_v13 = vld [vmem:[#allocation5 + $0x140] ss:$16 sps:$4 sm:$0xff]   ;;  %v4986_v15 = vld [vmem:[#allocation5 + $0x148] ss:$16 sps:$4 sm:$0xff]  }
 0x3ff   :  { %6431 = vst [vmem:[#allocation72_spill] sm:$0xff] %v4983_v13  ;;  %6432 = vst [vmem:[#allocation73_spill] sm:$0xff] %v4986_v15 }
 0x401   :  { %1860 = vmatpush1.bf16.msra.mxu0 %v4971_v17  ;;  %1901 = vmatpush1.bf16.msra.mxu1 %v4974_v36  ;;  %v4989_v17 = vld [vmem:[#allocation5 + $0x164] ss:$16 sps:$4 sm:$0xff]   ;;  %v4992_v36 = vld [vmem:[#allocation5 + $0x16c] ss:$16 sps:$4 sm:$0xff]  }
 0x402   :  { %1861 = vmatprep.subr.bf16.mxu0 %v4977_v38  ;;  %1902 = vmatprep.subr.bf16.mxu1 %v4980_v10  ;;  %6433 = vst [vmem:[#allocation74_spill] sm:$0xff] %v4989_v17  ;;  %6434 = vst [vmem:[#allocation18_spill] sm:$0xff] %v4992_v36  ;;  %v4995_v38 = vld [vmem:[#allocation5 + $0x160] ss:$16 sps:$4 sm:$0xff]   ;;  %v4998_v10 = vld [vmem:[#allocation5 + $0x168] ss:$16 sps:$4 sm:$0xff]  }
 0x403   :  { %6435 = vst [vmem:[#allocation19_spill] sm:$0xff] %v4995_v38  ;;  %6436 = vst [vmem:[#allocation20_spill] sm:$0xff] %v4998_v10 }
 0x405   :  { %1862 = vmatpush1.bf16.msra.mxu0 %v4983_v13  ;;  %1903 = vmatpush1.bf16.msra.mxu1 %v4986_v15  ;;  %v5001_v13 = vld [vmem:[#allocation5 + $0x184] ss:$16 sps:$4 sm:$0xff]   ;;  %v5004_v15 = vld [vmem:[#allocation5 + $0x18c] ss:$16 sps:$4 sm:$0xff]  }
 0x406   :  { %1863 = vmatprep.subr.bf16.mxu0 %v4989_v17  ;;  %1904 = vmatprep.subr.bf16.mxu1 %v4992_v36  ;;  %6437 = vst [vmem:[#allocation21_spill] sm:$0xff] %v5001_v13  ;;  %6438 = vst [vmem:[#allocation22_spill] sm:$0xff] %v5004_v15  ;;  %v5007_v17 = vld [vmem:[#allocation5 + $0x180] ss:$16 sps:$4 sm:$0xff]   ;;  %v5010_v36 = vld [vmem:[#allocation5 + $0x188] ss:$16 sps:$4 sm:$0xff]  }
 0x407   :  { %6439 = vst [vmem:[#allocation23_spill] sm:$0xff] %v5007_v17  ;;  %6440 = vst [vmem:[#allocation24_spill] sm:$0xff] %v5010_v36 }
 0x409   :  { %1864 = vmatpush1.bf16.msra.mxu0 %v4995_v38  ;;  %1905 = vmatpush1.bf16.msra.mxu1 %v4998_v10  ;;  %v5013_v38 = vld [vmem:[#allocation5 + $0x1a4] ss:$16 sps:$4 sm:$0xff]   ;;  %v5016_v10 = vld [vmem:[#allocation5 + $0x1ac] ss:$16 sps:$4 sm:$0xff]  }
 0x40a   :  { %1865 = vmatprep.subr.bf16.mxu0 %v5001_v13  ;;  %1906 = vmatprep.subr.bf16.mxu1 %v5004_v15  ;;  %6441 = vst [vmem:[#allocation25_spill] sm:$0xff] %v5013_v38  ;;  %6442 = vst [vmem:[#allocation26_spill] sm:$0xff] %v5016_v10  ;;  %v5019_v13 = vld [vmem:[#allocation5 + $0x1a0] ss:$16 sps:$4 sm:$0xff]   ;;  %v5022_v15 = vld [vmem:[#allocation5 + $0x1a8] ss:$16 sps:$4 sm:$0xff]  }
 0x40b   :  { %6443 = vst [vmem:[#allocation27_spill] sm:$0xff] %v5019_v13  ;;  %6444 = vst [vmem:[#allocation28_spill] sm:$0xff] %v5022_v15 }
 0x40d   :  { %1866 = vmatpush1.bf16.msra.mxu0 %v5007_v17  ;;  %1907 = vmatpush1.bf16.msra.mxu1 %v5010_v36  ;;  %v5025_v17 = vld [vmem:[#allocation5 + $0x1c4] ss:$16 sps:$4 sm:$0xff]   ;;  %v5028_v36 = vld [vmem:[#allocation5 + $0x1cc] ss:$16 sps:$4 sm:$0xff]  }
 0x40e   :  { %1867 = vmatprep.subr.bf16.mxu0 %v5013_v38  ;;  %1908 = vmatprep.subr.bf16.mxu1 %v5016_v10  ;;  %6445 = vst [vmem:[#allocation29_spill] sm:$0xff] %v5025_v17  ;;  %6446 = vst [vmem:[#allocation75_spill] sm:$0xff] %v5028_v36  ;;  %v5031_v38 = vld [vmem:[#allocation5 + $0x1c0] ss:$16 sps:$4 sm:$0xff]   ;;  %v5034_v10 = vld [vmem:[#allocation5 + $0x1c8] ss:$16 sps:$4 sm:$0xff]  }
 0x40f   :  { %6447 = vst [vmem:[#allocation76_spill] sm:$0xff] %v5031_v38  ;;  %6448 = vst [vmem:[#allocation77_spill] sm:$0xff] %v5034_v10 }
 0x411   :  { %1868 = vmatpush1.bf16.msra.mxu0 %v5019_v13  ;;  %1909 = vmatpush1.bf16.msra.mxu1 %v5022_v15  ;;  %v5037_v13 = vld [vmem:[#allocation5 + $0x1e4] ss:$16 sps:$4 sm:$0xff]   ;;  %v5040_v15 = vld [vmem:[#allocation5 + $0x1ec] ss:$16 sps:$4 sm:$0xff]  }
 0x412   :  { %1869 = vmatprep.subr.bf16.mxu0 %v5025_v17  ;;  %1910 = vmatprep.subr.bf16.mxu1 %v5028_v36  ;;  %6449 = vst [vmem:[#allocation78_spill] sm:$0xff] %v5037_v13  ;;  %6450 = vst [vmem:[#allocation79_spill] sm:$0xff] %v5040_v15  ;;  %v5043_v17 = vld [vmem:[#allocation5 + $0x1e0] ss:$16 sps:$4 sm:$0xff]   ;;  %v5046_v36 = vld [vmem:[#allocation5 + $0x1e8] ss:$16 sps:$4 sm:$0xff]  }
 0x413   :  { %6451 = vst [vmem:[#allocation80_spill] sm:$0xff] %v5043_v17  ;;  %6452 = vst [vmem:[#allocation81_spill] sm:$0xff] %v5046_v36 }
 0x415   :  { %1870 = vmatpush1.bf16.msra.mxu0 %v5031_v38  ;;  %1911 = vmatpush1.bf16.msra.mxu1 %v5034_v10 }
 0x416   :  { %1871 = vmatprep.subr.bf16.mxu0 %v5037_v13  ;;  %1912 = vmatprep.subr.bf16.mxu1 %v5040_v15 }
 0x419   :  { %1872 = vmatpush1.bf16.msra.mxu0 %v5043_v17  ;;  %1913 = vmatpush1.bf16.msra.mxu1 %v5046_v36 }
 0x41a   :  { %1948 = vmatprep.subr.bf16.mxu0 %v4792_v54  ;;  %1989 = vmatprep.subr.bf16.mxu1 %v4795_v55 }
 0x487   :  { %v1568_v10 = vpop.f32.mrb[32].mxu0  ;;  %v1609_v38 = vpop.f32.mrb[32].mxu1 }
 0x488   :  { %v1569_v13 = vadd.f32 %v1568_v10, %v6372_v8  ;;  %v1570_v33 = vpop.f32.mrb[33].mxu0  ;;  %v1611_v22 = vpop.f32.mrb[33].mxu1  ;;  %v1610_v55 = vadd.f32 %v1609_v38, %v6375_v28 }
 0x489   :  { %v1571_v15 = vadd.f32 %v1570_v33, %v6373_v12  ;;  %v1572_v32 = vpop.f32.mrb[34].mxu0  ;;  %v1613_v29 = vpop.f32.mrb[34].mxu1  ;;  %v1612_v54 = vadd.f32 %v1611_v22, %v6374_v23 }
 0x48a   :  { %v3325_v27 = vmul.f32 -1.442695, %v1569_v13  ;;  %v1573_v17 = vpop.f32.mrb[35].mxu0  ;;  %v1614_v24 = vpop.f32.mrb[35].mxu1 }
 0x48b   :  { %v3326_v21 = vmul.f32 -1.442695, %v1571_v15  ;;  %v3327_v36 = vmul.f32 -1.442695, %v1612_v54 }
 0x48c   :  { %3611 = vpow2.f32 %v3325_v27 }
 0x48d   :  { %3613 = vpow2.f32 %v3326_v21 }
 0x48e   :  { %3615 = vpow2.f32 %v3327_v36 }
 0x48f   :  { %3617 = vtanh.f32 %v1610_v55 }
 0x496   :  { %v3612_v16 = vpop.eup %3611 }
 0x497   :  { %v3614_v46 = vpop.eup %3613  ;;  %v1619_v10 = vadd.f32 1.0, %v3612_v16 }
 0x498   :  { %v1625_v8 = vadd.f32 1.0, %v3614_v46  ;;  %v3616_v29 = vpop.eup %3615 }
 0x499   :  { %3619 = vrcp.f32 %v1619_v10  ;;  %v3618_v32 = vpop.eup %3617  ;;  %v1632_v27 = vadd.f32 1.0, %v3616_v29 }
 0x49a   :  { %3621 = vrcp.f32 %v1625_v8 }
 0x49b   :  { %3623 = vrcp.f32 %v1632_v27 }
 0x4a3   :  { %v3620_v33 = vpop.eup %3619 }
 0x4a4   :  { %v3622_v24 = vpop.eup %3621  ;;  %v1636_v13 = vmul.f32 %v3620_v33, %v3618_v32 }
 0x4a5   :  { %v1635_v21 = vmul.f32 %v3622_v24, %v4803_v9 }
 0x4a7   :  { %v1675_v22 = vpop.f32.mrb[36].mxu0  ;;  %v1716_v54 = vpop.f32.mrb[36].mxu1  ;;  %v5056_v15 = vadd.f32 %v1636_v13, %v1635_v21 }
 0x4a8   :  { %v1677_v38 = vpop.f32.mrb[37].mxu0  ;;  %v1718_v16 = vpop.f32.mrb[37].mxu1 }
 0x4a9   :  { %6453 = vst [vmem:[#allocation82_spill] sm:$0xff] %v5056_v15  ;;  %v1679_v36 = vpop.f32.mrb[38].mxu0  ;;  %v1720_v55 = vpop.f32.mrb[38].mxu1  ;;  %3625 = vtanh.f32 %v5056_v15 }
 0x4aa   :  { %v1680_v46 = vpop.f32.mrb[39].mxu0  ;;  %v1721_v8 = vpop.f32.mrb[39].mxu1 }
 0x4ab   :  { %v3624_v21 = vpop.eup %3623 }
 0x4af   :  { %v1764_v17 = vpop.f32.mrb[40].mxu0  ;;  %v1805_v10 = vpop.f32.mrb[40].mxu1 }
 0x4b0   :  { %v1765_v28 = vadd.f32 %v1764_v17, %v1675_v22  ;;  %v1806_v32 = vadd.f32 %v1805_v10, %v1716_v54  ;;  %v1766_v29 = vpop.f32.mrb[41].mxu0  ;;  %v1807_v33 = vpop.f32.mrb[41].mxu1 }
 0x4b1   :  { %v1767_v9 = vadd.f32 %v1766_v29, %v1677_v38  ;;  %v1808_v24 = vadd.f32 %v1807_v33, %v1718_v16  ;;  %v1768_v23 = vpop.f32.mrb[42].mxu0  ;;  %v1809_v13 = vpop.f32.mrb[42].mxu1 }
 0x4b2   :  { %v1812_v27 = vadd.f32 %v1765_v28, %v4447_v2  ;;  %v1769_v12 = vpop.f32.mrb[43].mxu0  ;;  %v1810_v36 = vpop.f32.mrb[43].mxu1  ;;  %v1814_v38 = vadd.f32 %v1806_v32, %v4464_v31 }
 0x4b3   :  { %v3626_v55 = vpop.eup %3625  ;;  %v1813_v15 = vadd.f32 %v1767_v9, %v4451_v39  ;;  %v1815_v54 = vadd.f32 %v1808_v24, %v4458_v6 }
 0x4b4   :  { %v3332_v46 = vmul.f32 -1.442695, %v1812_v27  ;;  %v1639_v8 = vmul.f32 %v3626_v55, %v3624_v21  ;;  %v6481_v55 = vld [vmem:[#allocation56_spill] sm:$0xff] }
 0x4b5   :  { %v3333_v57 = vmul.f32 -1.442695, %v1813_v15  ;;  %v3334_v23 = vmul.f32 -1.442695, %v1815_v54  ;;  %v6485_v54 = vld [vmem:[#allocation60_spill] sm:$0xff] }
 0x4b6   :  { %3627 = vpow2.f32 %v3332_v46  ;;  %v1640_v22 = vpack.c.bf16 %v1639_v8, %v1639_v8  ;;  %v6482_v46 = vld [vmem:[#allocation57_spill] sm:$0xff]  ;;  %v6483_v8 = vld [vmem:[#allocation58_spill] sm:$0xff] }
 0x4b7   :  { %3629 = vpow2.f32 %v3333_v57 }
 0x4b8   :  { %1873 = vmatprep.mubr.bf16.mxu0 %v1640_v22  ;;  %1914 = vmatprep.mubr.bf16.mxu1 %v1640_v22  ;;  %3631 = vpow2.f32 %v3334_v23  ;;  %v6484_v22 = vld [vmem:[#allocation59_spill] sm:$0xff]  ;;  %v6486_v23 = vld [vmem:[#allocation61_spill] sm:$0xff] }
 0x4b9   :  { %3633 = vtanh.f32 %v1814_v38  ;;  %v6487_v38 = vld [vmem:[#allocation62_spill] sm:$0xff] }
 0x4c0   :  { %v3628_v16 = vpop.eup %3627 }
 0x4c1   :  { %v3630_v28 = vpop.eup %3629  ;;  %v1819_v12 = vadd.f32 1.0, %v3628_v16  ;;  %v6488_v16 = vld [vmem:[#allocation63_spill] sm:$0xff] }
 0x4c2   :  { %v1825_v17 = vadd.f32 1.0, %v3630_v28  ;;  %v3632_v10 = vpop.eup %3631  ;;  %v6489_v28 = vld [vmem:[#allocation64_spill] sm:$0xff] }
 0x4c3   :  { %3635 = vrcp.f32 %v1819_v12  ;;  %v3634_v15 = vpop.eup %3633  ;;  %v1832_v9 = vadd.f32 1.0, %v3632_v10  ;;  %v6490_v12 = vld [vmem:[#allocation65_spill] sm:$0xff]  ;;  %v6492_v10 = vld [vmem:[#allocation67_spill] sm:$0xff] }
 0x4c4   :  { %3637 = vrcp.f32 %v1825_v17  ;;  %v6491_v17 = vld [vmem:[#allocation66_spill] sm:$0xff] }
 0x4c5   :  { %3639 = vrcp.f32 %v1832_v9  ;;  %v6497_v9 = vld [vmem:[#allocation72_spill] sm:$0xff] }
 0x4cd   :  { %v3636_v29 = vpop.eup %3635 }
 0x4ce   :  { %v3638_v33 = vpop.eup %3637  ;;  %v1836_v57 = vmul.f32 %v3636_v29, %v3634_v15  ;;  %v6493_v15 = vld [vmem:[#allocation68_spill] sm:$0xff]  ;;  %v6494_v29 = vld [vmem:[#allocation69_spill] sm:$0xff] }
 0x4cf   :  { %v1835_v13 = vmul.f32 %v3638_v33, %v4811_v30  ;;  %v3640_v32 = vpop.eup %3639  ;;  %v6469_v30 = vld [vmem:[#allocation44_spill] sm:$0xff]  ;;  %v6495_v33 = vld [vmem:[#allocation70_spill] sm:$0xff] }
 0x4d1   :  { %v5064_v24 = vadd.f32 %v1836_v57, %v1835_v13  ;;  %v6496_v57 = vld [vmem:[#allocation71_spill] sm:$0xff]  ;;  %v6498_v13 = vld [vmem:[#allocation73_spill] sm:$0xff] }
 0x4d3   :  { %3641 = vtanh.f32 %v5064_v24 }
 0x4dd   :  { %v3642_v21 = vpop.eup %3641 }
 0x4de   :  { %v1839_v27 = vmul.f32 %v3642_v21, %v3640_v32  ;;  %v6499_v32 = vld [vmem:[#allocation74_spill] sm:$0xff] }
 0x4df   :  { %v6500_v21 = vld [vmem:[#allocation18_spill] sm:$0xff] }
 0x4e0   :  { %v1840_v36 = vpack.c.bf16 %v1839_v27, %v1839_v27  ;;  %v6501_v27 = vld [vmem:[#allocation19_spill] sm:$0xff] }
 0x4e2   :  { %1874 = vmatmul.mubr.bf16.vlgmr.msra.gmra.mrb[44].mxu0 %v1840_v36  ;;  %1915 = vmatmul.mubr.bf16.vlgmr.msra.gmra.mrb[44].mxu1 %v1840_v36 }
 0x4e3   :  { %1949 = vmatpush1.bf16.msra.mxu0 %v4619_v35  ;;  %1990 = vmatpush1.bf16.msra.mxu1 %v4622_v62  ;;  %v2030_v35 = vrot.slane %v4220_v51, 4  ;;  %v2031_v62 = vrot.slane %v6388_v11, 3 }
 0x4e4   :  { %1950 = vmatprep.subr.bf16.mxu0 %v4625_v1  ;;  %1991 = vmatprep.subr.bf16.mxu1 %v4628_v56  ;;  %v6454_v1 = vld [vmem:[#allocation13_spill] sm:$0xff] }
 0x4e5   :  { %1980 = vmatprep.mubr.bf16.mxu0 %v6251_v19  ;;  %2021 = vmatprep.mubr.bf16.mxu1 %v6251_v19  ;;  %v2032_v56 = vsel %vm388_vm1, %v2031_v62, %v2030_v35  ;;  %v6503_v35 = vld [vmem:[#allocation21_spill] sm:$0xff]  ;;  %v6504_v62 = vld [vmem:[#allocation22_spill] sm:$0xff] }
 0x4e7   :  { %1951 = vmatpush1.bf16.msra.mxu0 %v4633_v26  ;;  %1992 = vmatpush1.bf16.msra.mxu1 %v4636_v37  ;;  %v6455_v26 = vld [vmem:[#allocation30_spill] sm:$0xff]  ;;  %v6456_v37 = vld [vmem:[#allocation33_spill] sm:$0xff] }
 0x4e8   :  { %1952 = vmatprep.subr.bf16.mxu0 %v4639_v20  ;;  %1993 = vmatprep.subr.bf16.mxu1 %v4642_v40  ;;  %v2033_v20 = vpack.c.b16 %v2032_v56, %v2032_v56  ;;  %v6457_v40 = vld [vmem:[#allocation34_spill] sm:$0xff]  ;;  %v6505_v56 = vld [vmem:[#allocation23_spill] sm:$0xff] }
 0x4eb   :  { %1953 = vmatpush1.bf16.msra.mxu0 %v4645_v61  ;;  %1994 = vmatpush1.bf16.msra.mxu1 %v4648_v52  ;;  %v6458_v61 = vld [vmem:[#allocation35_spill] sm:$0xff]  ;;  %v6459_v52 = vld [vmem:[#allocation36_spill] sm:$0xff] }
 0x4ec   :  { %1954 = vmatprep.subr.bf16.mxu0 %v4651_v60  ;;  %1995 = vmatprep.subr.bf16.mxu1 %v4654_v50  ;;  %v6460_v60 = vld [vmem:[#allocation37_spill] sm:$0xff]  ;;  %v6461_v50 = vld [vmem:[#allocation38_spill] sm:$0xff] }
 0x4ef   :  { %1955 = vmatpush1.bf16.msra.mxu0 %v4657_v45  ;;  %1996 = vmatpush1.bf16.msra.mxu1 %v4660_v3  ;;  %v6462_v45 = vld [vmem:[#allocation39_spill] sm:$0xff]  ;;  %v6463_v3 = vld [vmem:[#allocation40_spill] sm:$0xff] }
 0x4f0   :  { %1956 = vmatprep.subr.bf16.mxu0 %v4663_v59  ;;  %1997 = vmatprep.subr.bf16.mxu1 %v4666_v41  ;;  %v6464_v59 = vld [vmem:[#allocation9_spill] sm:$0xff]  ;;  %v6465_v41 = vld [vmem:[#allocation10_spill] sm:$0xff] }
 0x4f3   :  { %1957 = vmatpush1.bf16.msra.mxu0 %v6377_v34  ;;  %1998 = vmatpush1.bf16.msra.mxu1 %v6378_v42  ;;  %v6470_v34 = vld [vmem:[#allocation45_spill] sm:$0xff]  ;;  %v6471_v42 = vld [vmem:[#allocation46_spill] sm:$0xff] }
 0x4f4   :  { %1958 = vmatprep.subr.bf16.mxu0 %v6379_v43  ;;  %1999 = vmatprep.subr.bf16.mxu1 %v6380_v44  ;;  %v6472_v43 = vld [vmem:[#allocation47_spill] sm:$0xff]  ;;  %v6473_v44 = vld [vmem:[#allocation48_spill] sm:$0xff] }
 0x4f7   :  { %1959 = vmatpush1.bf16.msra.mxu0 %v6381_v48  ;;  %2000 = vmatpush1.bf16.msra.mxu1 %v6382_v49  ;;  %v6474_v48 = vld [vmem:[#allocation49_spill] sm:$0xff]  ;;  %v6475_v49 = vld [vmem:[#allocation50_spill] sm:$0xff] }
 0x4f8   :  { %1960 = vmatprep.subr.bf16.mxu0 %v6383_v63  ;;  %2001 = vmatprep.subr.bf16.mxu1 %v6384_v0  ;;  %v6476_v63 = vld [vmem:[#allocation51_spill] sm:$0xff]  ;;  %v6477_v0 = vld [vmem:[#allocation52_spill] sm:$0xff] }
 0x4fb   :  { %1961 = vmatpush1.bf16.msra.mxu0 %v6385_v5  ;;  %2002 = vmatpush1.bf16.msra.mxu1 %v6386_v58  ;;  %v6478_v5 = vld [vmem:[#allocation53_spill] sm:$0xff]  ;;  %v6479_v58 = vld [vmem:[#allocation54_spill] sm:$0xff] }
 0x4fc   :  { %1962 = vmatprep.subr.bf16.mxu0 %v4699_v25  ;;  %2003 = vmatprep.subr.bf16.mxu1 %v4702_v4  ;;  %v6467_v25 = vld [vmem:[#allocation42_spill] sm:$0xff]  ;;  %v6468_v4 = vld [vmem:[#allocation43_spill] sm:$0xff] }
 0x4ff   :  { %1963 = vmatpush1.bf16.msra.mxu0 %v4705_v18  ;;  %2004 = vmatpush1.bf16.msra.mxu1 %v6387_v7  ;;  %v6466_v18 = vld [vmem:[#allocation41_spill] sm:$0xff]  ;;  %v6480_v7 = vld [vmem:[#allocation55_spill] sm:$0xff] }
 0x500   :  { %3338 = vmatprep.subr.msk.bf16.mxu0 %vm413_vm0, %v4211_v47  ;;  %3340 = vmatprep.subr.msk.bf16.mxu1 %vm413_vm0, %v6389_v14 }
 0x502   :  { %1981 = vmatmul.mubr.bf16.vlgmr.msra.gmra.mrb[48].mxu0 %v1840_v36  ;;  %2022 = vmatmul.mubr.bf16.vlgmr.msra.gmra.mrb[48].mxu1 %v1840_v36  ;;  %v6502_v36 = vld [vmem:[#allocation20_spill] sm:$0xff] }
 0x503   :  { %2038 = vmatpush1.bf16.msra.mxu0 %v4226_v53  ;;  %2079 = vmatpush1.bf16.msra.mxu1 %v6454_v1 }
 0x504   :  { %2069 = vmatprep.mubr.bf16.mxu0 %v6251_v19  ;;  %2110 = vmatprep.mubr.bf16.mxu1 %v6251_v19 }
 0x505   :  { %2148 = vmatprep.subr.bf16.mxu0 %v6455_v26  ;;  %2189 = vmatprep.subr.bf16.mxu1 %v6456_v37  ;;  %v6506_v26 = vld [vmem:[#allocation24_spill] sm:$0xff] }
 0x50a   :  { %3339 = vmatmul.mubr.msk.bf16.vlgmr.msra.gmra.mrb[52].mxu0 %vm409_vm2, %v2033_v20  ;;  %3341 = vmatmul.mubr.msk.bf16.vlgmr.msra.gmra.mrb[52].mxu1 %vm409_vm2, %v2033_v20  ;;  %v6507_v20 = vld [vmem:[#allocation25_spill] sm:$0xff] }
 0x50b   :  { %2149 = vmatpush1.bf16.msra.mxu0 %v6457_v40  ;;  %2190 = vmatpush1.bf16.msra.mxu1 %v6458_v61 }
 0x50c   :  { %2150 = vmatprep.subr.bf16.mxu0 %v6459_v52  ;;  %2191 = vmatprep.subr.bf16.mxu1 %v6460_v60 }
 0x50f   :  { %2151 = vmatpush1.bf16.msra.mxu0 %v6461_v50  ;;  %2192 = vmatpush1.bf16.msra.mxu1 %v6462_v45 }
 0x510   :  { %2152 = vmatprep.subr.bf16.mxu0 %v6463_v3  ;;  %2193 = vmatprep.subr.bf16.mxu1 %v6464_v59 }
 0x513   :  { %2153 = vmatpush1.bf16.msra.mxu0 %v6465_v41  ;;  %2194 = vmatpush1.bf16.msra.mxu1 %v6466_v18 }
 0x514   :  { %2154 = vmatprep.subr.bf16.mxu0 %v6467_v25  ;;  %2195 = vmatprep.subr.bf16.mxu1 %v6468_v4 }
 0x517   :  { %2155 = vmatpush1.bf16.msra.mxu0 %v6469_v30  ;;  %2196 = vmatpush1.bf16.msra.mxu1 %v6470_v34 }
 0x518   :  { %2156 = vmatprep.subr.bf16.mxu0 %v6471_v42  ;;  %2197 = vmatprep.subr.bf16.mxu1 %v6472_v43 }
 0x51b   :  { %2157 = vmatpush1.bf16.msra.mxu0 %v6473_v44  ;;  %2198 = vmatpush1.bf16.msra.mxu1 %v6474_v48 }
 0x51c   :  { %2158 = vmatprep.subr.bf16.mxu0 %v6475_v49  ;;  %2199 = vmatprep.subr.bf16.mxu1 %v6476_v63 }
 0x51f   :  { %2159 = vmatpush1.bf16.msra.mxu0 %v6477_v0  ;;  %2200 = vmatpush1.bf16.msra.mxu1 %v6478_v5 }
 0x520   :  { %2160 = vmatprep.subr.bf16.mxu0 %v6479_v58  ;;  %2201 = vmatprep.subr.bf16.mxu1 %v6480_v7 }
 0x523   :  { %2161 = vmatpush1.bf16.msra.mxu0 %v6481_v55  ;;  %2202 = vmatpush1.bf16.msra.mxu1 %v6482_v46 }
 0x524   :  { %2162 = vmatprep.subr.bf16.mxu0 %v6483_v8  ;;  %2203 = vmatprep.subr.bf16.mxu1 %v6484_v22 }
 0x527   :  { %2163 = vmatpush1.bf16.msra.mxu0 %v6485_v54  ;;  %2204 = vmatpush1.bf16.msra.mxu1 %v6486_v23 }
 0x528   :  { %2164 = vmatprep.subr.bf16.mxu0 %v6487_v38  ;;  %2205 = vmatprep.subr.bf16.mxu1 %v6488_v16 }
 0x52b   :  { %2165 = vmatpush1.bf16.msra.mxu0 %v6489_v28  ;;  %2206 = vmatpush1.bf16.msra.mxu1 %v6490_v12 }
 0x52c   :  { %2166 = vmatprep.subr.bf16.mxu0 %v6491_v17  ;;  %2207 = vmatprep.subr.bf16.mxu1 %v6492_v10 }
 0x52f   :  { %2167 = vmatpush1.bf16.msra.mxu0 %v6493_v15  ;;  %2208 = vmatpush1.bf16.msra.mxu1 %v6494_v29  ;;  %v6522_v29 = vld [vmem:[#allocation14_spill] sm:$0xff] }
 0x530   :  { %2168 = vmatprep.subr.bf16.mxu0 %v6495_v33  ;;  %2209 = vmatprep.subr.bf16.mxu1 %v6496_v57  ;;  %v6521_v57 = vld [vmem:[#allocation15_spill] sm:$0xff] }
 0x533   :  { %2169 = vmatpush1.bf16.msra.mxu0 %v6497_v9  ;;  %2210 = vmatpush1.bf16.msra.mxu1 %v6498_v13  ;;  %v6508_v9 = vld [vmem:[#allocation26_spill] sm:$0xff]  ;;  %v6509_v13 = vld [vmem:[#allocation27_spill] sm:$0xff] }
 0x534   :  { %2170 = vmatprep.subr.bf16.mxu0 %v6499_v32  ;;  %2211 = vmatprep.subr.bf16.mxu1 %v6500_v21  ;;  %v6510_v32 = vld [vmem:[#allocation28_spill] sm:$0xff]  ;;  %v6511_v21 = vld [vmem:[#allocation29_spill] sm:$0xff] }
 0x537   :  { %2171 = vmatpush1.bf16.msra.mxu0 %v6501_v27  ;;  %2212 = vmatpush1.bf16.msra.mxu1 %v6502_v36  ;;  %v6512_v27 = vld [vmem:[#allocation75_spill] sm:$0xff]  ;;  %v6513_v36 = vld [vmem:[#allocation76_spill] sm:$0xff] }
 0x538   :  { %2172 = vmatprep.subr.bf16.mxu0 %v6503_v35  ;;  %2213 = vmatprep.subr.bf16.mxu1 %v6504_v62  ;;  %v6514_v35 = vld [vmem:[#allocation77_spill] sm:$0xff]  ;;  %v6515_v62 = vld [vmem:[#allocation78_spill] sm:$0xff] }
 0x53b   :  { %2173 = vmatpush1.bf16.msra.mxu0 %v6505_v56  ;;  %2214 = vmatpush1.bf16.msra.mxu1 %v6506_v26  ;;  %v6516_v56 = vld [vmem:[#allocation79_spill] sm:$0xff]  ;;  %v6517_v26 = vld [vmem:[#allocation80_spill] sm:$0xff] }
 0x53c   :  { %2174 = vmatprep.subr.bf16.mxu0 %v6507_v20  ;;  %2215 = vmatprep.subr.bf16.mxu1 %v6508_v9  ;;  %v6518_v20 = vld [vmem:[#allocation81_spill] sm:$0xff]  ;;  %v6519_v9 = vld [vmem:[#allocation31_spill] sm:$0xff] }
 0x53f   :  { %2175 = vmatpush1.bf16.msra.mxu0 %v6509_v13  ;;  %2216 = vmatpush1.bf16.msra.mxu1 %v6510_v32  ;;  %v6520_v13 = vld [vmem:[#allocation32_spill] sm:$0xff] }
 0x540   :  { %2176 = vmatprep.subr.bf16.mxu0 %v6511_v21  ;;  %2217 = vmatprep.subr.bf16.mxu1 %v6512_v27 }
 0x543   :  { %2177 = vmatpush1.bf16.msra.mxu0 %v6513_v36  ;;  %2218 = vmatpush1.bf16.msra.mxu1 %v6514_v35 }
 0x544   :  { %2178 = vmatprep.subr.bf16.mxu0 %v6515_v62  ;;  %2219 = vmatprep.subr.bf16.mxu1 %v6516_v56 }
 0x547   :  { %2179 = vmatpush1.bf16.msra.mxu0 %v6517_v26  ;;  %2220 = vmatpush1.bf16.msra.mxu1 %v6518_v20  ;;  %v6523_v20 = vld [vmem:[#allocation16_spill] sm:$0xff] }
 0x548   :  { %2255 = vmatprep.subr.bf16.mxu0 %v6519_v9  ;;  %2296 = vmatprep.subr.bf16.mxu1 %v6520_v13  ;;  %v6524_v13 = vld [vmem:[#allocation17_spill] sm:$0xff] }
 0x5b5   :  { %v1875_v32 = vpop.f32.mrb[44].mxu0  ;;  %v1916_v21 = vpop.f32.mrb[44].mxu1 }
 0x5b6   :  { %v1876_v27 = vadd.f32 %v1875_v32, %v6521_v57  ;;  %v1877_v33 = vpop.f32.mrb[45].mxu0  ;;  %v1918_v36 = vpop.f32.mrb[45].mxu1  ;;  %v1917_v28 = vadd.f32 %v1916_v21, %v6524_v13 }
 0x5b7   :  { %v1878_v35 = vadd.f32 %v1877_v33, %v6522_v29  ;;  %v1879_v15 = vpop.f32.mrb[46].mxu0  ;;  %v1920_v62 = vpop.f32.mrb[46].mxu1  ;;  %v1919_v9 = vadd.f32 %v1918_v36, %v6523_v20 }
 0x5b8   :  { %v3335_v10 = vmul.f32 -1.442695, %v1876_v27  ;;  %v1880_v56 = vpop.f32.mrb[47].mxu0  ;;  %v1921_v17 = vpop.f32.mrb[47].mxu1  ;;  %v6525_v62 = vld [vmem:[#allocation82_spill] sm:$0xff] }
 0x5b9   :  { %v3336_v26 = vmul.f32 -1.442695, %v1878_v35  ;;  %v3337_v12 = vmul.f32 -1.442695, %v1919_v9 }
 0x5ba   :  { %3643 = vpow2.f32 %v3335_v10 }
 0x5bb   :  { %3645 = vpow2.f32 %v3336_v26 }
 0x5bc   :  { %3647 = vpow2.f32 %v3337_v12 }
 0x5bd   :  { %3649 = vtanh.f32 %v1917_v28 }
 0x5c4   :  { %v3644_v16 = vpop.eup %3643 }
 0x5c5   :  { %v3646_v38 = vpop.eup %3645  ;;  %v1926_v32 = vadd.f32 1.0, %v3644_v16 }
 0x5c6   :  { %v1932_v57 = vadd.f32 1.0, %v3646_v38  ;;  %v3648_v15 = vpop.eup %3647 }
 0x5c7   :  { %3651 = vrcp.f32 %v1926_v32  ;;  %v3650_v33 = vpop.eup %3649  ;;  %v1939_v10 = vadd.f32 1.0, %v3648_v15 }
 0x5c8   :  { %3653 = vrcp.f32 %v1932_v57 }
 0x5c9   :  { %3655 = vrcp.f32 %v1939_v10 }
 0x5d1   :  { %v3652_v27 = vpop.eup %3651 }
 0x5d2   :  { %v3654_v17 = vpop.eup %3653  ;;  %v1943_v35 = vmul.f32 %v3652_v27, %v3650_v33 }
 0x5d3   :  { %v1942_v56 = vmul.f32 %v3654_v17, %v6525_v62 }
 0x5d5   :  { %v1982_v36 = vpop.f32.mrb[48].mxu0  ;;  %v2023_v26 = vpop.f32.mrb[48].mxu1  ;;  %v5183_v9 = vadd.f32 %v1943_v35, %v1942_v56 }
 0x5d6   :  { %v1984_v21 = vpop.f32.mrb[49].mxu0  ;;  %v2025_v16 = vpop.f32.mrb[49].mxu1 }
 0x5d7   :  { %6526 = vst [vmem:[#allocation30_spill] sm:$0xff] %v5183_v9  ;;  %v1986_v12 = vpop.f32.mrb[50].mxu0  ;;  %v2027_v28 = vpop.f32.mrb[50].mxu1  ;;  %3657 = vtanh.f32 %v5183_v9 }
 0x5d8   :  { %v1987_v38 = vpop.f32.mrb[51].mxu0  ;;  %v2028_v57 = vpop.f32.mrb[51].mxu1 }
 0x5d9   :  { %v3656_v56 = vpop.eup %3655 }
 0x5dd   :  { %v2071_v32 = vpop.f32.mrb[52].mxu0  ;;  %v2112_v13 = vpop.f32.mrb[52].mxu1 }
 0x5de   :  { %v2072_v20 = vadd.f32 %v2071_v32, %v1982_v36  ;;  %v2113_v33 = vadd.f32 %v2112_v13, %v2023_v26  ;;  %v2073_v15 = vpop.f32.mrb[53].mxu0  ;;  %v2114_v27 = vpop.f32.mrb[53].mxu1 }
 0x5df   :  { %v2074_v17 = vadd.f32 %v2073_v15, %v1984_v21  ;;  %v2115_v62 = vadd.f32 %v2114_v27, %v2025_v16  ;;  %v2075_v29 = vpop.f32.mrb[54].mxu0  ;;  %v2116_v35 = vpop.f32.mrb[54].mxu1 }
 0x5e0   :  { %v2119_v10 = vadd.f32 %v2072_v20, %v4447_v2  ;;  %v2076_v23 = vpop.f32.mrb[55].mxu0  ;;  %v2117_v12 = vpop.f32.mrb[55].mxu1  ;;  %v2121_v26 = vadd.f32 %v2113_v33, %v4464_v31 }
 0x5e1   :  { %v3658_v28 = vpop.eup %3657  ;;  %v2120_v9 = vadd.f32 %v2074_v17, %v4451_v39  ;;  %v2122_v13 = vadd.f32 %v2115_v62, %v4458_v6 }
 0x5e2   :  { %v3342_v38 = vmul.f32 -1.442695, %v2119_v10  ;;  %v1946_v57 = vmul.f32 %v3658_v28, %v3656_v56  ;;  %v5198_v28 = vld [vmem:[#allocation3] ss:$16 sps:$4 sm:$0xff]  }
 0x5e3   :  { %v3343_v54 = vmul.f32 -1.442695, %v2120_v9  ;;  %v3344_v29 = vmul.f32 -1.442695, %v2122_v13  ;;  %v5215_v13 = vld [vmem:[#allocation3 + $0x28] ss:$16 sps:$4 sm:$0xff]  }
 0x5e4   :  { %3659 = vpow2.f32 %v3342_v38  ;;  %v1947_v36 = vpack.c.bf16 %v1946_v57, %v1946_v57  ;;  %v5201_v38 = vld [vmem:[#allocation3 + $0x8] ss:$16 sps:$4 sm:$0xff]   ;;  %v5207_v57 = vld [vmem:[#allocation3 + $0x2c] ss:$16 sps:$4 sm:$0xff]  }
 0x5e5   :  { %3661 = vpow2.f32 %v3343_v54 }
 0x5e6   :  { %2180 = vmatprep.mubr.bf16.mxu0 %v1947_v36  ;;  %2221 = vmatprep.mubr.bf16.mxu1 %v1947_v36  ;;  %3663 = vpow2.f32 %v3344_v29  ;;  %v5212_v36 = vld [vmem:[#allocation3 + $0x20] ss:$16 sps:$4 sm:$0xff]   ;;  %v5218_v29 = vld [vmem:[#allocation3 + $0x44] ss:$16 sps:$4 sm:$0xff]  }
 0x5e7   :  { %3665 = vtanh.f32 %v2121_v26  ;;  %v5221_v26 = vld [vmem:[#allocation3 + $0x4c] ss:$16 sps:$4 sm:$0xff]  }
 0x5ee   :  { %v3660_v21 = vpop.eup %3659 }
 0x5ef   :  { %v3662_v20 = vpop.eup %3661  ;;  %v2126_v23 = vadd.f32 1.0, %v3660_v21  ;;  %v5224_v21 = vld [vmem:[#allocation3 + $0x40] ss:$16 sps:$4 sm:$0xff]  }
 0x5f0   :  { %v2132_v16 = vadd.f32 1.0, %v3662_v20  ;;  %v3664_v32 = vpop.eup %3663  ;;  %v5227_v20 = vld [vmem:[#allocation3 + $0x48] ss:$16 sps:$4 sm:$0xff]  }
 0x5f1   :  { %3667 = vrcp.f32 %v2126_v23  ;;  %v3666_v9 = vpop.eup %3665  ;;  %v2139_v17 = vadd.f32 1.0, %v3664_v32  ;;  %v5230_v23 = vld [vmem:[#allocation3 + $0x64] ss:$16 sps:$4 sm:$0xff]   ;;  %v5236_v32 = vld [vmem:[#allocation3 + $0x60] ss:$16 sps:$4 sm:$0xff]  }
 0x5f2   :  { %3669 = vrcp.f32 %v2132_v16  ;;  %v5233_v16 = vld [vmem:[#allocation3 + $0x6c] ss:$16 sps:$4 sm:$0xff]  }
 0x5f3   :  { %3671 = vrcp.f32 %v2139_v17  ;;  %v5251_v17 = vld [vmem:[#allocation3 + $0x88] ss:$16 sps:$4 sm:$0xff]  }
 0x5f4   :  { %6528 = vst [vmem:[#allocation34_spill] sm:$0xff] %v5251_v17 }
 0x5fb   :  { %v3668_v15 = vpop.eup %3667 }
 0x5fc   :  { %v3670_v27 = vpop.eup %3669  ;;  %v2143_v54 = vmul.f32 %v3668_v15, %v3666_v9  ;;  %v5239_v9 = vld [vmem:[#allocation3 + $0x68] ss:$16 sps:$4 sm:$0xff]   ;;  %v5242_v15 = vld [vmem:[#allocation3 + $0x84] ss:$16 sps:$4 sm:$0xff]  }
 0x5fd   :  { %v2142_v35 = vmul.f32 %v3670_v27, %v5064_v24  ;;  %v3672_v33 = vpop.eup %3671  ;;  %v5204_v24 = vld [vmem:[#allocation3 + $0x24] ss:$16 sps:$4 sm:$0xff]   ;;  %v5245_v27 = vld [vmem:[#allocation3 + $0x8c] ss:$16 sps:$4 sm:$0xff]  }
 0x5ff   :  { %v5191_v62 = vadd.f32 %v2143_v54, %v2142_v35  ;;  %v5248_v54 = vld [vmem:[#allocation3 + $0x80] ss:$16 sps:$4 sm:$0xff]   ;;  %v5254_v35 = vld [vmem:[#allocation3 + $0xa4] ss:$16 sps:$4 sm:$0xff]  }
 0x600   :  { %6527 = vst [vmem:[#allocation33_spill] sm:$0xff] %v5248_v54  ;;  %6529 = vst [vmem:[#allocation35_spill] sm:$0xff] %v5254_v35 }
 0x601   :  { %3673 = vtanh.f32 %v5191_v62 }
 0x60b   :  { %v3674_v56 = vpop.eup %3673 }
 0x60c   :  { %v2146_v10 = vmul.f32 %v3674_v56, %v3672_v33  ;;  %v5257_v33 = vld [vmem:[#allocation3 + $0xac] ss:$16 sps:$4 sm:$0xff]   ;;  %v5260_v56 = vld [vmem:[#allocation3 + $0xa0] ss:$16 sps:$4 sm:$0xff]  }
 0x60d   :  { %6530 = vst [vmem:[#allocation36_spill] sm:$0xff] %v5257_v33  ;;  %6531 = vst [vmem:[#allocation37_spill] sm:$0xff] %v5260_v56 }
 0x60e   :  { %v5194_v12 = vpack.c.bf16 %v2146_v10, %v2146_v10  ;;  %v5263_v10 = vld [vmem:[#allocation3 + $0xa8] ss:$16 sps:$4 sm:$0xff]  }
 0x60f   :  { %6532 = vst [vmem:[#allocation38_spill] sm:$0xff] %v5263_v10 }
 0x610   :  { %2181 = vmatmul.mubr.bf16.vlgmr.msra.gmra.mrb[56].mxu0 %v5194_v12  ;;  %2222 = vmatmul.mubr.bf16.vlgmr.msra.gmra.mrb[56].mxu1 %v5194_v12 }
 0x611   :  { %2256 = vmatpush1.bf16.msra.mxu0 %v5198_v28  ;;  %2297 = vmatpush1.bf16.msra.mxu1 %v5201_v38 }
 0x612   :  { %2257 = vmatprep.subr.bf16.mxu0 %v5204_v24  ;;  %2298 = vmatprep.subr.bf16.mxu1 %v5207_v57 }
 0x613   :  { %2287 = vmatprep.mubr.bf16.mxu0 %v6251_v19  ;;  %2328 = vmatprep.mubr.bf16.mxu1 %v6251_v19 }
 0x615   :  { %2258 = vmatpush1.bf16.msra.mxu0 %v5212_v36  ;;  %2299 = vmatpush1.bf16.msra.mxu1 %v5215_v13 }
 0x616   :  { %2259 = vmatprep.subr.bf16.mxu0 %v5218_v29  ;;  %2300 = vmatprep.subr.bf16.mxu1 %v5221_v26 }
 0x619   :  { %2260 = vmatpush1.bf16.msra.mxu0 %v5224_v21  ;;  %2301 = vmatpush1.bf16.msra.mxu1 %v5227_v20 }
 0x61a   :  { %2261 = vmatprep.subr.bf16.mxu0 %v5230_v23  ;;  %2302 = vmatprep.subr.bf16.mxu1 %v5233_v16 }
 0x61d   :  { %2262 = vmatpush1.bf16.msra.mxu0 %v5236_v32  ;;  %2303 = vmatpush1.bf16.msra.mxu1 %v5239_v9 }
 0x61e   :  { %2263 = vmatprep.subr.bf16.mxu0 %v5242_v15  ;;  %2304 = vmatprep.subr.bf16.mxu1 %v5245_v27 }
 0x621   :  { %2264 = vmatpush1.bf16.msra.mxu0 %v5248_v54  ;;  %2305 = vmatpush1.bf16.msra.mxu1 %v5251_v17  ;;  %v5266_v54 = vld [vmem:[#allocation3 + $0xc4] ss:$16 sps:$4 sm:$0xff]   ;;  %v5269_v17 = vld [vmem:[#allocation3 + $0xcc] ss:$16 sps:$4 sm:$0xff]  }
 0x622   :  { %2265 = vmatprep.subr.bf16.mxu0 %v5254_v35  ;;  %2306 = vmatprep.subr.bf16.mxu1 %v5257_v33  ;;  %6533 = vst [vmem:[#allocation39_spill] sm:$0xff] %v5266_v54  ;;  %6534 = vst [vmem:[#allocation40_spill] sm:$0xff] %v5269_v17  ;;  %v5272_v35 = vld [vmem:[#allocation3 + $0xc0] ss:$16 sps:$4 sm:$0xff]   ;;  %v5275_v33 = vld [vmem:[#allocation3 + $0xc8] ss:$16 sps:$4 sm:$0xff]  }
 0x623   :  { %6535 = vst [vmem:[#allocation9_spill] sm:$0xff] %v5272_v35  ;;  %6536 = vst [vmem:[#allocation10_spill] sm:$0xff] %v5275_v33 }
 0x625   :  { %2266 = vmatpush1.bf16.msra.mxu0 %v5260_v56  ;;  %2307 = vmatpush1.bf16.msra.mxu1 %v5263_v10  ;;  %v5278_v56 = vld [vmem:[#allocation3 + $0xe4] ss:$16 sps:$4 sm:$0xff]   ;;  %v5281_v10 = vld [vmem:[#allocation3 + $0xec] ss:$16 sps:$4 sm:$0xff]  }
 0x626   :  { %2267 = vmatprep.subr.bf16.mxu0 %v5266_v54  ;;  %2308 = vmatprep.subr.bf16.mxu1 %v5269_v17  ;;  %v5284_v54 = vld [vmem:[#allocation3 + $0xe0] ss:$16 sps:$4 sm:$0xff]   ;;  %v5287_v17 = vld [vmem:[#allocation3 + $0xe8] ss:$16 sps:$4 sm:$0xff]  }
 0x627   :  { %6537 = vst [vmem:[#allocation41_spill] sm:$0xff] %v5287_v17 }
 0x629   :  { %2268 = vmatpush1.bf16.msra.mxu0 %v5272_v35  ;;  %2309 = vmatpush1.bf16.msra.mxu1 %v5275_v33  ;;  %v2337_v35 = vrot.slane %v4220_v51, 5  ;;  %v2338_v33 = vrot.slane %v6388_v11, 4  ;;  %v5303_v11 = vld [vmem:[#allocation5 + $0x4] ss:$16 sps:$4 sm:$0xff]  }
 0x62a   :  { %2269 = vmatprep.subr.bf16.mxu0 %v5278_v56  ;;  %2310 = vmatprep.subr.bf16.mxu1 %v5281_v10  ;;  %6538 = vst [vmem:[#allocation42_spill] sm:$0xff] %v5303_v11 }
 0x62d   :  { %2270 = vmatpush1.bf16.msra.mxu0 %v5284_v54  ;;  %2311 = vmatpush1.bf16.msra.mxu1 %v5287_v17  ;;  %v2339_v17 = vsel %vm388_vm1, %v2338_v33, %v2337_v35  ;;  %v6571_v35 = vld [vmem:[#allocation80_spill] sm:$0xff]  ;;  %v6572_v33 = vld [vmem:[#allocation81_spill] sm:$0xff] }
 0x62e   :  { %3348 = vmatprep.subr.msk.bf16.mxu0 %vm413_vm0, %v4211_v47  ;;  %3350 = vmatprep.subr.msk.bf16.mxu1 %vm413_vm0, %v6389_v14  ;;  %v2340_v14 = vpack.c.b16 %v2339_v17, %v2339_v17  ;;  %v6570_v17 = vld [vmem:[#allocation79_spill] sm:$0xff] }
 0x630   :  { %2288 = vmatmul.mubr.bf16.vlgmr.msra.gmra.mrb[60].mxu0 %v5194_v12  ;;  %2329 = vmatmul.mubr.bf16.vlgmr.msra.gmra.mrb[60].mxu1 %v5194_v12  ;;  %v6569_v12 = vld [vmem:[#allocation78_spill] sm:$0xff] }
 0x631   :  { %2345 = vmatpush1.bf16.msra.mxu0 %v4226_v53  ;;  %2386 = vmatpush1.bf16.msra.mxu1 %v6454_v1 }
 0x632   :  { %2376 = vmatprep.mubr.bf16.mxu0 %v6251_v19  ;;  %2417 = vmatprep.mubr.bf16.mxu1 %v6251_v19 }
 0x633   :  { %2455 = vmatprep.subr.bf16.mxu0 %v5303_v11  ;;  %2496 = vmatprep.subr.bf16.mxu1 %v6456_v37  ;;  %v6540_v37 = vld [vmem:[#allocation61_spill] sm:$0xff] }
 0x638   :  { %3349 = vmatmul.mubr.msk.bf16.vlgmr.msra.gmra.mrb[64].mxu0 %vm409_vm2, %v2340_v14  ;;  %3351 = vmatmul.mubr.msk.bf16.vlgmr.msra.gmra.mrb[64].mxu1 %vm409_vm2, %v2340_v14  ;;  %v6539_v14 = vld [vmem:[#allocation60_spill] sm:$0xff] }
 0x639   :  { %2456 = vmatpush1.bf16.msra.mxu0 %v6457_v40  ;;  %2497 = vmatpush1.bf16.msra.mxu1 %v6458_v61  ;;  %v6541_v40 = vld [vmem:[#allocation62_spill] sm:$0xff]  ;;  %v6542_v61 = vld [vmem:[#allocation63_spill] sm:$0xff] }
 0x63a   :  { %2457 = vmatprep.subr.bf16.mxu0 %v6459_v52  ;;  %2498 = vmatprep.subr.bf16.mxu1 %v6460_v60  ;;  %v6543_v52 = vld [vmem:[#allocation64_spill] sm:$0xff]  ;;  %v6544_v60 = vld [vmem:[#allocation65_spill] sm:$0xff] }
 0x63d   :  { %2458 = vmatpush1.bf16.msra.mxu0 %v6461_v50  ;;  %2499 = vmatpush1.bf16.msra.mxu1 %v6462_v45  ;;  %v6545_v50 = vld [vmem:[#allocation66_spill] sm:$0xff]  ;;  %v6546_v45 = vld [vmem:[#allocation67_spill] sm:$0xff] }
 0x63e   :  { %2459 = vmatprep.subr.bf16.mxu0 %v6463_v3  ;;  %2500 = vmatprep.subr.bf16.mxu1 %v6464_v59  ;;  %v6547_v3 = vld [vmem:[#allocation68_spill] sm:$0xff]  ;;  %v6548_v59 = vld [vmem:[#allocation69_spill] sm:$0xff] }
 0x641   :  { %2460 = vmatpush1.bf16.msra.mxu0 %v6465_v41  ;;  %2501 = vmatpush1.bf16.msra.mxu1 %v6466_v18  ;;  %v6549_v41 = vld [vmem:[#allocation70_spill] sm:$0xff]  ;;  %v6550_v18 = vld [vmem:[#allocation71_spill] sm:$0xff] }
 0x642   :  { %2461 = vmatprep.subr.bf16.mxu0 %v6467_v25  ;;  %2502 = vmatprep.subr.bf16.mxu1 %v6468_v4  ;;  %v6551_v25 = vld [vmem:[#allocation72_spill] sm:$0xff]  ;;  %v6552_v4 = vld [vmem:[#allocation73_spill] sm:$0xff] }
 0x645   :  { %2462 = vmatpush1.bf16.msra.mxu0 %v6469_v30  ;;  %2503 = vmatpush1.bf16.msra.mxu1 %v6470_v34  ;;  %v6553_v30 = vld [vmem:[#allocation74_spill] sm:$0xff] }
 0x646   :  { %2463 = vmatprep.subr.bf16.mxu0 %v6471_v42  ;;  %2504 = vmatprep.subr.bf16.mxu1 %v6472_v43  ;;  %v6554_v34 = vld [vmem:[#allocation18_spill] sm:$0xff]  ;;  %v6555_v42 = vld [vmem:[#allocation19_spill] sm:$0xff]  ;;  %v6556_v43 = vld [vmem:[#allocation20_spill] sm:$0xff] }
 0x649   :  { %2464 = vmatpush1.bf16.msra.mxu0 %v6473_v44  ;;  %2505 = vmatpush1.bf16.msra.mxu1 %v6474_v48  ;;  %v6557_v44 = vld [vmem:[#allocation21_spill] sm:$0xff]  ;;  %v6558_v48 = vld [vmem:[#allocation22_spill] sm:$0xff] }
 0x64a   :  { %2465 = vmatprep.subr.bf16.mxu0 %v6475_v49  ;;  %2506 = vmatprep.subr.bf16.mxu1 %v6476_v63  ;;  %v6559_v49 = vld [vmem:[#allocation23_spill] sm:$0xff]  ;;  %v6560_v63 = vld [vmem:[#allocation24_spill] sm:$0xff] }
 0x64d   :  { %2466 = vmatpush1.bf16.msra.mxu0 %v6477_v0  ;;  %2507 = vmatpush1.bf16.msra.mxu1 %v6478_v5  ;;  %v6561_v0 = vld [vmem:[#allocation25_spill] sm:$0xff]  ;;  %v6562_v5 = vld [vmem:[#allocation26_spill] sm:$0xff] }
 0x64e   :  { %2467 = vmatprep.subr.bf16.mxu0 %v6479_v58  ;;  %2508 = vmatprep.subr.bf16.mxu1 %v6480_v7  ;;  %v6563_v58 = vld [vmem:[#allocation27_spill] sm:$0xff]  ;;  %v6564_v7 = vld [vmem:[#allocation28_spill] sm:$0xff] }
 0x651   :  { %2468 = vmatpush1.bf16.msra.mxu0 %v6481_v55  ;;  %2509 = vmatpush1.bf16.msra.mxu1 %v6482_v46  ;;  %v6565_v55 = vld [vmem:[#allocation29_spill] sm:$0xff]  ;;  %v6566_v46 = vld [vmem:[#allocation75_spill] sm:$0xff] }
 0x652   :  { %2469 = vmatprep.subr.bf16.mxu0 %v6483_v8  ;;  %2510 = vmatprep.subr.bf16.mxu1 %v6484_v22  ;;  %v6567_v8 = vld [vmem:[#allocation76_spill] sm:$0xff]  ;;  %v6568_v22 = vld [vmem:[#allocation77_spill] sm:$0xff] }
 0x655   :  { %2470 = vmatpush1.bf16.msra.mxu0 %v6539_v14  ;;  %2511 = vmatpush1.bf16.msra.mxu1 %v6540_v37  ;;  %v5371_v14 = vld [vmem:[#allocation3 + $0x4] ss:$16 sps:$4 sm:$0xff]   ;;  %v5374_v37 = vld [vmem:[#allocation3 + $0xc] ss:$16 sps:$4 sm:$0xff]  }
 0x656   :  { %2471 = vmatprep.subr.bf16.mxu0 %v6541_v40  ;;  %2512 = vmatprep.subr.bf16.mxu1 %v6542_v61 }
 0x659   :  { %2472 = vmatpush1.bf16.msra.mxu0 %v6543_v52  ;;  %2513 = vmatpush1.bf16.msra.mxu1 %v6544_v60  ;;  %v6573_v52 = vld [vmem:[#allocation15_spill] sm:$0xff] }
 0x65a   :  { %2473 = vmatprep.subr.bf16.mxu0 %v6545_v50  ;;  %2514 = vmatprep.subr.bf16.mxu1 %v6546_v45 }
 0x65d   :  { %2474 = vmatpush1.bf16.msra.mxu0 %v6547_v3  ;;  %2515 = vmatpush1.bf16.msra.mxu1 %v6548_v59  ;;  %v6574_v3 = vld [vmem:[#allocation14_spill] sm:$0xff] }
 0x65e   :  { %2475 = vmatprep.subr.bf16.mxu0 %v6549_v41  ;;  %2516 = vmatprep.subr.bf16.mxu1 %v6550_v18 }
 0x661   :  { %2476 = vmatpush1.bf16.msra.mxu0 %v6551_v25  ;;  %2517 = vmatpush1.bf16.msra.mxu1 %v6552_v4 }
 0x662   :  { %2477 = vmatprep.subr.bf16.mxu0 %v6553_v30  ;;  %2518 = vmatprep.subr.bf16.mxu1 %v6554_v34 }
 0x665   :  { %2478 = vmatpush1.bf16.msra.mxu0 %v6555_v42  ;;  %2519 = vmatpush1.bf16.msra.mxu1 %v6556_v43  ;;  %v6575_v42 = vld [vmem:[#allocation16_spill] sm:$0xff] }
 0x666   :  { %2479 = vmatprep.subr.bf16.mxu0 %v6557_v44  ;;  %2520 = vmatprep.subr.bf16.mxu1 %v6558_v48  ;;  %v6576_v48 = vld [vmem:[#allocation17_spill] sm:$0xff] }
 0x669   :  { %2480 = vmatpush1.bf16.msra.mxu0 %v6559_v49  ;;  %2521 = vmatpush1.bf16.msra.mxu1 %v6560_v63 }
 0x66a   :  { %2481 = vmatprep.subr.bf16.mxu0 %v6561_v0  ;;  %2522 = vmatprep.subr.bf16.mxu1 %v6562_v5 }
 0x66d   :  { %2482 = vmatpush1.bf16.msra.mxu0 %v6563_v58  ;;  %2523 = vmatpush1.bf16.msra.mxu1 %v6564_v7 }
 0x66e   :  { %2483 = vmatprep.subr.bf16.mxu0 %v6565_v55  ;;  %2524 = vmatprep.subr.bf16.mxu1 %v6566_v46 }
 0x671   :  { %2484 = vmatpush1.bf16.msra.mxu0 %v6567_v8  ;;  %2525 = vmatpush1.bf16.msra.mxu1 %v6568_v22 }
 0x672   :  { %2485 = vmatprep.subr.bf16.mxu0 %v6569_v12  ;;  %2526 = vmatprep.subr.bf16.mxu1 %v6570_v17  ;;  %v6577_v17 = vld [vmem:[#allocation30_spill] sm:$0xff] }
 0x675   :  { %2486 = vmatpush1.bf16.msra.mxu0 %v6571_v35  ;;  %2527 = vmatpush1.bf16.msra.mxu1 %v6572_v33 }
 0x676   :  { %2562 = vmatprep.subr.bf16.mxu0 %v5371_v14  ;;  %2603 = vmatprep.subr.bf16.mxu1 %v5374_v37 }
 0x6e3   :  { %v2182_v40 = vpop.f32.mrb[56].mxu0  ;;  %v2223_v61 = vpop.f32.mrb[56].mxu1 }
 0x6e4   :  { %v2183_v60 = vadd.f32 %v2182_v40, %v6573_v52  ;;  %v2184_v50 = vpop.f32.mrb[57].mxu0  ;;  %v2225_v45 = vpop.f32.mrb[57].mxu1  ;;  %v2224_v49 = vadd.f32 %v2223_v61, %v6576_v48 }
 0x6e5   :  { %v2185_v59 = vadd.f32 %v2184_v50, %v6574_v3  ;;  %v2186_v41 = vpop.f32.mrb[58].mxu0  ;;  %v2227_v18 = vpop.f32.mrb[58].mxu1  ;;  %v2226_v43 = vadd.f32 %v2225_v45, %v6575_v42 }
 0x6e6   :  { %v3345_v25 = vmul.f32 -1.442695, %v2183_v60  ;;  %v2187_v4 = vpop.f32.mrb[59].mxu0  ;;  %v2228_v30 = vpop.f32.mrb[59].mxu1 }
 0x6e7   :  { %v3346_v34 = vmul.f32 -1.442695, %v2185_v59  ;;  %v3347_v44 = vmul.f32 -1.442695, %v2226_v43 }
 0x6e8   :  { %3675 = vpow2.f32 %v3345_v25 }
 0x6e9   :  { %3677 = vpow2.f32 %v3346_v34 }
 0x6ea   :  { %3679 = vpow2.f32 %v3347_v44 }
 0x6eb   :  { %3681 = vtanh.f32 %v2224_v49 }
 0x6f2   :  { %v3676_v63 = vpop.eup %3675 }
 0x6f3   :  { %v3678_v0 = vpop.eup %3677  ;;  %v2233_v5 = vadd.f32 1.0, %v3676_v63 }
 0x6f4   :  { %v2239_v58 = vadd.f32 1.0, %v3678_v0  ;;  %v3680_v7 = vpop.eup %3679 }
 0x6f5   :  { %3683 = vrcp.f32 %v2233_v5  ;;  %v3682_v55 = vpop.eup %3681  ;;  %v2246_v12 = vadd.f32 1.0, %v3680_v7 }
 0x6f6   :  { %3685 = vrcp.f32 %v2239_v58 }
 0x6f7   :  { %3687 = vrcp.f32 %v2246_v12 }
 0x6ff   :  { %v3684_v46 = vpop.eup %3683 }
 0x700   :  { %v3686_v8 = vpop.eup %3685  ;;  %v2250_v22 = vmul.f32 %v3684_v46, %v3682_v55 }
 0x701   :  { %v2249_v35 = vmul.f32 %v3686_v8, %v6577_v17  ;;  %v3688_v58 = vpop.eup %3687 }
 0x703   :  { %v2289_v33 = vpop.f32.mrb[60].mxu0  ;;  %v2330_v40 = vpop.f32.mrb[60].mxu1  ;;  %v5382_v60 = vadd.f32 %v2250_v22, %v2249_v35 }
 0x704   :  { %v2291_v61 = vpop.f32.mrb[61].mxu0  ;;  %v2332_v50 = vpop.f32.mrb[61].mxu1 }
 0x705   :  { %v2293_v45 = vpop.f32.mrb[62].mxu0  ;;  %v2334_v59 = vpop.f32.mrb[62].mxu1  ;;  %3689 = vtanh.f32 %v5382_v60 }
 0x706   :  { %v2294_v41 = vpop.f32.mrb[63].mxu0  ;;  %v2335_v18 = vpop.f32.mrb[63].mxu1 }
 0x70b   :  { %v2378_v25 = vpop.f32.mrb[64].mxu0  ;;  %v2419_v4 = vpop.f32.mrb[64].mxu1 }
 0x70c   :  { %v2379_v30 = vadd.f32 %v2378_v25, %v2289_v33  ;;  %v2420_v34 = vadd.f32 %v2419_v4, %v2330_v40  ;;  %v2380_v43 = vpop.f32.mrb[65].mxu0  ;;  %v2421_v44 = vpop.f32.mrb[65].mxu1 }
 0x70d   :  { %v2381_v49 = vadd.f32 %v2380_v43, %v2291_v61  ;;  %v2422_v63 = vadd.f32 %v2421_v44, %v2332_v50  ;;  %v2382_v0 = vpop.f32.mrb[66].mxu0  ;;  %v2423_v5 = vpop.f32.mrb[66].mxu1 }
 0x70e   :  { %v2426_v7 = vadd.f32 %v2379_v30, %v4447_v2  ;;  %v2383_v55 = vpop.f32.mrb[67].mxu0  ;;  %v2424_v46 = vpop.f32.mrb[67].mxu1  ;;  %v2428_v50 = vadd.f32 %v2420_v34, %v4464_v31 }
 0x70f   :  { %v3690_v8 = vpop.eup %3689  ;;  %v2427_v22 = vadd.f32 %v2381_v49, %v4451_v39  ;;  %v2429_v40 = vadd.f32 %v2422_v63, %v4458_v6  ;;  %v6579_v55 = vld [vmem:[#allocation34_spill] sm:$0xff]  ;;  %v6580_v46 = vld [vmem:[#allocation35_spill] sm:$0xff] }
 0x710   :  { %v3352_v12 = vmul.f32 -1.442695, %v2426_v7  ;;  %v2253_v17 = vmul.f32 %v3690_v8, %v3688_v58  ;;  %v6581_v8 = vld [vmem:[#allocation36_spill] sm:$0xff] }
 0x711   :  { %v3353_v35 = vmul.f32 -1.442695, %v2427_v22  ;;  %v3354_v61 = vmul.f32 -1.442695, %v2429_v40  ;;  %v6582_v22 = vld [vmem:[#allocation37_spill] sm:$0xff]  ;;  %v6587_v40 = vld [vmem:[#allocation10_spill] sm:$0xff] }
 0x712   :  { %3691 = vpow2.f32 %v3352_v12  ;;  %v2254_v33 = vpack.c.bf16 %v2253_v17, %v2253_v17  ;;  %v6583_v12 = vld [vmem:[#allocation38_spill] sm:$0xff]  ;;  %v6584_v17 = vld [vmem:[#allocation39_spill] sm:$0xff] }
 0x713   :  { %3693 = vpow2.f32 %v3353_v35  ;;  %v6585_v35 = vld [vmem:[#allocation40_spill] sm:$0xff] }
 0x714   :  { %2487 = vmatprep.mubr.bf16.mxu0 %v2254_v33  ;;  %2528 = vmatprep.mubr.bf16.mxu1 %v2254_v33  ;;  %3695 = vpow2.f32 %v3354_v61  ;;  %v6586_v33 = vld [vmem:[#allocation9_spill] sm:$0xff] }
 0x715   :  { %3697 = vtanh.f32 %v2428_v50  ;;  %v6588_v61 = vld [vmem:[#allocation41_spill] sm:$0xff]  ;;  %v2644_v50 = vrot.slane %v4220_v51, 6 }
 0x71c   :  { %v3692_v45 = vpop.eup %3691 }
 0x71d   :  { %v3694_v59 = vpop.eup %3693  ;;  %v2433_v41 = vadd.f32 1.0, %v3692_v45  ;;  %v6589_v45 = vld [vmem:[#allocation11_spill] sm:$0xff] }
 0x71e   :  { %v2439_v18 = vadd.f32 1.0, %v3694_v59  ;;  %v3696_v25 = vpop.eup %3695  ;;  %v2645_v59 = vrot.slane %v6589_v45, 5 }
 0x71f   :  { %3699 = vrcp.f32 %v2433_v41  ;;  %v3698_v4 = vpop.eup %3697  ;;  %v2446_v49 = vadd.f32 1.0, %v3696_v25  ;;  %v6590_v41 = vld [vmem:[#allocation12_spill] sm:$0xff] }
 0x720   :  { %3701 = vrcp.f32 %v2439_v18  ;;  %v2646_v18 = vsel %vm388_vm1, %v2645_v59, %v2644_v50  ;;  %v5437_v25 = vld [vmem:[#allocation5 + $0xc] ss:$16 sps:$4 sm:$0xff]   ;;  %v5469_v50 = vld [vmem:[#allocation5 + $0x48] ss:$16 sps:$4 sm:$0xff]   ;;  %v5472_v59 = vld [vmem:[#allocation5 + $0x64] ss:$16 sps:$4 sm:$0xff]  }
 0x721   :  { %3703 = vrcp.f32 %v2446_v49  ;;  %6591 = vst [vmem:[#allocation43_spill] sm:$0xff] %v5437_v25  ;;  %v5451_v49 = vld [vmem:[#allocation5 + $0x2c] ss:$16 sps:$4 sm:$0xff]   ;;  %6601 = vst [vmem:[#allocation53_spill] sm:$0xff] %v5469_v50 }
 0x722   :  { %6595 = vst [vmem:[#allocation47_spill] sm:$0xff] %v5451_v49  ;;  %6602 = vst [vmem:[#allocation54_spill] sm:$0xff] %v5472_v59 }
 0x729   :  { %v3700_v30 = vpop.eup %3699 }
 0x72a   :  { %v3702_v43 = vpop.eup %3701  ;;  %v2450_v44 = vmul.f32 %v3700_v30, %v3698_v4  ;;  %v2647_v4 = vpack.c.b16 %v2646_v18, %v2646_v18  ;;  %v5442_v30 = vld [vmem:[#allocation5] ss:$16 sps:$4 sm:$0xff]   ;;  %v5475_v18 = vld [vmem:[#allocation5 + $0x6c] ss:$16 sps:$4 sm:$0xff]  }
 0x72b   :  { %v2449_v0 = vmul.f32 %v3702_v43, %v5191_v62  ;;  %v3704_v34 = vpop.eup %3703  ;;  %v6578_v62 = vld [vmem:[#allocation33_spill] sm:$0xff]  ;;  %6592 = vst [vmem:[#allocation44_spill] sm:$0xff] %v5442_v30  ;;  %v5445_v43 = vld [vmem:[#allocation5 + $0x8] ss:$16 sps:$4 sm:$0xff]   ;;  %6603 = vst [vmem:[#allocation55_spill] sm:$0xff] %v5475_v18 }
 0x72c   :  { %6593 = vst [vmem:[#allocation45_spill] sm:$0xff] %v5445_v43 }
 0x72d   :  { %v5390_v63 = vadd.f32 %v2450_v44, %v2449_v0  ;;  %v5448_v44 = vld [vmem:[#allocation5 + $0x24] ss:$16 sps:$4 sm:$0xff]   ;;  %v5454_v0 = vld [vmem:[#allocation5 + $0x20] ss:$16 sps:$4 sm:$0xff]  }
 0x72e   :  { %6594 = vst [vmem:[#allocation46_spill] sm:$0xff] %v5448_v44  ;;  %6596 = vst [vmem:[#allocation48_spill] sm:$0xff] %v5454_v0 }
 0x72f   :  { %3705 = vtanh.f32 %v5390_v63 }
 0x739   :  { %v3706_v5 = vpop.eup %3705 }
 0x73a   :  { %v2453_v58 = vmul.f32 %v3706_v5, %v3704_v34  ;;  %v5457_v34 = vld [vmem:[#allocation5 + $0x28] ss:$16 sps:$4 sm:$0xff]   ;;  %v5460_v5 = vld [vmem:[#allocation5 + $0x44] ss:$16 sps:$4 sm:$0xff]  }
 0x73b   :  { %6597 = vst [vmem:[#allocation49_spill] sm:$0xff] %v5457_v34  ;;  %6598 = vst [vmem:[#allocation50_spill] sm:$0xff] %v5460_v5 }
 0x73c   :  { %v2454_v7 = vpack.c.bf16 %v2453_v58, %v2453_v58  ;;  %v5463_v58 = vld [vmem:[#allocation5 + $0x4c] ss:$16 sps:$4 sm:$0xff]  }
 0x73d   :  { %6599 = vst [vmem:[#allocation51_spill] sm:$0xff] %v5463_v58 }
 0x73e   :  { %2488 = vmatmul.mubr.bf16.vlgmr.msra.gmra.mrb[68].mxu0 %v2454_v7  ;;  %2529 = vmatmul.mubr.bf16.vlgmr.msra.gmra.mrb[68].mxu1 %v2454_v7 }
 0x73f   :  { %2563 = vmatpush1.bf16.msra.mxu0 %v5198_v28  ;;  %2604 = vmatpush1.bf16.msra.mxu1 %v5201_v38 }
 0x740   :  { %2564 = vmatprep.subr.bf16.mxu0 %v5204_v24  ;;  %2605 = vmatprep.subr.bf16.mxu1 %v5207_v57 }
 0x741   :  { %2594 = vmatprep.mubr.bf16.mxu0 %v6251_v19  ;;  %2635 = vmatprep.mubr.bf16.mxu1 %v6251_v19 }
 0x743   :  { %2565 = vmatpush1.bf16.msra.mxu0 %v5212_v36  ;;  %2606 = vmatpush1.bf16.msra.mxu1 %v5215_v13 }
 0x744   :  { %2566 = vmatprep.subr.bf16.mxu0 %v5218_v29  ;;  %2607 = vmatprep.subr.bf16.mxu1 %v5221_v26 }
 0x747   :  { %2567 = vmatpush1.bf16.msra.mxu0 %v5224_v21  ;;  %2608 = vmatpush1.bf16.msra.mxu1 %v5227_v20 }
 0x748   :  { %2568 = vmatprep.subr.bf16.mxu0 %v5230_v23  ;;  %2609 = vmatprep.subr.bf16.mxu1 %v5233_v16 }
 0x74b   :  { %2569 = vmatpush1.bf16.msra.mxu0 %v5236_v32  ;;  %2610 = vmatpush1.bf16.msra.mxu1 %v5239_v9 }
 0x74c   :  { %2570 = vmatprep.subr.bf16.mxu0 %v5242_v15  ;;  %2611 = vmatprep.subr.bf16.mxu1 %v5245_v27 }
 0x74f   :  { %2571 = vmatpush1.bf16.msra.mxu0 %v6578_v62  ;;  %2612 = vmatpush1.bf16.msra.mxu1 %v6579_v55 }
 0x750   :  { %2572 = vmatprep.subr.bf16.mxu0 %v6580_v46  ;;  %2613 = vmatprep.subr.bf16.mxu1 %v6581_v8 }
 0x753   :  { %2573 = vmatpush1.bf16.msra.mxu0 %v6582_v22  ;;  %2614 = vmatpush1.bf16.msra.mxu1 %v6583_v12 }
 0x754   :  { %2574 = vmatprep.subr.bf16.mxu0 %v6584_v17  ;;  %2615 = vmatprep.subr.bf16.mxu1 %v6585_v35 }
 0x757   :  { %2575 = vmatpush1.bf16.msra.mxu0 %v6586_v33  ;;  %2616 = vmatpush1.bf16.msra.mxu1 %v6587_v40 }
 0x758   :  { %2576 = vmatprep.subr.bf16.mxu0 %v5278_v56  ;;  %2617 = vmatprep.subr.bf16.mxu1 %v5281_v10 }
 0x75b   :  { %2577 = vmatpush1.bf16.msra.mxu0 %v5284_v54  ;;  %2618 = vmatpush1.bf16.msra.mxu1 %v6588_v61 }
 0x75c   :  { %3358 = vmatprep.subr.msk.bf16.mxu0 %vm413_vm0, %v4211_v47  ;;  %3360 = vmatprep.subr.msk.bf16.mxu1 %vm413_vm0, %v6590_v41 }
 0x75e   :  { %2595 = vmatmul.mubr.bf16.vlgmr.msra.gmra.mrb[72].mxu0 %v2454_v7  ;;  %2636 = vmatmul.mubr.bf16.vlgmr.msra.gmra.mrb[72].mxu1 %v2454_v7  ;;  %v5466_v7 = vld [vmem:[#allocation5 + $0x40] ss:$16 sps:$4 sm:$0xff]  }
 0x75f   :  { %2652 = vmatpush1.bf16.msra.mxu0 %v4226_v53  ;;  %2693 = vmatpush1.bf16.msra.mxu1 %v6454_v1  ;;  %6600 = vst [vmem:[#allocation52_spill] sm:$0xff] %v5466_v7 }
 0x760   :  { %2683 = vmatprep.mubr.bf16.mxu0 %v6251_v19  ;;  %2724 = vmatprep.mubr.bf16.mxu1 %v6251_v19 }
 0x761   :  { %2762 = vmatprep.subr.bf16.mxu0 %v5303_v11  ;;  %2803 = vmatprep.subr.bf16.mxu1 %v5437_v25 }
 0x766   :  { %3359 = vmatmul.mubr.msk.bf16.vlgmr.msra.gmra.mrb[76].mxu0 %vm409_vm2, %v2647_v4  ;;  %3361 = vmatmul.mubr.msk.bf16.vlgmr.msra.gmra.mrb[76].mxu1 %vm409_vm2, %v2647_v4  ;;  %v5478_v4 = vld [vmem:[#allocation5 + $0x60] ss:$16 sps:$4 sm:$0xff]  }
 0x767   :  { %2763 = vmatpush1.bf16.msra.mxu0 %v5442_v30  ;;  %2804 = vmatpush1.bf16.msra.mxu1 %v5445_v43  ;;  %6604 = vst [vmem:[#allocation56_spill] sm:$0xff] %v5478_v4 }
 0x768   :  { %2764 = vmatprep.subr.bf16.mxu0 %v5448_v44  ;;  %2805 = vmatprep.subr.bf16.mxu1 %v5451_v49 }
 0x76b   :  { %2765 = vmatpush1.bf16.msra.mxu0 %v5454_v0  ;;  %2806 = vmatpush1.bf16.msra.mxu1 %v5457_v34 }
 0x76c   :  { %2766 = vmatprep.subr.bf16.mxu0 %v5460_v5  ;;  %2807 = vmatprep.subr.bf16.mxu1 %v5463_v58  ;;  %v5481_v58 = vld [vmem:[#allocation5 + $0x68] ss:$16 sps:$4 sm:$0xff]  }
 0x76d   :  { %6605 = vst [vmem:[#allocation57_spill] sm:$0xff] %v5481_v58 }
 0x76f   :  { %2767 = vmatpush1.bf16.msra.mxu0 %v5466_v7  ;;  %2808 = vmatpush1.bf16.msra.mxu1 %v5469_v50  ;;  %v5484_v7 = vld [vmem:[#allocation5 + $0x84] ss:$16 sps:$4 sm:$0xff]   ;;  %v5487_v50 = vld [vmem:[#allocation5 + $0x8c] ss:$16 sps:$4 sm:$0xff]  }
 0x770   :  { %2768 = vmatprep.subr.bf16.mxu0 %v5472_v59  ;;  %2809 = vmatprep.subr.bf16.mxu1 %v5475_v18  ;;  %6606 = vst [vmem:[#allocation58_spill] sm:$0xff] %v5484_v7  ;;  %6607 = vst [vmem:[#allocation59_spill] sm:$0xff] %v5487_v50  ;;  %v5490_v59 = vld [vmem:[#allocation5 + $0x80] ss:$16 sps:$4 sm:$0xff]   ;;  %v5493_v18 = vld [vmem:[#allocation5 + $0x88] ss:$16 sps:$4 sm:$0xff]  }
 0x771   :  { %6608 = vst [vmem:[#allocation31_spill] sm:$0xff] %v5490_v59  ;;  %6609 = vst [vmem:[#allocation32_spill] sm:$0xff] %v5493_v18 }
 0x773   :  { %2769 = vmatpush1.bf16.msra.mxu0 %v5478_v4  ;;  %2810 = vmatpush1.bf16.msra.mxu1 %v5481_v58  ;;  %v5496_v4 = vld [vmem:[#allocation5 + $0xa4] ss:$16 sps:$4 sm:$0xff]   ;;  %v5499_v58 = vld [vmem:[#allocation5 + $0xac] ss:$16 sps:$4 sm:$0xff]  }
 0x774   :  { %2770 = vmatprep.subr.bf16.mxu0 %v5484_v7  ;;  %2811 = vmatprep.subr.bf16.mxu1 %v5487_v50  ;;  %6610 = vst [vmem:[#allocation82_spill] sm:$0xff] %v5496_v4  ;;  %6611 = vst [vmem:[#allocation60_spill] sm:$0xff] %v5499_v58  ;;  %v5502_v7 = vld [vmem:[#allocation5 + $0xa0] ss:$16 sps:$4 sm:$0xff]   ;;  %v5505_v50 = vld [vmem:[#allocation5 + $0xa8] ss:$16 sps:$4 sm:$0xff]  }
 0x775   :  { %6612 = vst [vmem:[#allocation61_spill] sm:$0xff] %v5502_v7  ;;  %6613 = vst [vmem:[#allocation62_spill] sm:$0xff] %v5505_v50 }
 0x777   :  { %2771 = vmatpush1.bf16.msra.mxu0 %v5490_v59  ;;  %2812 = vmatpush1.bf16.msra.mxu1 %v5493_v18  ;;  %v5508_v59 = vld [vmem:[#allocation5 + $0xc4] ss:$16 sps:$4 sm:$0xff]   ;;  %v5511_v18 = vld [vmem:[#allocation5 + $0xcc] ss:$16 sps:$4 sm:$0xff]  }
 0x778   :  { %2772 = vmatprep.subr.bf16.mxu0 %v5496_v4  ;;  %2813 = vmatprep.subr.bf16.mxu1 %v5499_v58  ;;  %6614 = vst [vmem:[#allocation63_spill] sm:$0xff] %v5508_v59  ;;  %6615 = vst [vmem:[#allocation64_spill] sm:$0xff] %v5511_v18  ;;  %v5514_v4 = vld [vmem:[#allocation5 + $0xc0] ss:$16 sps:$4 sm:$0xff]   ;;  %v5517_v58 = vld [vmem:[#allocation5 + $0xc8] ss:$16 sps:$4 sm:$0xff]  }
 0x779   :  { %6616 = vst [vmem:[#allocation65_spill] sm:$0xff] %v5514_v4  ;;  %6617 = vst [vmem:[#allocation66_spill] sm:$0xff] %v5517_v58 }
 0x77b   :  { %2773 = vmatpush1.bf16.msra.mxu0 %v5502_v7  ;;  %2814 = vmatpush1.bf16.msra.mxu1 %v5505_v50  ;;  %v5520_v7 = vld [vmem:[#allocation5 + $0xe4] ss:$16 sps:$4 sm:$0xff]   ;;  %v5523_v50 = vld [vmem:[#allocation5 + $0xec] ss:$16 sps:$4 sm:$0xff]  }
 0x77c   :  { %2774 = vmatprep.subr.bf16.mxu0 %v5508_v59  ;;  %2815 = vmatprep.subr.bf16.mxu1 %v5511_v18  ;;  %6618 = vst [vmem:[#allocation67_spill] sm:$0xff] %v5520_v7  ;;  %6619 = vst [vmem:[#allocation68_spill] sm:$0xff] %v5523_v50  ;;  %v5526_v59 = vld [vmem:[#allocation5 + $0xe0] ss:$16 sps:$4 sm:$0xff]   ;;  %v5529_v18 = vld [vmem:[#allocation5 + $0xe8] ss:$16 sps:$4 sm:$0xff]  }
 0x77d   :  { %6620 = vst [vmem:[#allocation69_spill] sm:$0xff] %v5526_v59  ;;  %6621 = vst [vmem:[#allocation70_spill] sm:$0xff] %v5529_v18 }
 0x77f   :  { %2775 = vmatpush1.bf16.msra.mxu0 %v5514_v4  ;;  %2816 = vmatpush1.bf16.msra.mxu1 %v5517_v58  ;;  %v5532_v4 = vld [vmem:[#allocation5 + $0x104] ss:$16 sps:$4 sm:$0xff]   ;;  %v5535_v58 = vld [vmem:[#allocation5 + $0x10c] ss:$16 sps:$4 sm:$0xff]  }
 0x780   :  { %2776 = vmatprep.subr.bf16.mxu0 %v5520_v7  ;;  %2817 = vmatprep.subr.bf16.mxu1 %v5523_v50  ;;  %6622 = vst [vmem:[#allocation71_spill] sm:$0xff] %v5532_v4  ;;  %6623 = vst [vmem:[#allocation72_spill] sm:$0xff] %v5535_v58  ;;  %v5538_v7 = vld [vmem:[#allocation5 + $0x100] ss:$16 sps:$4 sm:$0xff]   ;;  %v5541_v50 = vld [vmem:[#allocation5 + $0x108] ss:$16 sps:$4 sm:$0xff]  }
 0x781   :  { %6624 = vst [vmem:[#allocation73_spill] sm:$0xff] %v5538_v7  ;;  %6625 = vst [vmem:[#allocation74_spill] sm:$0xff] %v5541_v50 }
 0x783   :  { %2777 = vmatpush1.bf16.msra.mxu0 %v5526_v59  ;;  %2818 = vmatpush1.bf16.msra.mxu1 %v5529_v18  ;;  %v5544_v59 = vld [vmem:[#allocation5 + $0x124] ss:$16 sps:$4 sm:$0xff]   ;;  %v5547_v18 = vld [vmem:[#allocation5 + $0x12c] ss:$16 sps:$4 sm:$0xff]  }
 0x784   :  { %2778 = vmatprep.subr.bf16.mxu0 %v5532_v4  ;;  %2819 = vmatprep.subr.bf16.mxu1 %v5535_v58  ;;  %6626 = vst [vmem:[#allocation18_spill] sm:$0xff] %v5544_v59  ;;  %6627 = vst [vmem:[#allocation19_spill] sm:$0xff] %v5547_v18  ;;  %v5550_v4 = vld [vmem:[#allocation5 + $0x120] ss:$16 sps:$4 sm:$0xff]   ;;  %v5553_v58 = vld [vmem:[#allocation5 + $0x128] ss:$16 sps:$4 sm:$0xff]  }
 0x785   :  { %6628 = vst [vmem:[#allocation20_spill] sm:$0xff] %v5550_v4  ;;  %6629 = vst [vmem:[#allocation21_spill] sm:$0xff] %v5553_v58 }
 0x787   :  { %2779 = vmatpush1.bf16.msra.mxu0 %v5538_v7  ;;  %2820 = vmatpush1.bf16.msra.mxu1 %v5541_v50  ;;  %v5556_v7 = vld [vmem:[#allocation5 + $0x144] ss:$16 sps:$4 sm:$0xff]   ;;  %v5559_v50 = vld [vmem:[#allocation5 + $0x14c] ss:$16 sps:$4 sm:$0xff]  }
 0x788   :  { %2780 = vmatprep.subr.bf16.mxu0 %v5544_v59  ;;  %2821 = vmatprep.subr.bf16.mxu1 %v5547_v18  ;;  %6630 = vst [vmem:[#allocation22_spill] sm:$0xff] %v5556_v7  ;;  %6631 = vst [vmem:[#allocation23_spill] sm:$0xff] %v5559_v50  ;;  %v5562_v59 = vld [vmem:[#allocation5 + $0x140] ss:$16 sps:$4 sm:$0xff]   ;;  %v5565_v18 = vld [vmem:[#allocation5 + $0x148] ss:$16 sps:$4 sm:$0xff]  }
 0x789   :  { %6632 = vst [vmem:[#allocation24_spill] sm:$0xff] %v5562_v59  ;;  %6633 = vst [vmem:[#allocation25_spill] sm:$0xff] %v5565_v18 }
 0x78b   :  { %2781 = vmatpush1.bf16.msra.mxu0 %v5550_v4  ;;  %2822 = vmatpush1.bf16.msra.mxu1 %v5553_v58  ;;  %v5568_v4 = vld [vmem:[#allocation5 + $0x164] ss:$16 sps:$4 sm:$0xff]   ;;  %v5571_v58 = vld [vmem:[#allocation5 + $0x16c] ss:$16 sps:$4 sm:$0xff]  }
 0x78c   :  { %2782 = vmatprep.subr.bf16.mxu0 %v5556_v7  ;;  %2823 = vmatprep.subr.bf16.mxu1 %v5559_v50  ;;  %6634 = vst [vmem:[#allocation26_spill] sm:$0xff] %v5568_v4  ;;  %6635 = vst [vmem:[#allocation27_spill] sm:$0xff] %v5571_v58  ;;  %v5574_v7 = vld [vmem:[#allocation5 + $0x160] ss:$16 sps:$4 sm:$0xff]   ;;  %v5577_v50 = vld [vmem:[#allocation5 + $0x168] ss:$16 sps:$4 sm:$0xff]  }
 0x78d   :  { %6636 = vst [vmem:[#allocation28_spill] sm:$0xff] %v5574_v7  ;;  %6637 = vst [vmem:[#allocation29_spill] sm:$0xff] %v5577_v50 }
 0x78f   :  { %2783 = vmatpush1.bf16.msra.mxu0 %v5562_v59  ;;  %2824 = vmatpush1.bf16.msra.mxu1 %v5565_v18  ;;  %v5580_v59 = vld [vmem:[#allocation5 + $0x184] ss:$16 sps:$4 sm:$0xff]   ;;  %v5583_v18 = vld [vmem:[#allocation5 + $0x18c] ss:$16 sps:$4 sm:$0xff]  }
 0x790   :  { %2784 = vmatprep.subr.bf16.mxu0 %v5568_v4  ;;  %2825 = vmatprep.subr.bf16.mxu1 %v5571_v58  ;;  %6638 = vst [vmem:[#allocation75_spill] sm:$0xff] %v5580_v59  ;;  %6639 = vst [vmem:[#allocation76_spill] sm:$0xff] %v5583_v18  ;;  %v5586_v4 = vld [vmem:[#allocation5 + $0x180] ss:$16 sps:$4 sm:$0xff]   ;;  %v5589_v58 = vld [vmem:[#allocation5 + $0x188] ss:$16 sps:$4 sm:$0xff]  }
 0x791   :  { %6640 = vst [vmem:[#allocation77_spill] sm:$0xff] %v5586_v4  ;;  %6641 = vst [vmem:[#allocation78_spill] sm:$0xff] %v5589_v58 }
 0x793   :  { %2785 = vmatpush1.bf16.msra.mxu0 %v5574_v7  ;;  %2826 = vmatpush1.bf16.msra.mxu1 %v5577_v50  ;;  %v5592_v7 = vld [vmem:[#allocation5 + $0x1a4] ss:$16 sps:$4 sm:$0xff]   ;;  %v5595_v50 = vld [vmem:[#allocation5 + $0x1ac] ss:$16 sps:$4 sm:$0xff]  }
 0x794   :  { %2786 = vmatprep.subr.bf16.mxu0 %v5580_v59  ;;  %2827 = vmatprep.subr.bf16.mxu1 %v5583_v18  ;;  %6642 = vst [vmem:[#allocation79_spill] sm:$0xff] %v5592_v7  ;;  %6643 = vst [vmem:[#allocation80_spill] sm:$0xff] %v5595_v50  ;;  %v5598_v59 = vld [vmem:[#allocation5 + $0x1a0] ss:$16 sps:$4 sm:$0xff]   ;;  %v5601_v18 = vld [vmem:[#allocation5 + $0x1a8] ss:$16 sps:$4 sm:$0xff]  }
 0x795   :  { %6644 = vst [vmem:[#allocation81_spill] sm:$0xff] %v5598_v59  ;;  %6645 = vst [vmem:[#allocation30_spill] sm:$0xff] %v5601_v18 }
 0x797   :  { %2787 = vmatpush1.bf16.msra.mxu0 %v5586_v4  ;;  %2828 = vmatpush1.bf16.msra.mxu1 %v5589_v58  ;;  %v5604_v4 = vld [vmem:[#allocation5 + $0x1c4] ss:$16 sps:$4 sm:$0xff]   ;;  %v5607_v58 = vld [vmem:[#allocation5 + $0x1cc] ss:$16 sps:$4 sm:$0xff]  }
 0x798   :  { %2788 = vmatprep.subr.bf16.mxu0 %v5592_v7  ;;  %2829 = vmatprep.subr.bf16.mxu1 %v5595_v50  ;;  %6646 = vst [vmem:[#allocation33_spill] sm:$0xff] %v5604_v4  ;;  %6647 = vst [vmem:[#allocation34_spill] sm:$0xff] %v5607_v58  ;;  %v5610_v7 = vld [vmem:[#allocation5 + $0x1c0] ss:$16 sps:$4 sm:$0xff]   ;;  %v5613_v50 = vld [vmem:[#allocation5 + $0x1c8] ss:$16 sps:$4 sm:$0xff]  }
 0x799   :  { %6648 = vst [vmem:[#allocation35_spill] sm:$0xff] %v5610_v7  ;;  %6649 = vst [vmem:[#allocation36_spill] sm:$0xff] %v5613_v50 }
 0x79b   :  { %2789 = vmatpush1.bf16.msra.mxu0 %v5598_v59  ;;  %2830 = vmatpush1.bf16.msra.mxu1 %v5601_v18  ;;  %v5616_v59 = vld [vmem:[#allocation5 + $0x1e4] ss:$16 sps:$4 sm:$0xff]   ;;  %v5619_v18 = vld [vmem:[#allocation5 + $0x1ec] ss:$16 sps:$4 sm:$0xff]  }
 0x79c   :  { %2790 = vmatprep.subr.bf16.mxu0 %v5604_v4  ;;  %2831 = vmatprep.subr.bf16.mxu1 %v5607_v58  ;;  %6650 = vst [vmem:[#allocation37_spill] sm:$0xff] %v5616_v59  ;;  %6651 = vst [vmem:[#allocation38_spill] sm:$0xff] %v5619_v18  ;;  %v5622_v4 = vld [vmem:[#allocation5 + $0x1e0] ss:$16 sps:$4 sm:$0xff]   ;;  %v5625_v58 = vld [vmem:[#allocation5 + $0x1e8] ss:$16 sps:$4 sm:$0xff]  }
 0x79d   :  { %6652 = vst [vmem:[#allocation39_spill] sm:$0xff] %v5622_v4  ;;  %6653 = vst [vmem:[#allocation40_spill] sm:$0xff] %v5625_v58 }
 0x79f   :  { %2791 = vmatpush1.bf16.msra.mxu0 %v5610_v7  ;;  %2832 = vmatpush1.bf16.msra.mxu1 %v5613_v50 }
 0x7a0   :  { %2792 = vmatprep.subr.bf16.mxu0 %v5616_v59  ;;  %2833 = vmatprep.subr.bf16.mxu1 %v5619_v18 }
 0x7a3   :  { %2793 = vmatpush1.bf16.msra.mxu0 %v5622_v4  ;;  %2834 = vmatpush1.bf16.msra.mxu1 %v5625_v58 }
 0x7a4   :  { %2869 = vmatprep.subr.bf16.mxu0 %v5371_v14  ;;  %2910 = vmatprep.subr.bf16.mxu1 %v5374_v37 }
 0x811   :  { %v2489_v50 = vpop.f32.mrb[68].mxu0  ;;  %v2530_v7 = vpop.f32.mrb[68].mxu1 }
 0x812   :  { %v2490_v59 = vadd.f32 %v2489_v50, %v6573_v52  ;;  %v2491_v5 = vpop.f32.mrb[69].mxu0  ;;  %v2532_v34 = vpop.f32.mrb[69].mxu1  ;;  %v2531_v37 = vadd.f32 %v2530_v7, %v6576_v48 }
 0x813   :  { %v2492_v18 = vadd.f32 %v2491_v5, %v6574_v3  ;;  %v2493_v0 = vpop.f32.mrb[70].mxu0  ;;  %v2534_v49 = vpop.f32.mrb[70].mxu1  ;;  %v2533_v14 = vadd.f32 %v2532_v34, %v6575_v42 }
 0x814   :  { %v3355_v44 = vmul.f32 -1.442695, %v2490_v59  ;;  %v2494_v4 = vpop.f32.mrb[71].mxu0  ;;  %v2535_v43 = vpop.f32.mrb[71].mxu1 }
 0x815   :  { %v3356_v30 = vmul.f32 -1.442695, %v2492_v18  ;;  %v3357_v58 = vmul.f32 -1.442695, %v2533_v14 }
 0x816   :  { %3707 = vpow2.f32 %v3355_v44 }
 0x817   :  { %3709 = vpow2.f32 %v3356_v30 }
 0x818   :  { %3711 = vpow2.f32 %v3357_v58 }
 0x819   :  { %3713 = vtanh.f32 %v2531_v37 }
 0x820   :  { %v3708_v25 = vpop.eup %3707 }
 0x821   :  { %v3710_v11 = vpop.eup %3709  ;;  %v2540_v50 = vadd.f32 1.0, %v3708_v25 }
 0x822   :  { %v2546_v52 = vadd.f32 1.0, %v3710_v11  ;;  %v3712_v49 = vpop.eup %3711 }
 0x823   :  { %3715 = vrcp.f32 %v2540_v50  ;;  %v3714_v0 = vpop.eup %3713  ;;  %v2553_v44 = vadd.f32 1.0, %v3712_v49 }
 0x824   :  { %3717 = vrcp.f32 %v2546_v52 }
 0x825   :  { %3719 = vrcp.f32 %v2553_v44 }
 0x82d   :  { %v3716_v5 = vpop.eup %3715 }
 0x82e   :  { %v3718_v43 = vpop.eup %3717  ;;  %v2557_v59 = vmul.f32 %v3716_v5, %v3714_v0 }
 0x82f   :  { %v2556_v30 = vmul.f32 %v3718_v43, %v5382_v60 }
 0x831   :  { %v2596_v34 = vpop.f32.mrb[72].mxu0  ;;  %v2637_v18 = vpop.f32.mrb[72].mxu1  ;;  %v5635_v4 = vadd.f32 %v2557_v59, %v2556_v30 }
 0x832   :  { %v2598_v7 = vpop.f32.mrb[73].mxu0  ;;  %v2639_v25 = vpop.f32.mrb[73].mxu1 }
 0x833   :  { %6654 = vst [vmem:[#allocation9_spill] sm:$0xff] %v5635_v4  ;;  %v2600_v58 = vpop.f32.mrb[74].mxu0  ;;  %v2641_v14 = vpop.f32.mrb[74].mxu1  ;;  %3721 = vtanh.f32 %v5635_v4 }
 0x834   :  { %v2601_v11 = vpop.f32.mrb[75].mxu0  ;;  %v2642_v52 = vpop.f32.mrb[75].mxu1 }
 0x835   :  { %v3720_v30 = vpop.eup %3719 }
 0x839   :  { %v2685_v37 = vpop.f32.mrb[76].mxu0  ;;  %v2726_v50 = vpop.f32.mrb[76].mxu1 }
 0x83a   :  { %v2686_v48 = vadd.f32 %v2685_v37, %v2596_v34  ;;  %v2727_v0 = vadd.f32 %v2726_v50, %v2637_v18  ;;  %v2687_v49 = vpop.f32.mrb[77].mxu0  ;;  %v2728_v5 = vpop.f32.mrb[77].mxu1 }
 0x83b   :  { %v2688_v60 = vadd.f32 %v2687_v49, %v2598_v7  ;;  %v2729_v43 = vadd.f32 %v2728_v5, %v2639_v25  ;;  %v2689_v42 = vpop.f32.mrb[78].mxu0  ;;  %v2730_v59 = vpop.f32.mrb[78].mxu1 }
 0x83c   :  { %v2733_v44 = vadd.f32 %v2686_v48, %v4447_v2  ;;  %v2690_v3 = vpop.f32.mrb[79].mxu0  ;;  %v2731_v58 = vpop.f32.mrb[79].mxu1  ;;  %v2735_v7 = vadd.f32 %v2727_v0, %v4464_v31 }
 0x83d   :  { %v3722_v14 = vpop.eup %3721  ;;  %v2734_v4 = vadd.f32 %v2688_v60, %v4451_v39  ;;  %v2736_v18 = vadd.f32 %v2729_v43, %v4458_v6 }
 0x83e   :  { %v3362_v11 = vmul.f32 -1.442695, %v2733_v44  ;;  %v2560_v52 = vmul.f32 %v3722_v14, %v3720_v30  ;;  %v6688_v14 = vld [vmem:[#allocation71_spill] sm:$0xff] }
 0x83f   :  { %v3363_v1 = vmul.f32 -1.442695, %v2734_v4  ;;  %v3364_v42 = vmul.f32 -1.442695, %v2736_v18  ;;  %v6692_v18 = vld [vmem:[#allocation18_spill] sm:$0xff] }
 0x840   :  { %3723 = vpow2.f32 %v3362_v11  ;;  %v2561_v34 = vpack.c.bf16 %v2560_v52, %v2560_v52  ;;  %v6689_v11 = vld [vmem:[#allocation72_spill] sm:$0xff]  ;;  %v6690_v52 = vld [vmem:[#allocation73_spill] sm:$0xff] }
 0x841   :  { %3725 = vpow2.f32 %v3363_v1 }
 0x842   :  { %2794 = vmatprep.mubr.bf16.mxu0 %v2561_v34  ;;  %2835 = vmatprep.mubr.bf16.mxu1 %v2561_v34  ;;  %3727 = vpow2.f32 %v3364_v42  ;;  %v6691_v34 = vld [vmem:[#allocation74_spill] sm:$0xff]  ;;  %v6693_v42 = vld [vmem:[#allocation19_spill] sm:$0xff] }
 0x843   :  { %3729 = vtanh.f32 %v2735_v7  ;;  %v6694_v7 = vld [vmem:[#allocation20_spill] sm:$0xff] }
 0x84a   :  { %v3724_v25 = vpop.eup %3723 }
 0x84b   :  { %v3726_v48 = vpop.eup %3725  ;;  %v2740_v3 = vadd.f32 1.0, %v3724_v25  ;;  %v6695_v25 = vld [vmem:[#allocation21_spill] sm:$0xff] }
 0x84c   :  { %v2746_v37 = vadd.f32 1.0, %v3726_v48  ;;  %v3728_v50 = vpop.eup %3727  ;;  %v6696_v48 = vld [vmem:[#allocation22_spill] sm:$0xff] }
 0x84d   :  { %3731 = vrcp.f32 %v2740_v3  ;;  %v3730_v4 = vpop.eup %3729  ;;  %v2753_v60 = vadd.f32 1.0, %v3728_v50  ;;  %v6697_v3 = vld [vmem:[#allocation23_spill] sm:$0xff]  ;;  %v6699_v50 = vld [vmem:[#allocation25_spill] sm:$0xff] }
 0x84e   :  { %3733 = vrcp.f32 %v2746_v37  ;;  %v6698_v37 = vld [vmem:[#allocation24_spill] sm:$0xff] }
 0x84f   :  { %3735 = vrcp.f32 %v2753_v60  ;;  %v6704_v60 = vld [vmem:[#allocation75_spill] sm:$0xff] }
 0x857   :  { %v3732_v49 = vpop.eup %3731 }
 0x858   :  { %v3734_v5 = vpop.eup %3733  ;;  %v2757_v1 = vmul.f32 %v3732_v49, %v3730_v4  ;;  %v6700_v4 = vld [vmem:[#allocation26_spill] sm:$0xff]  ;;  %v6701_v49 = vld [vmem:[#allocation27_spill] sm:$0xff] }
 0x859   :  { %v2756_v59 = vmul.f32 %v3734_v5, %v5390_v63  ;;  %v3736_v0 = vpop.eup %3735  ;;  %v6674_v63 = vld [vmem:[#allocation31_spill] sm:$0xff]  ;;  %v6702_v5 = vld [vmem:[#allocation28_spill] sm:$0xff] }
 0x85b   :  { %v5643_v43 = vadd.f32 %v2757_v1, %v2756_v59  ;;  %v6703_v1 = vld [vmem:[#allocation29_spill] sm:$0xff]  ;;  %v6705_v59 = vld [vmem:[#allocation76_spill] sm:$0xff] }
 0x85d   :  { %3737 = vtanh.f32 %v5643_v43 }
 0x867   :  { %v3738_v30 = vpop.eup %3737 }
 0x868   :  { %v2760_v44 = vmul.f32 %v3738_v30, %v3736_v0  ;;  %v6706_v0 = vld [vmem:[#allocation77_spill] sm:$0xff]  ;;  %v6707_v30 = vld [vmem:[#allocation78_spill] sm:$0xff] }
 0x86a   :  { %v2761_v58 = vpack.c.bf16 %v2760_v44, %v2760_v44  ;;  %v6708_v44 = vld [vmem:[#allocation79_spill] sm:$0xff] }
 0x86c   :  { %2795 = vmatmul.mubr.bf16.vlgmr.msra.gmra.mrb[80].mxu0 %v2761_v58  ;;  %2836 = vmatmul.mubr.bf16.vlgmr.msra.gmra.mrb[80].mxu1 %v2761_v58 }
 0x86d   :  { %2870 = vmatpush1.bf16.msra.mxu0 %v5198_v28  ;;  %2911 = vmatpush1.bf16.msra.mxu1 %v5201_v38  ;;  %v2951_v28 = vrot.slane %v4220_v51, 7  ;;  %v2952_v38 = vrot.slane %v6589_v45, 6  ;;  %v6656_v51 = vld [vmem:[#allocation42_spill] sm:$0xff]  ;;  %v6686_v45 = vld [vmem:[#allocation69_spill] sm:$0xff] }
 0x86e   :  { %2871 = vmatprep.subr.bf16.mxu0 %v5204_v24  ;;  %2912 = vmatprep.subr.bf16.mxu1 %v5207_v57  ;;  %v6655_v24 = vld [vmem:[#allocation13_spill] sm:$0xff] }
 0x86f   :  { %2901 = vmatprep.mubr.bf16.mxu0 %v6251_v19  ;;  %2942 = vmatprep.mubr.bf16.mxu1 %v6251_v19  ;;  %v2953_v57 = vsel %vm388_vm1, %v2952_v38, %v2951_v28  ;;  %v6710_v28 = vld [vmem:[#allocation81_spill] sm:$0xff]  ;;  %v6711_v38 = vld [vmem:[#allocation30_spill] sm:$0xff] }
 0x871   :  { %2872 = vmatpush1.bf16.msra.mxu0 %v5212_v36  ;;  %2913 = vmatpush1.bf16.msra.mxu1 %v5215_v13  ;;  %v6657_v36 = vld [vmem:[#allocation43_spill] sm:$0xff]  ;;  %v6658_v13 = vld [vmem:[#allocation44_spill] sm:$0xff] }
 0x872   :  { %2873 = vmatprep.subr.bf16.mxu0 %v5218_v29  ;;  %2914 = vmatprep.subr.bf16.mxu1 %v5221_v26  ;;  %v6660_v29 = vld [vmem:[#allocation46_spill] sm:$0xff]  ;;  %v6661_v26 = vld [vmem:[#allocation47_spill] sm:$0xff] }
 0x875   :  { %2874 = vmatpush1.bf16.msra.mxu0 %v5224_v21  ;;  %2915 = vmatpush1.bf16.msra.mxu1 %v5227_v20  ;;  %v6662_v21 = vld [vmem:[#allocation48_spill] sm:$0xff]  ;;  %v6664_v20 = vld [vmem:[#allocation50_spill] sm:$0xff] }
 0x876   :  { %2875 = vmatprep.subr.bf16.mxu0 %v5230_v23  ;;  %2916 = vmatprep.subr.bf16.mxu1 %v5233_v16  ;;  %v6665_v23 = vld [vmem:[#allocation51_spill] sm:$0xff]  ;;  %v6666_v16 = vld [vmem:[#allocation52_spill] sm:$0xff] }
 0x879   :  { %2876 = vmatpush1.bf16.msra.mxu0 %v5236_v32  ;;  %2917 = vmatpush1.bf16.msra.mxu1 %v5239_v9  ;;  %v6667_v32 = vld [vmem:[#allocation53_spill] sm:$0xff]  ;;  %v6668_v9 = vld [vmem:[#allocation54_spill] sm:$0xff] }
 0x87a   :  { %2877 = vmatprep.subr.bf16.mxu0 %v5242_v15  ;;  %2918 = vmatprep.subr.bf16.mxu1 %v5245_v27  ;;  %v6669_v15 = vld [vmem:[#allocation55_spill] sm:$0xff]  ;;  %v6670_v27 = vld [vmem:[#allocation56_spill] sm:$0xff] }
 0x87d   :  { %2878 = vmatpush1.bf16.msra.mxu0 %v6578_v62  ;;  %2919 = vmatpush1.bf16.msra.mxu1 %v6579_v55  ;;  %v6675_v62 = vld [vmem:[#allocation32_spill] sm:$0xff]  ;;  %v6676_v55 = vld [vmem:[#allocation82_spill] sm:$0xff] }
 0x87e   :  { %2879 = vmatprep.subr.bf16.mxu0 %v6580_v46  ;;  %2920 = vmatprep.subr.bf16.mxu1 %v6581_v8  ;;  %v6677_v46 = vld [vmem:[#allocation60_spill] sm:$0xff]  ;;  %v6678_v8 = vld [vmem:[#allocation61_spill] sm:$0xff] }
 0x881   :  { %2880 = vmatpush1.bf16.msra.mxu0 %v6582_v22  ;;  %2921 = vmatpush1.bf16.msra.mxu1 %v6583_v12  ;;  %v6679_v22 = vld [vmem:[#allocation62_spill] sm:$0xff]  ;;  %v6680_v12 = vld [vmem:[#allocation63_spill] sm:$0xff] }
 0x882   :  { %2881 = vmatprep.subr.bf16.mxu0 %v6584_v17  ;;  %2922 = vmatprep.subr.bf16.mxu1 %v6585_v35  ;;  %v6681_v17 = vld [vmem:[#allocation64_spill] sm:$0xff]  ;;  %v6682_v35 = vld [vmem:[#allocation65_spill] sm:$0xff] }
 0x885   :  { %2882 = vmatpush1.bf16.msra.mxu0 %v6586_v33  ;;  %2923 = vmatpush1.bf16.msra.mxu1 %v6587_v40  ;;  %v6683_v33 = vld [vmem:[#allocation66_spill] sm:$0xff]  ;;  %v6684_v40 = vld [vmem:[#allocation67_spill] sm:$0xff] }
 0x886   :  { %2883 = vmatprep.subr.bf16.mxu0 %v5278_v56  ;;  %2924 = vmatprep.subr.bf16.mxu1 %v5281_v10  ;;  %v6672_v56 = vld [vmem:[#allocation58_spill] sm:$0xff]  ;;  %v6673_v10 = vld [vmem:[#allocation59_spill] sm:$0xff] }
 0x889   :  { %2884 = vmatpush1.bf16.msra.mxu0 %v5284_v54  ;;  %2925 = vmatpush1.bf16.msra.mxu1 %v6588_v61  ;;  %v6671_v54 = vld [vmem:[#allocation57_spill] sm:$0xff]  ;;  %v6685_v61 = vld [vmem:[#allocation68_spill] sm:$0xff] }
 0x88a   :  { %3368 = vmatprep.subr.msk.bf16.mxu0 %vm413_vm0, %v4211_v47  ;;  %3370 = vmatprep.subr.msk.bf16.mxu1 %vm413_vm0, %v6590_v41  ;;  %v2954_v47 = vpack.c.b16 %v2953_v57, %v2953_v57  ;;  %v6687_v41 = vld [vmem:[#allocation70_spill] sm:$0xff] }
 0x88b   :  { %v6713_v57 = vld [vmem:[#allocation34_spill] sm:$0xff] }
 0x88c   :  { %2902 = vmatmul.mubr.bf16.vlgmr.msra.gmra.mrb[84].mxu0 %v2761_v58  ;;  %2943 = vmatmul.mubr.bf16.vlgmr.msra.gmra.mrb[84].mxu1 %v2761_v58  ;;  %v6709_v58 = vld [vmem:[#allocation80_spill] sm:$0xff] }
 0x88d   :  { %2959 = vmatpush1.bf16.msra.mxu0 %v4226_v53  ;;  %3000 = vmatpush1.bf16.msra.mxu1 %v6655_v24  ;;  %v6659_v53 = vld [vmem:[#allocation45_spill] sm:$0xff] }
 0x88e   :  { %2990 = vmatprep.mubr.bf16.mxu0 %v6251_v19  ;;  %3031 = vmatprep.mubr.bf16.mxu1 %v6251_v19  ;;  %v6663_v19 = vld [vmem:[#allocation49_spill] sm:$0xff] }
 0x88f   :  { %3069 = vmatprep.subr.bf16.mxu0 %v6656_v51  ;;  %3110 = vmatprep.subr.bf16.mxu1 %v6657_v36  ;;  %v6712_v24 = vld [vmem:[#allocation33_spill] sm:$0xff]  ;;  %v6714_v51 = vld [vmem:[#allocation35_spill] sm:$0xff]  ;;  %v6715_v36 = vld [vmem:[#allocation36_spill] sm:$0xff] }
 0x894   :  { %3369 = vmatmul.mubr.msk.bf16.vlgmr.msra.gmra.mrb[88].mxu0 %vm409_vm2, %v2954_v47  ;;  %3371 = vmatmul.mubr.msk.bf16.vlgmr.msra.gmra.mrb[88].mxu1 %vm409_vm2, %v2954_v47  ;;  %v6716_v47 = vld [vmem:[#allocation37_spill] sm:$0xff] }
 0x895   :  { %3070 = vmatpush1.bf16.msra.mxu0 %v6658_v13  ;;  %3111 = vmatpush1.bf16.msra.mxu1 %v6659_v53  ;;  %v6717_v13 = vld [vmem:[#allocation38_spill] sm:$0xff]  ;;  %v6718_v53 = vld [vmem:[#allocation39_spill] sm:$0xff] }
 0x896   :  { %3071 = vmatprep.subr.bf16.mxu0 %v6660_v29  ;;  %3112 = vmatprep.subr.bf16.mxu1 %v6661_v26  ;;  %v6719_v29 = vld [vmem:[#allocation40_spill] sm:$0xff] }
 0x899   :  { %3072 = vmatpush1.bf16.msra.mxu0 %v6662_v21  ;;  %3113 = vmatpush1.bf16.msra.mxu1 %v6663_v19  ;;  %v6720_v19 = vld [vmem:[#allocation15_spill] sm:$0xff] }
 0x89a   :  { %3073 = vmatprep.subr.bf16.mxu0 %v6664_v20  ;;  %3114 = vmatprep.subr.bf16.mxu1 %v6665_v23 }
 0x89d   :  { %3074 = vmatpush1.bf16.msra.mxu0 %v6666_v16  ;;  %3115 = vmatpush1.bf16.msra.mxu1 %v6667_v32  ;;  %v6721_v32 = vld [vmem:[#allocation14_spill] sm:$0xff] }
 0x89e   :  { %3075 = vmatprep.subr.bf16.mxu0 %v6668_v9  ;;  %3116 = vmatprep.subr.bf16.mxu1 %v6669_v15 }
 0x8a1   :  { %3076 = vmatpush1.bf16.msra.mxu0 %v6670_v27  ;;  %3117 = vmatpush1.bf16.msra.mxu1 %v6671_v54 }
 0x8a2   :  { %3077 = vmatprep.subr.bf16.mxu0 %v6672_v56  ;;  %3118 = vmatprep.subr.bf16.mxu1 %v6673_v10 }
 0x8a5   :  { %3078 = vmatpush1.bf16.msra.mxu0 %v6674_v63  ;;  %3119 = vmatpush1.bf16.msra.mxu1 %v6675_v62  ;;  %v6722_v62 = vld [vmem:[#allocation16_spill] sm:$0xff] }
 0x8a6   :  { %3079 = vmatprep.subr.bf16.mxu0 %v6676_v55  ;;  %3120 = vmatprep.subr.bf16.mxu1 %v6677_v46 }
 0x8a9   :  { %3080 = vmatpush1.bf16.msra.mxu0 %v6678_v8  ;;  %3121 = vmatpush1.bf16.msra.mxu1 %v6679_v22  ;;  %v6723_v8 = vld [vmem:[#allocation17_spill] sm:$0xff] }
 0x8aa   :  { %3081 = vmatprep.subr.bf16.mxu0 %v6680_v12  ;;  %3122 = vmatprep.subr.bf16.mxu1 %v6681_v17 }
 0x8ad   :  { %3082 = vmatpush1.bf16.msra.mxu0 %v6682_v35  ;;  %3123 = vmatpush1.bf16.msra.mxu1 %v6683_v33 }
 0x8ae   :  { %3083 = vmatprep.subr.bf16.mxu0 %v6684_v40  ;;  %3124 = vmatprep.subr.bf16.mxu1 %v6685_v61 }
 0x8b1   :  { %3084 = vmatpush1.bf16.msra.mxu0 %v6686_v45  ;;  %3125 = vmatpush1.bf16.msra.mxu1 %v6687_v41 }
 0x8b2   :  { %3085 = vmatprep.subr.bf16.mxu0 %v6688_v14  ;;  %3126 = vmatprep.subr.bf16.mxu1 %v6689_v11 }
 0x8b5   :  { %3086 = vmatpush1.bf16.msra.mxu0 %v6690_v52  ;;  %3127 = vmatpush1.bf16.msra.mxu1 %v6691_v34  ;;  %v6724_v52 = vld [vmem:[#allocation9_spill] sm:$0xff] }
 0x8b6   :  { %3087 = vmatprep.subr.bf16.mxu0 %v6692_v18  ;;  %3128 = vmatprep.subr.bf16.mxu1 %v6693_v42 }
 0x8b9   :  { %3088 = vmatpush1.bf16.msra.mxu0 %v6694_v7  ;;  %3129 = vmatpush1.bf16.msra.mxu1 %v6695_v25 }
 0x8ba   :  { %3089 = vmatprep.subr.bf16.mxu0 %v6696_v48  ;;  %3130 = vmatprep.subr.bf16.mxu1 %v6697_v3 }
 0x8bd   :  { %3090 = vmatpush1.bf16.msra.mxu0 %v6698_v37  ;;  %3131 = vmatpush1.bf16.msra.mxu1 %v6699_v50 }
 0x8be   :  { %3091 = vmatprep.subr.bf16.mxu0 %v6700_v4  ;;  %3132 = vmatprep.subr.bf16.mxu1 %v6701_v49 }
 0x8c1   :  { %3092 = vmatpush1.bf16.msra.mxu0 %v6702_v5  ;;  %3133 = vmatpush1.bf16.msra.mxu1 %v6703_v1 }
 0x8c2   :  { %3093 = vmatprep.subr.bf16.mxu0 %v6704_v60  ;;  %3134 = vmatprep.subr.bf16.mxu1 %v6705_v59 }
 0x8c5   :  { %3094 = vmatpush1.bf16.msra.mxu0 %v6706_v0  ;;  %3135 = vmatpush1.bf16.msra.mxu1 %v6707_v30 }
 0x8c6   :  { %3095 = vmatprep.subr.bf16.mxu0 %v6708_v44  ;;  %3136 = vmatprep.subr.bf16.mxu1 %v6709_v58 }
 0x8c9   :  { %3096 = vmatpush1.bf16.msra.mxu0 %v6710_v28  ;;  %3137 = vmatpush1.bf16.msra.mxu1 %v6711_v38 }
 0x8ca   :  { %3097 = vmatprep.subr.bf16.mxu0 %v6712_v24  ;;  %3138 = vmatprep.subr.bf16.mxu1 %v6713_v57 }
 0x8cd   :  { %3098 = vmatpush1.bf16.msra.mxu0 %v6714_v51  ;;  %3139 = vmatpush1.bf16.msra.mxu1 %v6715_v36 }
 0x8ce   :  { %3099 = vmatprep.subr.bf16.mxu0 %v6716_v47  ;;  %3140 = vmatprep.subr.bf16.mxu1 %v6717_v13 }
 0x8d1   :  { %3100 = vmatpush1.bf16.msra.mxu0 %v6718_v53  ;;  %3141 = vmatpush1.bf16.msra.mxu1 %v6719_v29 }
 0x93f   :  { %v2796_v26 = vpop.f32.mrb[80].mxu0  ;;  %v2837_v21 = vpop.f32.mrb[80].mxu1 }
 0x940   :  { %v2797_v20 = vadd.f32 %v2796_v26, %v6720_v19  ;;  %v2798_v23 = vpop.f32.mrb[81].mxu0  ;;  %v2839_v16 = vpop.f32.mrb[81].mxu1  ;;  %v2838_v22 = vadd.f32 %v2837_v21, %v6723_v8 }
 0x941   :  { %v2799_v9 = vadd.f32 %v2798_v23, %v6721_v32  ;;  %v2800_v15 = vpop.f32.mrb[82].mxu0  ;;  %v2841_v27 = vpop.f32.mrb[82].mxu1  ;;  %v2840_v55 = vadd.f32 %v2839_v16, %v6722_v62 }
 0x942   :  { %v3365_v54 = vmul.f32 -1.442695, %v2797_v20  ;;  %v2801_v56 = vpop.f32.mrb[83].mxu0  ;;  %v2842_v10 = vpop.f32.mrb[83].mxu1 }
 0x943   :  { %v3366_v63 = vmul.f32 -1.442695, %v2799_v9  ;;  %v3367_v46 = vmul.f32 -1.442695, %v2840_v55 }
 0x944   :  { %3739 = vpow2.f32 %v3365_v54 }
 0x945   :  { %3741 = vpow2.f32 %v3366_v63 }
 0x946   :  { %3743 = vpow2.f32 %v3367_v46 }
 0x947   :  { %3745 = vtanh.f32 %v2838_v22 }
 0x94e   :  { %v3740_v12 = vpop.eup %3739 }
 0x94f   :  { %v3742_v17 = vpop.eup %3741  ;;  %v2847_v35 = vadd.f32 1.0, %v3740_v12 }
 0x950   :  { %v2853_v33 = vadd.f32 1.0, %v3742_v17  ;;  %v3744_v40 = vpop.eup %3743 }
 0x951   :  { %3747 = vrcp.f32 %v2847_v35  ;;  %v3746_v61 = vpop.eup %3745  ;;  %v2860_v11 = vadd.f32 1.0, %v3744_v40 }
 0x952   :  { %3749 = vrcp.f32 %v2853_v33 }
 0x953   :  { %3751 = vrcp.f32 %v2860_v11 }
 0x95b   :  { %v3748_v45 = vpop.eup %3747 }
 0x95c   :  { %v3750_v41 = vpop.eup %3749  ;;  %v2864_v14 = vmul.f32 %v3748_v45, %v3746_v61 }
 0x95d   :  { %v2863_v34 = vmul.f32 %v3750_v41, %v6724_v52  ;;  %v3752_v38 = vpop.eup %3751 }
 0x95f   :  { %v2903_v18 = vpop.f32.mrb[84].mxu0  ;;  %v2944_v42 = vpop.f32.mrb[84].mxu1  ;;  %v5760_v7 = vadd.f32 %v2864_v14, %v2863_v34 }
 0x960   :  { %v2905_v25 = vpop.f32.mrb[85].mxu0  ;;  %v2946_v48 = vpop.f32.mrb[85].mxu1 }
 0x961   :  { %v2907_v3 = vpop.f32.mrb[86].mxu0  ;;  %v2948_v37 = vpop.f32.mrb[86].mxu1  ;;  %3753 = vtanh.f32 %v5760_v7 }
 0x962   :  { %v2908_v50 = vpop.f32.mrb[87].mxu0  ;;  %v2949_v4 = vpop.f32.mrb[87].mxu1 }
 0x967   :  { %v2992_v49 = vpop.f32.mrb[88].mxu0  ;;  %v3033_v5 = vpop.f32.mrb[88].mxu1 }
 0x968   :  { %v2993_v1 = vadd.f32 %v2992_v49, %v2903_v18  ;;  %v3034_v60 = vadd.f32 %v3033_v5, %v2944_v42  ;;  %v2994_v59 = vpop.f32.mrb[89].mxu0  ;;  %v3035_v0 = vpop.f32.mrb[89].mxu1 }
 0x969   :  { %v2995_v30 = vadd.f32 %v2994_v59, %v2905_v25  ;;  %v3036_v44 = vadd.f32 %v3035_v0, %v2946_v48  ;;  %v2996_v58 = vpop.f32.mrb[90].mxu0  ;;  %v3037_v28 = vpop.f32.mrb[90].mxu1  ;;  %v3378_v0 = vld [vmem:[%s5786_s6] ss:$0 sm:$0xff] }
 0x96a   :  { %v3040_v24 = vadd.f32 %v2993_v1, %v4447_v2  ;;  %v2997_v57 = vpop.f32.mrb[91].mxu0  ;;  %v3038_v51 = vpop.f32.mrb[91].mxu1  ;;  %v3042_v23 = vadd.f32 %v3034_v60, %v4464_v31  ;;  %v3379_v28 = vld [vmem:[#allocation2] ss:$0 sm:$0xff] }
 0x96b   :  { %v3754_v36 = vpop.eup %3753  ;;  %v3041_v47 = vadd.f32 %v2995_v30, %v4451_v39  ;;  %v3043_v21 = vadd.f32 %v3036_v44, %v4458_v6 }
 0x96c   :  { %v3372_v13 = vmul.f32 -1.442695, %v3040_v24  ;;  %v2867_v53 = vmul.f32 %v3754_v36, %v3752_v38 }
 0x96d   :  { %v3373_v29 = vmul.f32 -1.442695, %v3041_v47  ;;  %v3374_v20 = vmul.f32 -1.442695, %v3043_v21 }
 0x96e   :  { %3755 = vpow2.f32 %v3372_v13  ;;  %v2868_v26 = vpack.c.bf16 %v2867_v53, %v2867_v53 }
 0x96f   :  { %3757 = vpow2.f32 %v3373_v29 }
 0x970   :  { %3101 = vmatprep.mubr.bf16.mxu0 %v2868_v26  ;;  %3142 = vmatprep.mubr.bf16.mxu1 %v2868_v26  ;;  %3759 = vpow2.f32 %v3374_v20 }
 0x971   :  { %3761 = vtanh.f32 %v3042_v23 }
 0x978   :  { %v3756_v16 = vpop.eup %3755 }
 0x979   :  { %v3758_v2 = vpop.eup %3757  ;;  %v3047_v9 = vadd.f32 1.0, %v3756_v16 }
 0x97a   :  { %v3053_v15 = vadd.f32 1.0, %v3758_v2  ;;  %v3760_v39 = vpop.eup %3759 }
 0x97b   :  { %3763 = vrcp.f32 %v3047_v9  ;;  %v3762_v27 = vpop.eup %3761  ;;  %v3060_v63 = vadd.f32 1.0, %v3760_v39 }
 0x97c   :  { %3765 = vrcp.f32 %v3053_v15 }
 0x97d   :  { %3767 = vrcp.f32 %v3060_v63 }
 0x985   :  { %v3764_v54 = vpop.eup %3763 }
 0x986   :  { %v3766_v56 = vpop.eup %3765  ;;  %v3064_v10 = vmul.f32 %v3764_v54, %v3762_v27 }
 0x987   :  { %v3063_v55 = vmul.f32 %v3766_v56, %v5643_v43  ;;  %v3768_v31 = vpop.eup %3767 }
 0x989   :  { %v3065_v6 = vadd.f32 %v3064_v10, %v3063_v55 }
 0x98b   :  { %3769 = vtanh.f32 %v3065_v6 }
 0x995   :  { %v3770_v46 = vpop.eup %3769 }
 0x996   :  { %v3067_v22 = vmul.f32 %v3770_v46, %v3768_v31 }
 0x998   :  { %v3068_v12 = vpack.c.bf16 %v3067_v22, %v3067_v22 }
 0x99a   :  { %3102 = vmatmul.mubr.bf16.vlgmr.msra.gmra.mrb[92].mxu0 %v3068_v12  ;;  %3143 = vmatmul.mubr.bf16.vlgmr.msra.gmra.mrb[92].mxu1 %v3068_v12 }
 0xa6d   :  { %v3103_v17 = vpop.f32.mrb[92].mxu0  ;;  %v3144_v35 = vpop.f32.mrb[92].mxu1 }
 0xa6e   :  { %v3104_v33 = vadd.f32 %v3103_v17, %v6720_v19  ;;  %v3105_v40 = vpop.f32.mrb[93].mxu0  ;;  %v3146_v61 = vpop.f32.mrb[93].mxu1  ;;  %v3145_v25 = vadd.f32 %v3144_v35, %v6723_v8 }
 0xa6f   :  { %v3106_v45 = vadd.f32 %v3105_v40, %v6721_v32  ;;  %v3107_v41 = vpop.f32.mrb[94].mxu0  ;;  %v3148_v14 = vpop.f32.mrb[94].mxu1  ;;  %v3147_v18 = vadd.f32 %v3146_v61, %v6722_v62 }
 0xa70   :  { %v3375_v43 = vmul.f32 -1.442695, %v3104_v33  ;;  %v3108_v11 = vpop.f32.mrb[95].mxu0  ;;  %v3149_v52 = vpop.f32.mrb[95].mxu1 }
 0xa71   :  { %v3376_v34 = vmul.f32 -1.442695, %v3106_v45  ;;  %v3377_v42 = vmul.f32 -1.442695, %v3147_v18 }
 0xa72   :  { %3771 = vpow2.f32 %v3375_v43 }
 0xa73   :  { %3773 = vpow2.f32 %v3376_v34 }
 0xa74   :  { %3775 = vpow2.f32 %v3377_v42 }
 0xa75   :  { %3777 = vtanh.f32 %v3145_v25 }
 0xa7c   :  { %v3772_v48 = vpop.eup %3771 }
 0xa7d   :  { %v3774_v3 = vpop.eup %3773  ;;  %v3154_v19 = vadd.f32 1.0, %v3772_v48 }
 0xa7e   :  { %v3160_v37 = vadd.f32 1.0, %v3774_v3  ;;  %v3776_v32 = vpop.eup %3775 }
 0xa7f   :  { %3779 = vrcp.f32 %v3154_v19  ;;  %v3778_v50 = vpop.eup %3777  ;;  %v3167_v1 = vadd.f32 1.0, %v3776_v32 }
 0xa80   :  { %3781 = vrcp.f32 %v3160_v37 }
 0xa81   :  { %3783 = vrcp.f32 %v3167_v1 }
 0xa89   :  { %v3780_v4 = vpop.eup %3779 }
 0xa8a   :  { %v3782_v49 = vpop.eup %3781  ;;  %v3171_v5 = vmul.f32 %v3780_v4, %v3778_v50 }
 0xa8b   :  { %v3170_v60 = vmul.f32 %v3782_v49, %v5760_v7  ;;  %v3784_v8 = vpop.eup %3783 }
 0xa8d   :  { %v3172_v62 = vadd.f32 %v3171_v5, %v3170_v60 }
 0xa8f   :  { %3785 = vtanh.f32 %v3172_v62 }
 0xa99   :  { %v3786_v59 = vpop.eup %3785 }
 0xa9a   :  { %v3174_v30 = vmul.f32 %v3786_v59, %v3784_v8 }
 0xa9c   :  { %v3182_v44 = vmul.f32 %v3378_v0, %v3174_v30 }
 0xa9e   :  { %v3183_v58 = vsel %vm413_vm0, %v3182_v44, 0.0 }
 0xa9f   :  { %3184 = vadd.xlane.f32.xlu0 %v3183_v58 }
 0xb2c   :  { %v3185_v38 = vpop.xlane.xlu0 %3184 }
 0xb2d   :  { %v3193_v24 = vadd.f32 %v3379_v28, %v3185_v38 }
 0xb2f   :  { %3195 = vst.msk [vmem:[%s5788_s8] sm:$0x3] %vm3194_vm3, %v3193_v24 }
 0xb30   :  { %3200 = vsyncpa [#allocation4], 1 }
 0xb31   :  { %3201 = vsyncpa [#allocation6], 1 }

</bundles_post_ra>
